<compile_context>
chip_gen: v7x
topology: tpu7x:2x2x1
jax: 0.10.0
libtpu: 0.0.40
codegen_flags: <defaults>
</compile_context>

<pallas_src>
import functools
import math

import jax
import jax.numpy as jnp
from jax import lax
from jax.experimental import pallas as pl
from jax.experimental.pallas import tpu as pltpu


# ------------------------------ fused kernel --------------------------------

def _annotator_kernel(
    x_ref,      # (1, BP*S, 3)   pooled image tokens for this grid step
    bb_ref,     # (4, CH)        rows 0-2: 1x1-conv weight, row 3: bias
    pw_ref,     # (CH, D) bf16   2048 -> D projection weight
    misc_ref,   # (2C+3, D)      [query_emb(C); fc_w(C); proj_b; final_ln_g; final_ln_b]
    aw_ref,     # (NL, 8, D, D) bf16  [swq swk swv swo cwq cwk cwv cwo]
    avec_ref,   # (NL, 16, D)    per-layer biases / LN vectors (row 15 = pad)
    w1_ref,     # (NL, D, F) bf16
    b1_ref,     # (NL, 1, F)
    w2_ref,     # (NL, F, D) bf16
    fcb_ref,    # (1, C)
    out_ref,    # (1, BP, C*S + C)   packed [attn flattened | y]
    *, num_heads, num_layers, norm_first, remove_self_attn,
    keep_query_position, batch_per_step, num_classes, num_tokens, eps):

    f32 = jnp.float32
    cdt = jnp.bfloat16                     # MXU operand dtype (f32 accumulate)
    bp = batch_per_step
    c = num_classes
    s = num_tokens
    d = misc_ref.shape[-1]
    dh = d // num_heads
    scale = 1.0 / math.sqrt(dh)
    bt = bp * s                            # folded batch*token rows

    def layernorm(x, g, b):
        mu = jnp.mean(x, axis=-1, keepdims=True)
        xc = x - mu
        var = jnp.mean(xc * xc, axis=-1, keepdims=True)
        return xc * lax.rsqrt(var + eps) * g + b

    # ------------- backbone stand-in + 2048->D projection (fused) -----------
    # TODO(synk): pretrained timm TResNet backbone has no in-script equivalent;
    # deterministic stand-in = avg-pool (wrapper) + 1x1 conv (3->CH) + ReLU,
    # fused here with the Head's 1x1 linear projection (CH->D) + ReLU.
    x = x_ref[0]                                        # (bt, 3) f32
    x0, x1, x2 = x[:, 0:1], x[:, 1:2], x[:, 2:3]
    ch = bb_ref.shape[-1]
    ch_chunk = 512 if ch % 512 == 0 else ch

    # Chunked over CH: never materialise the full (bt, CH) f32 feature map.
    mem = jnp.zeros((bt, d), f32)
    for c0 in range(0, ch, ch_chunk):
        wb = bb_ref[:, c0:c0 + ch_chunk]                # (4, chunk)
        f = x0 * wb[0:1] + x1 * wb[1:2] + x2 * wb[2:3] + wb[3:4]
        f = jnp.maximum(f, 0.0).astype(cdt)             # (bt, chunk) bf16
        mem = mem + jnp.dot(f, pw_ref[c0:c0 + ch_chunk, :],
                            preferred_element_type=f32)

    tail = misc_ref[2 * c:2 * c + 3]                    # (3, D)
    proj_b, flng, flnb = tail[0:1], tail[1:2], tail[2:3]
    mem = jnp.maximum(mem + proj_b, 0.0)                # (bt, D) memory tokens

    qe = misc_ref[0:c]                                  # (C, D) label embeddings
    fcw = misc_ref[c:2 * c]                             # (C, D) classifier weight

    qpos = jnp.concatenate([qe] * bp, axis=0) if bp > 1 else qe   # (bp*C, D)
    tgt = qpos

    # ------------------------------ decoder ---------------------------------
    # TODO(synk): the custom `Transformer` source is not provided; implemented
    # as a DETR/query2label-style decoder (label embeddings double as query
    # positional encodings when keep_query_position=True), eval mode (no dropout).
    def mha(xq, xk, xv, wq, wk, wv, wo, bq, bk, bv, bo, n_kv, need_probs):
        # Fused projections: one (rows, D) @ (D, D) matmul each.
        q = jnp.dot(xq.astype(cdt), wq, preferred_element_type=f32) + bq
        k = jnp.dot(xk.astype(cdt), wk, preferred_element_type=f32) + bk
        v = jnp.dot(xv.astype(cdt), wv, preferred_element_type=f32) + bv
        ctx_rows, probs_rows = [], []
        for bi in range(bp):                            # attention stays per-image
            qb = q[bi * c:(bi + 1) * c]                 # (C, D)
            kb = k[bi * n_kv:(bi + 1) * n_kv]           # (n_kv, D)
            vb = v[bi * n_kv:(bi + 1) * n_kv]
            qh = jnp.stack([qb[:, h * dh:(h + 1) * dh] for h in range(num_heads)])
            kh = jnp.stack([kb[:, h * dh:(h + 1) * dh] for h in range(num_heads)])
            vh = jnp.stack([vb[:, h * dh:(h + 1) * dh] for h in range(num_heads)])
            sc = jnp.einsum('hqk,hsk->hqs', qh, kh,
                            preferred_element_type=f32) * scale   # (H, C, n_kv)
            sc = sc - jnp.max(sc, axis=-1, keepdims=True)
            p = jnp.exp(sc)
            p = p / jnp.sum(p, axis=-1, keepdims=True)            # exact softmax
            cx = jnp.einsum('hqs,hsk->hqk', p, vh,
                            preferred_element_type=f32)           # (H, C, dh)
            ctx_rows.append(
                jnp.concatenate([cx[h] for h in range(num_heads)], axis=-1))
            if need_probs:
                probs_rows.append(jnp.mean(p, axis=0))            # (C, n_kv)
        ctx = jnp.concatenate(ctx_rows, axis=0) if bp > 1 else ctx_rows[0]
        # Single fused output projection (vs H per-head matmuls + head-sum).
        out = jnp.dot(ctx.astype(cdt), wo, preferred_element_type=f32) + bo
        probs = jnp.stack(probs_rows, axis=0) if need_probs else None
        return out, probs

    def ffn(xin, l, b2):
        h1 = jnp.dot(xin.astype(cdt), w1_ref[l],
                     preferred_element_type=f32) + b1_ref[l]
        h1 = jnp.maximum(h1, 0.0)
        return jnp.dot(h1.astype(cdt), w2_ref[l],
                       preferred_element_type=f32) + b2

    attn_probs = None
    for l in range(num_layers):
        vecs = avec_ref[l]                              # (16, D) f32
        sbq, sbk, sbv, sbo = vecs[0:1], vecs[1:2], vecs[2:3], vecs[3:4]
        cbq, cbk, cbv, cbo = vecs[4:5], vecs[5:6], vecs[6:7], vecs[7:8]
        b2 = vecs[8:9]
        ln1g, ln1b = vecs[9:10], vecs[10:11]
        ln2g, ln2b = vecs[11:12], vecs[12:13]
        ln3g, ln3b = vecs[13:14], vecs[14:15]

        if not remove_self_attn:
            t = layernorm(tgt, ln1g, ln1b) if norm_first else tgt
            qk_in = t + qpos if keep_query_position else t
            sa, _ = mha(qk_in, qk_in, t,
                        aw_ref[l, 0], aw_ref[l, 1], aw_ref[l, 2], aw_ref[l, 3],
                        sbq, sbk, sbv, sbo, n_kv=c, need_probs=False)
            tgt = (tgt + sa) if norm_first else layernorm(tgt + sa, ln1g, ln1b)

        need_probs = (l == num_layers - 1)              # only the returned map
        t = layernorm(tgt, ln2g, ln2b) if norm_first else tgt
        q_in = t + qpos if keep_query_position else t
        ca, probs = mha(q_in, mem, mem,
                        aw_ref[l, 4], aw_ref[l, 5], aw_ref[l, 6], aw_ref[l, 7],
                        cbq, cbk, cbv, cbo, n_kv=s, need_probs=need_probs)
        if need_probs:
            attn_probs = probs

        if norm_first:
            tgt = tgt + ca
            tgt = tgt + ffn(layernorm(tgt, ln3g, ln3b), l, b2)
        else:
            tgt = layernorm(tgt + ca, ln2g, ln2b)
            tgt = layernorm(tgt + ffn(tgt, l, b2), ln3g, ln3b)

    # TODO(synk): final LayerNorm applied unconditionally (query2label-style
    # decoder norm); verify against the reference `Transformer` if available.
    tgt = layernorm(tgt, flng, flnb)

    # classifier: (w * hidden_state).sum(-1) + b
    tgt3 = tgt.reshape(bp, c, d)
    y = jnp.sum(fcw[None, :, :] * tgt3, axis=-1) + fcb_ref[...]   # (bp, C)

    if attn_probs is None:
        attn_probs = jnp.zeros((bp, c, s), f32)

    # Lane-dense packed output: per image [attn flattened row-major | y].
    for ci in range(c):
        out_ref[0, :, ci * s:(ci + 1) * s] = attn_probs[:, ci, :]
    out_ref[0, :, c * s:] = y


# ---------------------------- wrapper / packing ------------------------------

def _pack_params(params, cfg):
    d = cfg["hidden_size"]
    c = cfg["num_classes"]
    layers = params["transformer"]["layers"]
    bf16, f32 = jnp.bfloat16, jnp.float32

    # backbone 1x1 conv weight + bias packed as rows of one (4, CH) slab
    bb = jnp.concatenate(
        [params["bb_w"], params["bb_b"].reshape(1, -1)], axis=0).astype(f32)

    pw = params["proj_w"].astype(bf16)                           # (CH, D)

    # misc D-wide slab: [query_emb; fc_w; proj_b; final_ln_g; final_ln_b]
    misc = jnp.concatenate([
        params["query_emb"].reshape(c, d),
        params["fc_w"].reshape(c, d),
        params["proj_b"].reshape(1, d),
        params["transformer"]["final_ln_g"].reshape(1, d),
        params["transformer"]["final_ln_b"].reshape(1, d),
    ], axis=0).astype(f32)                                       # (2C+3, D)

    def attn_w(lp):
        sa, ca = lp["self_attn"], lp["cross_attn"]
        return jnp.stack([sa["wq"], sa["wk"], sa["wv"], sa["wo"],
                          ca["wq"], ca["wk"], ca["wv"], ca["wo"]], axis=0)
    aw = jnp.stack([attn_w(lp) for lp in layers]).astype(bf16)   # (NL, 8, D, D)

    def layer_vecs(lp):
        sa, ca = lp["self_attn"], lp["cross_attn"]
        rows = [sa["bq"], sa["bk"], sa["bv"], sa["bo"],
                ca["bq"], ca["bk"], ca["bv"], ca["bo"],
                lp["ffn"]["b2"],
                lp["ln1_g"], lp["ln1_b"], lp["ln2_g"], lp["ln2_b"],
                lp["ln3_g"], lp["ln3_b"],
                jnp.zeros((d,), f32)]                            # pad row
        return jnp.stack([r.reshape(d) for r in rows], axis=0)
    avec = jnp.stack([layer_vecs(lp) for lp in layers]).astype(f32)  # (NL,16,D)

    w1 = jnp.stack([lp["ffn"]["w1"] for lp in layers]).astype(bf16)  # (NL,D,F)
    b1 = jnp.stack([lp["ffn"]["b1"].reshape(1, -1) for lp in layers]).astype(f32)
    w2 = jnp.stack([lp["ffn"]["w2"] for lp in layers]).astype(bf16)  # (NL,F,D)

    fcb = params["fc_b"].reshape(1, c).astype(f32)

    return [bb, pw, misc, aw, avec, w1, b1, w2, fcb]


def annotator_forward(images, params, cfg):
    """images: (B, 3, S, S) NCHW -> (y_hats (B, C), attn (B, C, E*E))."""
    b, cin, side, _ = images.shape
    c = cfg["num_classes"]
    e = cfg["encoded_size"]
    pool = side // e
    n_tok = e * e

    # NCHW -> avg-pooled channels-last tokens (B, E*E, 3); cheap, left to XLA.
    x = images.astype(jnp.float32).reshape(b, cin, e, pool, e, pool).mean(axis=(3, 5))
    x = jnp.transpose(x, (0, 2, 3, 1)).reshape(b, n_tok, cin)

    # Fold the batch into the kernel body; at most 2 "parallel" grid programs
    # (one per TensorCore on v7x, single pass on v5e/v6e for odd B).
    progs = 2 if (b % 2 == 0 and b >= 2) else 1
    bp = b // progs
    x = x.reshape(progs, bp * n_tok, cin)

    flat = _pack_params(params, cfg)

    def const_spec(a):
        zeros = (0,) * a.ndim
        return pl.BlockSpec(a.shape, lambda i, _z=zeros: _z)

    width = c * n_tok + c                      # packed [attn(C*S) | y(C)]
    kernel = functools.partial(
        _annotator_kernel,
        num_heads=cfg["num_heads"], num_layers=cfg["num_decoder_layers"],
        norm_first=cfg["norm_first"], remove_self_attn=cfg["remove_self_attn"],
        keep_query_position=cfg["keep_query_position"],
        batch_per_step=bp, num_classes=c, num_tokens=n_tok, eps=1e-5)

    out = pl.pallas_call(
        kernel,
        grid=(progs,),
        in_specs=[pl.BlockSpec((1, bp * n_tok, cin), lambda i: (i, 0, 0))]
                 + [const_spec(a) for a in flat],
        out_specs=pl.BlockSpec((1, bp, width), lambda i: (i, 0, 0)),
        out_shape=jax.ShapeDtypeStruct((progs, bp, width), jnp.float32),
        compiler_params=pltpu.CompilerParams(
            dimension_semantics=("parallel",)),   # shard across TCs on v7x
    )(x, *flat)

    out = out.reshape(b, width)
    attn = out[:, :c * n_tok].reshape(b, c, n_tok)
    y = out[:, c * n_tok:]
    return y, attn


# ------------------------------ parameter init ------------------------------

def init_params(key, cfg):
    c, d, f, ch = (cfg["num_classes"], cfg["hidden_size"],
                   cfg["feedforward_size"], cfg["channel_size"])
    keys = iter(jax.random.split(key, 64))

    def xavier(k, shape):
        fan_in, fan_out = shape[-2], shape[-1]
        std = math.sqrt(2.0 / (fan_in + fan_out))
        return jax.random.normal(k, shape, jnp.float32) * std

    def attn_params():
        return {
            "wq": xavier(next(keys), (d, d)), "wk": xavier(next(keys), (d, d)),
            "wv": xavier(next(keys), (d, d)), "wo": xavier(next(keys), (d, d)),
            "bq": jnp.zeros((d,), jnp.float32), "bk": jnp.zeros((d,), jnp.float32),
            "bv": jnp.zeros((d,), jnp.float32), "bo": jnp.zeros((d,), jnp.float32),
        }

    layers = []
    for _ in range(cfg["num_decoder_layers"]):
        layers.append({
            "self_attn": attn_params(),
            "cross_attn": attn_params(),
            "ffn": {"w1": xavier(next(keys), (d, f)),
                    "b1": jnp.zeros((f,), jnp.float32),
                    "w2": xavier(next(keys), (f, d)),
                    "b2": jnp.zeros((d,), jnp.float32)},
            "ln1_g": jnp.ones((d,), jnp.float32), "ln1_b": jnp.zeros((d,), jnp.float32),
            "ln2_g": jnp.ones((d,), jnp.float32), "ln2_b": jnp.zeros((d,), jnp.float32),
            "ln3_g": jnp.ones((d,), jnp.float32), "ln3_b": jnp.zeros((d,), jnp.float32),
        })

    return {
        "bb_w": xavier(next(keys), (3, ch)), "bb_b": jnp.zeros((ch,), jnp.float32),
        "proj_w": xavier(next(keys), (ch, d)), "proj_b": jnp.zeros((d,), jnp.float32),
        "query_emb": jax.random.normal(next(keys), (c, d), jnp.float32),
        "transformer": {"layers": layers,
                        "final_ln_g": jnp.ones((d,), jnp.float32),
                        "final_ln_b": jnp.zeros((d,), jnp.float32)},
        "fc_w": xavier(next(keys), (1, c, d)),        # nn.init.xavier_normal_
        "fc_b": jnp.zeros((1, c), jnp.float32),       # nn.init.constant_(b, 0)
    }


# ----------------------------------- main -----------------------------------

if __name__ == "__main__":
    cfg = dict(num_classes=16, hidden_size=32, num_heads=4, num_decoder_layers=2,
               feedforward_size=64, norm_first=False, remove_self_attn=False,
               keep_query_position=True, channel_size=2048, encoded_size=4)

    key = jax.random.PRNGKey(0)
    pkey, ikey = jax.random.split(key)
    params = init_params(pkey, cfg)
    images = jax.random.normal(ikey, (2, 3, 16, 16), jnp.float32)

    fwd = jax.jit(lambda imgs, p: annotator_forward(imgs, p, cfg))
    y_hats, attn_weights = fwd(images, params)
    jax.block_until_ready((y_hats, attn_weights))

    assert y_hats.shape == (2, cfg["num_classes"])
    assert attn_weights.shape == (2, cfg["num_classes"], cfg["encoded_size"] ** 2)
    assert bool(jnp.all(jnp.isfinite(y_hats)))
    assert bool(jnp.all(jnp.isfinite(attn_weights)))
    # attention rows are softmax-normalised
    assert bool(jnp.all(jnp.abs(attn_weights.sum(-1) - 1.0) < 1e-3))
    print("KERNEL_OK")
</pallas_src>

<mosaic_0001>
module attributes {stable_mosaic.version = 11 : i64} {
  func.func @_annotator_kernel(%arg0: i32, %arg1: memref<1x16x3xf32, #tpu.memory_space<vmem>>, %arg2: memref<4x2048xf32, #tpu.memory_space<vmem>>, %arg3: memref<2048x32xbf16, #tpu.memory_space<vmem>>, %arg4: memref<35x32xf32, #tpu.memory_space<vmem>>, %arg5: memref<2x8x32x32xbf16, #tpu.memory_space<vmem>>, %arg6: memref<2x16x32xf32, #tpu.memory_space<vmem>>, %arg7: memref<2x32x64xbf16, #tpu.memory_space<vmem>>, %arg8: memref<2x1x64xf32, #tpu.memory_space<vmem>>, %arg9: memref<2x64x32xbf16, #tpu.memory_space<vmem>>, %arg10: memref<1x16xf32, #tpu.memory_space<vmem>>, %arg11: memref<1x1x272xf32, #tpu.memory_space<vmem>>) attributes {dimension_semantics = [#tpu.dimension_semantics<parallel>], iteration_bounds = array<i64: 2>, scalar_prefetch = 0 : i64, scratch_operands = 0 : i64, tpu.core_type = #tpu.core_type<tc>, window_params = [{transform_indices = @transform_0, window_bounds = array<i64: 1, 16, 3>}, {pipeline_mode = #tpu.pipeline_mode<synchronous>, transform_indices = @transform_1, window_bounds = array<i64: 4, 2048>}, {pipeline_mode = #tpu.pipeline_mode<synchronous>, transform_indices = @transform_2, window_bounds = array<i64: 2048, 32>}, {pipeline_mode = #tpu.pipeline_mode<synchronous>, transform_indices = @transform_3, window_bounds = array<i64: 35, 32>}, {pipeline_mode = #tpu.pipeline_mode<synchronous>, transform_indices = @transform_4, window_bounds = array<i64: 2, 8, 32, 32>}, {pipeline_mode = #tpu.pipeline_mode<synchronous>, transform_indices = @transform_5, window_bounds = array<i64: 2, 16, 32>}, {pipeline_mode = #tpu.pipeline_mode<synchronous>, transform_indices = @transform_6, window_bounds = array<i64: 2, 32, 64>}, {pipeline_mode = #tpu.pipeline_mode<synchronous>, transform_indices = @transform_7, window_bounds = array<i64: 2, 1, 64>}, {pipeline_mode = #tpu.pipeline_mode<synchronous>, transform_indices = @transform_8, window_bounds = array<i64: 2, 64, 32>}, {pipeline_mode = #tpu.pipeline_mode<synchronous>, transform_indices = @transform_9, window_bounds = array<i64: 1, 16>}, {transform_indices = @transform_10, window_bounds = array<i64: 1, 1, 272>}]} {
    %c0 = arith.constant 0 : index
    %c0_0 = arith.constant 0 : index
    %c0_1 = arith.constant 0 : index
    %0 = vector.load %arg1[%c0, %c0_0, %c0_1] : memref<1x16x3xf32, #tpu.memory_space<vmem>>, vector<1x16x3xf32>
    %1 = vector.shape_cast %0 : vector<1x16x3xf32> to vector<16x3xf32>
    %2 = vector.extract_strided_slice %1 {offsets = [0, 0], sizes = [16, 1], strides = [1, 1]} : vector<16x3xf32> to vector<16x1xf32>
    %3 = vector.extract_strided_slice %1 {offsets = [0, 1], sizes = [16, 1], strides = [1, 1]} : vector<16x3xf32> to vector<16x1xf32>
    %4 = vector.extract_strided_slice %1 {offsets = [0, 2], sizes = [16, 1], strides = [1, 1]} : vector<16x3xf32> to vector<16x1xf32>
    %cst = arith.constant 0.000000e+00 : f32
    %5 = vector.broadcast %cst : f32 to vector<16x32xf32>
    %c0_2 = arith.constant 0 : index
    %c0_3 = arith.constant 0 : index
    %6 = vector.load %arg2[%c0_2, %c0_3] : memref<4x2048xf32, #tpu.memory_space<vmem>>, vector<4x512xf32>
    %7 = vector.extract_strided_slice %6 {offsets = [0, 0], sizes = [1, 512], strides = [1, 1]} : vector<4x512xf32> to vector<1x512xf32>
    %8 = vector.broadcast %2 : vector<16x1xf32> to vector<16x512xf32>
    %9 = vector.broadcast %7 : vector<1x512xf32> to vector<16x512xf32>
    %10 = arith.mulf %8, %9 : vector<16x512xf32>
    %11 = vector.extract_strided_slice %6 {offsets = [1, 0], sizes = [1, 512], strides = [1, 1]} : vector<4x512xf32> to vector<1x512xf32>
    %12 = vector.broadcast %3 : vector<16x1xf32> to vector<16x512xf32>
    %13 = vector.broadcast %11 : vector<1x512xf32> to vector<16x512xf32>
    %14 = arith.mulf %12, %13 : vector<16x512xf32>
    %15 = arith.addf %10, %14 : vector<16x512xf32>
    %16 = vector.extract_strided_slice %6 {offsets = [2, 0], sizes = [1, 512], strides = [1, 1]} : vector<4x512xf32> to vector<1x512xf32>
    %17 = vector.broadcast %4 : vector<16x1xf32> to vector<16x512xf32>
    %18 = vector.broadcast %16 : vector<1x512xf32> to vector<16x512xf32>
    %19 = arith.mulf %17, %18 : vector<16x512xf32>
    %20 = arith.addf %15, %19 : vector<16x512xf32>
    %21 = vector.extract_strided_slice %6 {offsets = [3, 0], sizes = [1, 512], strides = [1, 1]} : vector<4x512xf32> to vector<1x512xf32>
    %22 = vector.broadcast %21 : vector<1x512xf32> to vector<16x512xf32>
    %23 = arith.addf %20, %22 : vector<16x512xf32>
    %cst_4 = arith.constant 0.000000e+00 : f32
    %24 = vector.broadcast %cst_4 : f32 to vector<16x512xf32>
    %25 = arith.maximumf %23, %24 : vector<16x512xf32>
    %26 = arith.truncf %25 : vector<16x512xf32> to vector<16x512xbf16>
    %c0_5 = arith.constant 0 : index
    %c0_6 = arith.constant 0 : index
    %27 = vector.load %arg3[%c0_5, %c0_6] : memref<2048x32xbf16, #tpu.memory_space<vmem>>, vector<512x32xbf16>
    %cst_7 = arith.constant dense<0.000000e+00> : vector<16x32xf32>
    %28 = tpu.matmul %26, %27, %cst_7 {dimension_numbers = #tpu.dot_dimension_numbers<[1], [0], [0], [1], [0, 0, 1, 1], [], []>} : vector<16x512xbf16>, vector<512x32xbf16>, vector<16x32xf32> -> vector<16x32xf32>
    %29 = arith.addf %5, %28 : vector<16x32xf32>
    %c0_8 = arith.constant 0 : index
    %c512 = arith.constant 512 : index
    %30 = vector.load %arg2[%c0_8, %c512] : memref<4x2048xf32, #tpu.memory_space<vmem>>, vector<4x512xf32>
    %31 = vector.extract_strided_slice %30 {offsets = [0, 0], sizes = [1, 512], strides = [1, 1]} : vector<4x512xf32> to vector<1x512xf32>
    %32 = vector.broadcast %2 : vector<16x1xf32> to vector<16x512xf32>
    %33 = vector.broadcast %31 : vector<1x512xf32> to vector<16x512xf32>
    %34 = arith.mulf %32, %33 : vector<16x512xf32>
    %35 = vector.extract_strided_slice %30 {offsets = [1, 0], sizes = [1, 512], strides = [1, 1]} : vector<4x512xf32> to vector<1x512xf32>
    %36 = vector.broadcast %3 : vector<16x1xf32> to vector<16x512xf32>
    %37 = vector.broadcast %35 : vector<1x512xf32> to vector<16x512xf32>
    %38 = arith.mulf %36, %37 : vector<16x512xf32>
    %39 = arith.addf %34, %38 : vector<16x512xf32>
    %40 = vector.extract_strided_slice %30 {offsets = [2, 0], sizes = [1, 512], strides = [1, 1]} : vector<4x512xf32> to vector<1x512xf32>
    %41 = vector.broadcast %4 : vector<16x1xf32> to vector<16x512xf32>
    %42 = vector.broadcast %40 : vector<1x512xf32> to vector<16x512xf32>
    %43 = arith.mulf %41, %42 : vector<16x512xf32>
    %44 = arith.addf %39, %43 : vector<16x512xf32>
    %45 = vector.extract_strided_slice %30 {offsets = [3, 0], sizes = [1, 512], strides = [1, 1]} : vector<4x512xf32> to vector<1x512xf32>
    %46 = vector.broadcast %45 : vector<1x512xf32> to vector<16x512xf32>
    %47 = arith.addf %44, %46 : vector<16x512xf32>
    %cst_9 = arith.constant 0.000000e+00 : f32
    %48 = vector.broadcast %cst_9 : f32 to vector<16x512xf32>
    %49 = arith.maximumf %47, %48 : vector<16x512xf32>
    %50 = arith.truncf %49 : vector<16x512xf32> to vector<16x512xbf16>
    %c512_10 = arith.constant 512 : index
    %c0_11 = arith.constant 0 : index
    %51 = vector.load %arg3[%c512_10, %c0_11] : memref<2048x32xbf16, #tpu.memory_space<vmem>>, vector<512x32xbf16>
    %cst_12 = arith.constant dense<0.000000e+00> : vector<16x32xf32>
    %52 = tpu.matmul %50, %51, %cst_12 {dimension_numbers = #tpu.dot_dimension_numbers<[1], [0], [0], [1], [0, 0, 1, 1], [], []>} : vector<16x512xbf16>, vector<512x32xbf16>, vector<16x32xf32> -> vector<16x32xf32>
    %53 = arith.addf %29, %52 : vector<16x32xf32>
    %c0_13 = arith.constant 0 : index
    %c1024 = arith.constant 1024 : index
    %54 = vector.load %arg2[%c0_13, %c1024] : memref<4x2048xf32, #tpu.memory_space<vmem>>, vector<4x512xf32>
    %55 = vector.extract_strided_slice %54 {offsets = [0, 0], sizes = [1, 512], strides = [1, 1]} : vector<4x512xf32> to vector<1x512xf32>
    %56 = vector.broadcast %2 : vector<16x1xf32> to vector<16x512xf32>
    %57 = vector.broadcast %55 : vector<1x512xf32> to vector<16x512xf32>
    %58 = arith.mulf %56, %57 : vector<16x512xf32>
    %59 = vector.extract_strided_slice %54 {offsets = [1, 0], sizes = [1, 512], strides = [1, 1]} : vector<4x512xf32> to vector<1x512xf32>
    %60 = vector.broadcast %3 : vector<16x1xf32> to vector<16x512xf32>
    %61 = vector.broadcast %59 : vector<1x512xf32> to vector<16x512xf32>
    %62 = arith.mulf %60, %61 : vector<16x512xf32>
    %63 = arith.addf %58, %62 : vector<16x512xf32>
    %64 = vector.extract_strided_slice %54 {offsets = [2, 0], sizes = [1, 512], strides = [1, 1]} : vector<4x512xf32> to vector<1x512xf32>
    %65 = vector.broadcast %4 : vector<16x1xf32> to vector<16x512xf32>
    %66 = vector.broadcast %64 : vector<1x512xf32> to vector<16x512xf32>
    %67 = arith.mulf %65, %66 : vector<16x512xf32>
    %68 = arith.addf %63, %67 : vector<16x512xf32>
    %69 = vector.extract_strided_slice %54 {offsets = [3, 0], sizes = [1, 512], strides = [1, 1]} : vector<4x512xf32> to vector<1x512xf32>
    %70 = vector.broadcast %69 : vector<1x512xf32> to vector<16x512xf32>
    %71 = arith.addf %68, %70 : vector<16x512xf32>
    %cst_14 = arith.constant 0.000000e+00 : f32
    %72 = vector.broadcast %cst_14 : f32 to vector<16x512xf32>
    %73 = arith.maximumf %71, %72 : vector<16x512xf32>
    %74 = arith.truncf %73 : vector<16x512xf32> to vector<16x512xbf16>
    %c1024_15 = arith.constant 1024 : index
    %c0_16 = arith.constant 0 : index
    %75 = vector.load %arg3[%c1024_15, %c0_16] : memref<2048x32xbf16, #tpu.memory_space<vmem>>, vector<512x32xbf16>
    %cst_17 = arith.constant dense<0.000000e+00> : vector<16x32xf32>
    %76 = tpu.matmul %74, %75, %cst_17 {dimension_numbers = #tpu.dot_dimension_numbers<[1], [0], [0], [1], [0, 0, 1, 1], [], []>} : vector<16x512xbf16>, vector<512x32xbf16>, vector<16x32xf32> -> vector<16x32xf32>
    %77 = arith.addf %53, %76 : vector<16x32xf32>
    %c0_18 = arith.constant 0 : index
    %c1536 = arith.constant 1536 : index
    %78 = vector.load %arg2[%c0_18, %c1536] : memref<4x2048xf32, #tpu.memory_space<vmem>>, vector<4x512xf32>
    %79 = vector.extract_strided_slice %78 {offsets = [0, 0], sizes = [1, 512], strides = [1, 1]} : vector<4x512xf32> to vector<1x512xf32>
    %80 = vector.broadcast %2 : vector<16x1xf32> to vector<16x512xf32>
    %81 = vector.broadcast %79 : vector<1x512xf32> to vector<16x512xf32>
    %82 = arith.mulf %80, %81 : vector<16x512xf32>
    %83 = vector.extract_strided_slice %78 {offsets = [1, 0], sizes = [1, 512], strides = [1, 1]} : vector<4x512xf32> to vector<1x512xf32>
    %84 = vector.broadcast %3 : vector<16x1xf32> to vector<16x512xf32>
    %85 = vector.broadcast %83 : vector<1x512xf32> to vector<16x512xf32>
    %86 = arith.mulf %84, %85 : vector<16x512xf32>
    %87 = arith.addf %82, %86 : vector<16x512xf32>
    %88 = vector.extract_strided_slice %78 {offsets = [2, 0], sizes = [1, 512], strides = [1, 1]} : vector<4x512xf32> to vector<1x512xf32>
    %89 = vector.broadcast %4 : vector<16x1xf32> to vector<16x512xf32>
    %90 = vector.broadcast %88 : vector<1x512xf32> to vector<16x512xf32>
    %91 = arith.mulf %89, %90 : vector<16x512xf32>
    %92 = arith.addf %87, %91 : vector<16x512xf32>
    %93 = vector.extract_strided_slice %78 {offsets = [3, 0], sizes = [1, 512], strides = [1, 1]} : vector<4x512xf32> to vector<1x512xf32>
    %94 = vector.broadcast %93 : vector<1x512xf32> to vector<16x512xf32>
    %95 = arith.addf %92, %94 : vector<16x512xf32>
    %cst_19 = arith.constant 0.000000e+00 : f32
    %96 = vector.broadcast %cst_19 : f32 to vector<16x512xf32>
    %97 = arith.maximumf %95, %96 : vector<16x512xf32>
    %98 = arith.truncf %97 : vector<16x512xf32> to vector<16x512xbf16>
    %c1536_20 = arith.constant 1536 : index
    %c0_21 = arith.constant 0 : index
    %99 = vector.load %arg3[%c1536_20, %c0_21] : memref<2048x32xbf16, #tpu.memory_space<vmem>>, vector<512x32xbf16>
    %cst_22 = arith.constant dense<0.000000e+00> : vector<16x32xf32>
    %100 = tpu.matmul %98, %99, %cst_22 {dimension_numbers = #tpu.dot_dimension_numbers<[1], [0], [0], [1], [0, 0, 1, 1], [], []>} : vector<16x512xbf16>, vector<512x32xbf16>, vector<16x32xf32> -> vector<16x32xf32>
    %101 = arith.addf %77, %100 : vector<16x32xf32>
    %c32 = arith.constant 32 : index
    %c0_23 = arith.constant 0 : index
    %102 = vector.load %arg4[%c32, %c0_23] : memref<35x32xf32, #tpu.memory_space<vmem>>, vector<3x32xf32>
    %103 = vector.extract_strided_slice %102 {offsets = [0, 0], sizes = [1, 32], strides = [1, 1]} : vector<3x32xf32> to vector<1x32xf32>
    %104 = vector.extract_strided_slice %102 {offsets = [1, 0], sizes = [1, 32], strides = [1, 1]} : vector<3x32xf32> to vector<1x32xf32>
    %105 = vector.extract_strided_slice %102 {offsets = [2, 0], sizes = [1, 32], strides = [1, 1]} : vector<3x32xf32> to vector<1x32xf32>
    %106 = vector.broadcast %103 : vector<1x32xf32> to vector<16x32xf32>
    %107 = arith.addf %101, %106 : vector<16x32xf32>
    %cst_24 = arith.constant 0.000000e+00 : f32
    %108 = vector.broadcast %cst_24 : f32 to vector<16x32xf32>
    %109 = arith.maximumf %107, %108 : vector<16x32xf32>
    %c0_25 = arith.constant 0 : index
    %c0_26 = arith.constant 0 : index
    %110 = vector.load %arg4[%c0_25, %c0_26] : memref<35x32xf32, #tpu.memory_space<vmem>>, vector<16x32xf32>
    %c16 = arith.constant 16 : index
    %c0_27 = arith.constant 0 : index
    %111 = vector.load %arg4[%c16, %c0_27] : memref<35x32xf32, #tpu.memory_space<vmem>>, vector<16x32xf32>
    %c0_28 = arith.constant 0 : index
    %c0_29 = arith.constant 0 : index
    %c0_30 = arith.constant 0 : index
    %112 = vector.load %arg6[%c0_28, %c0_29, %c0_30] : memref<2x16x32xf32, #tpu.memory_space<vmem>>, vector<1x16x32xf32>
    %113 = vector.shape_cast %112 : vector<1x16x32xf32> to vector<16x32xf32>
    %114 = vector.extract_strided_slice %113 {offsets = [0, 0], sizes = [1, 32], strides = [1, 1]} : vector<16x32xf32> to vector<1x32xf32>
    %115 = vector.extract_strided_slice %113 {offsets = [1, 0], sizes = [1, 32], strides = [1, 1]} : vector<16x32xf32> to vector<1x32xf32>
    %116 = vector.extract_strided_slice %113 {offsets = [2, 0], sizes = [1, 32], strides = [1, 1]} : vector<16x32xf32> to vector<1x32xf32>
    %117 = vector.extract_strided_slice %113 {offsets = [3, 0], sizes = [1, 32], strides = [1, 1]} : vector<16x32xf32> to vector<1x32xf32>
    %118 = vector.extract_strided_slice %113 {offsets = [4, 0], sizes = [1, 32], strides = [1, 1]} : vector<16x32xf32> to vector<1x32xf32>
    %119 = vector.extract_strided_slice %113 {offsets = [5, 0], sizes = [1, 32], strides = [1, 1]} : vector<16x32xf32> to vector<1x32xf32>
    %120 = vector.extract_strided_slice %113 {offsets = [6, 0], sizes = [1, 32], strides = [1, 1]} : vector<16x32xf32> to vector<1x32xf32>
    %121 = vector.extract_strided_slice %113 {offsets = [7, 0], sizes = [1, 32], strides = [1, 1]} : vector<16x32xf32> to vector<1x32xf32>
    %122 = vector.extract_strided_slice %113 {offsets = [8, 0], sizes = [1, 32], strides = [1, 1]} : vector<16x32xf32> to vector<1x32xf32>
    %123 = vector.extract_strided_slice %113 {offsets = [9, 0], sizes = [1, 32], strides = [1, 1]} : vector<16x32xf32> to vector<1x32xf32>
    %124 = vector.extract_strided_slice %113 {offsets = [10, 0], sizes = [1, 32], strides = [1, 1]} : vector<16x32xf32> to vector<1x32xf32>
    %125 = vector.extract_strided_slice %113 {offsets = [11, 0], sizes = [1, 32], strides = [1, 1]} : vector<16x32xf32> to vector<1x32xf32>
    %126 = vector.extract_strided_slice %113 {offsets = [12, 0], sizes = [1, 32], strides = [1, 1]} : vector<16x32xf32> to vector<1x32xf32>
    %127 = vector.extract_strided_slice %113 {offsets = [13, 0], sizes = [1, 32], strides = [1, 1]} : vector<16x32xf32> to vector<1x32xf32>
    %128 = vector.extract_strided_slice %113 {offsets = [14, 0], sizes = [1, 32], strides = [1, 1]} : vector<16x32xf32> to vector<1x32xf32>
    %129 = arith.addf %110, %110 : vector<16x32xf32>
    %c0_31 = arith.constant 0 : index
    %c0_32 = arith.constant 0 : index
    %c0_33 = arith.constant 0 : index
    %c0_34 = arith.constant 0 : index
    %130 = vector.load %arg5[%c0_31, %c0_32, %c0_33, %c0_34] : memref<2x8x32x32xbf16, #tpu.memory_space<vmem>>, vector<1x1x32x32xbf16>
    %131 = vector.shape_cast %130 : vector<1x1x32x32xbf16> to vector<32x32xbf16>
    %c0_35 = arith.constant 0 : index
    %c1 = arith.constant 1 : index
    %c0_36 = arith.constant 0 : index
    %c0_37 = arith.constant 0 : index
    %132 = vector.load %arg5[%c0_35, %c1, %c0_36, %c0_37] : memref<2x8x32x32xbf16, #tpu.memory_space<vmem>>, vector<1x1x32x32xbf16>
    %133 = vector.shape_cast %132 : vector<1x1x32x32xbf16> to vector<32x32xbf16>
    %c0_38 = arith.constant 0 : index
    %c2 = arith.constant 2 : index
    %c0_39 = arith.constant 0 : index
    %c0_40 = arith.constant 0 : index
    %134 = vector.load %arg5[%c0_38, %c2, %c0_39, %c0_40] : memref<2x8x32x32xbf16, #tpu.memory_space<vmem>>, vector<1x1x32x32xbf16>
    %135 = vector.shape_cast %134 : vector<1x1x32x32xbf16> to vector<32x32xbf16>
    %c0_41 = arith.constant 0 : index
    %c3 = arith.constant 3 : index
    %c0_42 = arith.constant 0 : index
    %c0_43 = arith.constant 0 : index
    %136 = vector.load %arg5[%c0_41, %c3, %c0_42, %c0_43] : memref<2x8x32x32xbf16, #tpu.memory_space<vmem>>, vector<1x1x32x32xbf16>
    %137 = vector.shape_cast %136 : vector<1x1x32x32xbf16> to vector<32x32xbf16>
    %138 = arith.truncf %129 : vector<16x32xf32> to vector<16x32xbf16>
    %cst_44 = arith.constant dense<0.000000e+00> : vector<16x32xf32>
    %139 = tpu.matmul %138, %131, %cst_44 {dimension_numbers = #tpu.dot_dimension_numbers<[1], [0], [0], [1], [0, 0, 1, 1], [], []>} : vector<16x32xbf16>, vector<32x32xbf16>, vector<16x32xf32> -> vector<16x32xf32>
    %140 = vector.broadcast %114 : vector<1x32xf32> to vector<16x32xf32>
    %141 = arith.addf %139, %140 : vector<16x32xf32>
    %142 = arith.truncf %129 : vector<16x32xf32> to vector<16x32xbf16>
    %cst_45 = arith.constant dense<0.000000e+00> : vector<16x32xf32>
    %143 = tpu.matmul %142, %133, %cst_45 {dimension_numbers = #tpu.dot_dimension_numbers<[1], [0], [0], [1], [0, 0, 1, 1], [], []>} : vector<16x32xbf16>, vector<32x32xbf16>, vector<16x32xf32> -> vector<16x32xf32>
    %144 = vector.broadcast %115 : vector<1x32xf32> to vector<16x32xf32>
    %145 = arith.addf %143, %144 : vector<16x32xf32>
    %146 = arith.truncf %110 : vector<16x32xf32> to vector<16x32xbf16>
    %cst_46 = arith.constant dense<0.000000e+00> : vector<16x32xf32>
    %147 = tpu.matmul %146, %135, %cst_46 {dimension_numbers = #tpu.dot_dimension_numbers<[1], [0], [0], [1], [0, 0, 1, 1], [], []>} : vector<16x32xbf16>, vector<32x32xbf16>, vector<16x32xf32> -> vector<16x32xf32>
    %148 = vector.broadcast %116 : vector<1x32xf32> to vector<16x32xf32>
    %149 = arith.addf %147, %148 : vector<16x32xf32>
    %150 = vector.extract_strided_slice %141 {offsets = [0, 0], sizes = [16, 8], strides = [1, 1]} : vector<16x32xf32> to vector<16x8xf32>
    %151 = vector.extract_strided_slice %141 {offsets = [0, 8], sizes = [16, 8], strides = [1, 1]} : vector<16x32xf32> to vector<16x8xf32>
    %152 = vector.extract_strided_slice %141 {offsets = [0, 16], sizes = [16, 8], strides = [1, 1]} : vector<16x32xf32> to vector<16x8xf32>
    %153 = vector.extract_strided_slice %141 {offsets = [0, 24], sizes = [16, 8], strides = [1, 1]} : vector<16x32xf32> to vector<16x8xf32>
    %154 = vector.shape_cast %150 : vector<16x8xf32> to vector<1x16x8xf32>
    %155 = vector.shape_cast %151 : vector<16x8xf32> to vector<1x16x8xf32>
    %156 = vector.shape_cast %152 : vector<16x8xf32> to vector<1x16x8xf32>
    %157 = vector.shape_cast %153 : vector<16x8xf32> to vector<1x16x8xf32>
    %158 = tpu.concatenate %154, %155, %156, %157 in 0 : vector<1x16x8xf32>, vector<1x16x8xf32>, vector<1x16x8xf32>, vector<1x16x8xf32> -> vector<4x16x8xf32>
    %159 = vector.extract_strided_slice %145 {offsets = [0, 0], sizes = [16, 8], strides = [1, 1]} : vector<16x32xf32> to vector<16x8xf32>
    %160 = vector.extract_strided_slice %145 {offsets = [0, 8], sizes = [16, 8], strides = [1, 1]} : vector<16x32xf32> to vector<16x8xf32>
    %161 = vector.extract_strided_slice %145 {offsets = [0, 16], sizes = [16, 8], strides = [1, 1]} : vector<16x32xf32> to vector<16x8xf32>
    %162 = vector.extract_strided_slice %145 {offsets = [0, 24], sizes = [16, 8], strides = [1, 1]} : vector<16x32xf32> to vector<16x8xf32>
    %163 = vector.shape_cast %159 : vector<16x8xf32> to vector<1x16x8xf32>
    %164 = vector.shape_cast %160 : vector<16x8xf32> to vector<1x16x8xf32>
    %165 = vector.shape_cast %161 : vector<16x8xf32> to vector<1x16x8xf32>
    %166 = vector.shape_cast %162 : vector<16x8xf32> to vector<1x16x8xf32>
    %167 = tpu.concatenate %163, %164, %165, %166 in 0 : vector<1x16x8xf32>, vector<1x16x8xf32>, vector<1x16x8xf32>, vector<1x16x8xf32> -> vector<4x16x8xf32>
    %168 = vector.extract_strided_slice %149 {offsets = [0, 0], sizes = [16, 8], strides = [1, 1]} : vector<16x32xf32> to vector<16x8xf32>
    %169 = vector.extract_strided_slice %149 {offsets = [0, 8], sizes = [16, 8], strides = [1, 1]} : vector<16x32xf32> to vector<16x8xf32>
    %170 = vector.extract_strided_slice %149 {offsets = [0, 16], sizes = [16, 8], strides = [1, 1]} : vector<16x32xf32> to vector<16x8xf32>
    %171 = vector.extract_strided_slice %149 {offsets = [0, 24], sizes = [16, 8], strides = [1, 1]} : vector<16x32xf32> to vector<16x8xf32>
    %172 = vector.shape_cast %168 : vector<16x8xf32> to vector<1x16x8xf32>
    %173 = vector.shape_cast %169 : vector<16x8xf32> to vector<1x16x8xf32>
    %174 = vector.shape_cast %170 : vector<16x8xf32> to vector<1x16x8xf32>
    %175 = vector.shape_cast %171 : vector<16x8xf32> to vector<1x16x8xf32>
    %176 = tpu.concatenate %172, %173, %174, %175 in 0 : vector<1x16x8xf32>, vector<1x16x8xf32>, vector<1x16x8xf32>, vector<1x16x8xf32> -> vector<4x16x8xf32>
    "tpu.trace_start"() <{level = 10 : i32, message = "hqk,hsk->hqs"}> : () -> ()
    %cst_47 = arith.constant dense<0.000000e+00> : vector<4x16x16xf32>
    %177 = tpu.matmul %158, %167, %cst_47 {dimension_numbers = #tpu.dot_dimension_numbers<[2], [2], [1], [1], [0, 0, 0, 1, 1, 1], [0], [0]>} : vector<4x16x8xf32>, vector<4x16x8xf32>, vector<4x16x16xf32> -> vector<4x16x16xf32>
    "tpu.trace_stop"() : () -> ()
    %cst_48 = arith.constant 0.353553385 : f32
    %178 = vector.broadcast %cst_48 : f32 to vector<4x16x16xf32>
    %179 = arith.mulf %177, %178 : vector<4x16x16xf32>
    %cst_49 = arith.constant dense<0xFF800000> : vector<4x16xf32>
    %180 = vector.multi_reduction <maximumf>, %179, %cst_49 [2] : vector<4x16x16xf32> to vector<4x16xf32>
    %181 = vector.shape_cast %180 : vector<4x16xf32> to vector<4x16x1xf32>
    %182 = vector.broadcast %181 : vector<4x16x1xf32> to vector<4x16x16xf32>
    %183 = arith.subf %179, %182 : vector<4x16x16xf32>
    %184 = math.exp %183 : vector<4x16x16xf32>
    %cst_50 = arith.constant dense<0.000000e+00> : vector<4x16xf32>
    %185 = vector.multi_reduction <add>, %184, %cst_50 [2] : vector<4x16x16xf32> to vector<4x16xf32>
    %186 = vector.shape_cast %185 : vector<4x16xf32> to vector<4x16x1xf32>
    %187 = vector.broadcast %186 : vector<4x16x1xf32> to vector<4x16x16xf32>
    %188 = arith.divf %184, %187 : vector<4x16x16xf32>
    "tpu.trace_start"() <{level = 10 : i32, message = "hqs,hsk->hqk"}> : () -> ()
    %cst_51 = arith.constant dense<0.000000e+00> : vector<4x16x8xf32>
    %189 = tpu.matmul %188, %176, %cst_51 {dimension_numbers = #tpu.dot_dimension_numbers<[2], [1], [1], [2], [0, 0, 0, 1, 1, 2], [0], [0]>} : vector<4x16x16xf32>, vector<4x16x8xf32>, vector<4x16x8xf32> -> vector<4x16x8xf32>
    "tpu.trace_stop"() : () -> ()
    %190 = vector.extract_strided_slice %189 {offsets = [0, 0, 0], sizes = [1, 16, 8], strides = [1, 1, 1]} : vector<4x16x8xf32> to vector<1x16x8xf32>
    %191 = vector.shape_cast %190 : vector<1x16x8xf32> to vector<16x8xf32>
    %192 = vector.extract_strided_slice %189 {offsets = [1, 0, 0], sizes = [1, 16, 8], strides = [1, 1, 1]} : vector<4x16x8xf32> to vector<1x16x8xf32>
    %193 = vector.shape_cast %192 : vector<1x16x8xf32> to vector<16x8xf32>
    %194 = vector.extract_strided_slice %189 {offsets = [2, 0, 0], sizes = [1, 16, 8], strides = [1, 1, 1]} : vector<4x16x8xf32> to vector<1x16x8xf32>
    %195 = vector.shape_cast %194 : vector<1x16x8xf32> to vector<16x8xf32>
    %196 = vector.extract_strided_slice %189 {offsets = [3, 0, 0], sizes = [1, 16, 8], strides = [1, 1, 1]} : vector<4x16x8xf32> to vector<1x16x8xf32>
    %197 = vector.shape_cast %196 : vector<1x16x8xf32> to vector<16x8xf32>
    %198 = tpu.concatenate %191, %193, %195, %197 in 1 : vector<16x8xf32>, vector<16x8xf32>, vector<16x8xf32>, vector<16x8xf32> -> vector<16x32xf32>
    %199 = arith.truncf %198 : vector<16x32xf32> to vector<16x32xbf16>
    %cst_52 = arith.constant dense<0.000000e+00> : vector<16x32xf32>
    %200 = tpu.matmul %199, %137, %cst_52 {dimension_numbers = #tpu.dot_dimension_numbers<[1], [0], [0], [1], [0, 0, 1, 1], [], []>} : vector<16x32xbf16>, vector<32x32xbf16>, vector<16x32xf32> -> vector<16x32xf32>
    %201 = vector.broadcast %117 : vector<1x32xf32> to vector<16x32xf32>
    %202 = arith.addf %200, %201 : vector<16x32xf32>
    %203 = arith.addf %110, %202 : vector<16x32xf32>
    %cst_53 = arith.constant dense<0.000000e+00> : vector<16xf32>
    %204 = vector.multi_reduction <add>, %203, %cst_53 [1] : vector<16x32xf32> to vector<16xf32>
    %205 = vector.shape_cast %204 : vector<16xf32> to vector<16x1xf32>
    %cst_54 = arith.constant 3.200000e+01 : f32
    %206 = vector.broadcast %cst_54 : f32 to vector<16x1xf32>
    %207 = arith.divf %205, %206 : vector<16x1xf32>
    %208 = vector.broadcast %207 : vector<16x1xf32> to vector<16x32xf32>
    %209 = arith.subf %203, %208 : vector<16x32xf32>
    %210 = arith.mulf %209, %209 : vector<16x32xf32>
    %cst_55 = arith.constant dense<0.000000e+00> : vector<16xf32>
    %211 = vector.multi_reduction <add>, %210, %cst_55 [1] : vector<16x32xf32> to vector<16xf32>
    %212 = vector.shape_cast %211 : vector<16xf32> to vector<16x1xf32>
    %cst_56 = arith.constant 3.200000e+01 : f32
    %213 = vector.broadcast %cst_56 : f32 to vector<16x1xf32>
    %214 = arith.divf %212, %213 : vector<16x1xf32>
    %cst_57 = arith.constant 9.99999974E-6 : f32
    %215 = vector.broadcast %cst_57 : f32 to vector<16x1xf32>
    %216 = arith.addf %214, %215 : vector<16x1xf32>
    %217 = math.rsqrt %216 : vector<16x1xf32>
    %218 = vector.broadcast %217 : vector<16x1xf32> to vector<16x32xf32>
    %219 = arith.mulf %209, %218 : vector<16x32xf32>
    %220 = vector.broadcast %123 : vector<1x32xf32> to vector<16x32xf32>
    %221 = arith.mulf %219, %220 : vector<16x32xf32>
    %222 = vector.broadcast %124 : vector<1x32xf32> to vector<16x32xf32>
    %223 = arith.addf %221, %222 : vector<16x32xf32>
    %224 = arith.addf %223, %110 : vector<16x32xf32>
    %c0_58 = arith.constant 0 : index
    %c4 = arith.constant 4 : index
    %c0_59 = arith.constant 0 : index
    %c0_60 = arith.constant 0 : index
    %225 = vector.load %arg5[%c0_58, %c4, %c0_59, %c0_60] : memref<2x8x32x32xbf16, #tpu.memory_space<vmem>>, vector<1x1x32x32xbf16>
    %226 = vector.shape_cast %225 : vector<1x1x32x32xbf16> to vector<32x32xbf16>
    %c0_61 = arith.constant 0 : index
    %c5 = arith.constant 5 : index
    %c0_62 = arith.constant 0 : index
    %c0_63 = arith.constant 0 : index
    %227 = vector.load %arg5[%c0_61, %c5, %c0_62, %c0_63] : memref<2x8x32x32xbf16, #tpu.memory_space<vmem>>, vector<1x1x32x32xbf16>
    %228 = vector.shape_cast %227 : vector<1x1x32x32xbf16> to vector<32x32xbf16>
    %c0_64 = arith.constant 0 : index
    %c6 = arith.constant 6 : index
    %c0_65 = arith.constant 0 : index
    %c0_66 = arith.constant 0 : index
    %229 = vector.load %arg5[%c0_64, %c6, %c0_65, %c0_66] : memref<2x8x32x32xbf16, #tpu.memory_space<vmem>>, vector<1x1x32x32xbf16>
    %230 = vector.shape_cast %229 : vector<1x1x32x32xbf16> to vector<32x32xbf16>
    %c0_67 = arith.constant 0 : index
    %c7 = arith.constant 7 : index
    %c0_68 = arith.constant 0 : index
    %c0_69 = arith.constant 0 : index
    %231 = vector.load %arg5[%c0_67, %c7, %c0_68, %c0_69] : memref<2x8x32x32xbf16, #tpu.memory_space<vmem>>, vector<1x1x32x32xbf16>
    %232 = vector.shape_cast %231 : vector<1x1x32x32xbf16> to vector<32x32xbf16>
    %233 = arith.truncf %224 : vector<16x32xf32> to vector<16x32xbf16>
    %cst_70 = arith.constant dense<0.000000e+00> : vector<16x32xf32>
    %234 = tpu.matmul %233, %226, %cst_70 {dimension_numbers = #tpu.dot_dimension_numbers<[1], [0], [0], [1], [0, 0, 1, 1], [], []>} : vector<16x32xbf16>, vector<32x32xbf16>, vector<16x32xf32> -> vector<16x32xf32>
    %235 = vector.broadcast %118 : vector<1x32xf32> to vector<16x32xf32>
    %236 = arith.addf %234, %235 : vector<16x32xf32>
    %237 = arith.truncf %109 : vector<16x32xf32> to vector<16x32xbf16>
    %cst_71 = arith.constant dense<0.000000e+00> : vector<16x32xf32>
    %238 = tpu.matmul %237, %228, %cst_71 {dimension_numbers = #tpu.dot_dimension_numbers<[1], [0], [0], [1], [0, 0, 1, 1], [], []>} : vector<16x32xbf16>, vector<32x32xbf16>, vector<16x32xf32> -> vector<16x32xf32>
    %239 = vector.broadcast %119 : vector<1x32xf32> to vector<16x32xf32>
    %240 = arith.addf %238, %239 : vector<16x32xf32>
    %241 = arith.truncf %109 : vector<16x32xf32> to vector<16x32xbf16>
    %cst_72 = arith.constant dense<0.000000e+00> : vector<16x32xf32>
    %242 = tpu.matmul %241, %230, %cst_72 {dimension_numbers = #tpu.dot_dimension_numbers<[1], [0], [0], [1], [0, 0, 1, 1], [], []>} : vector<16x32xbf16>, vector<32x32xbf16>, vector<16x32xf32> -> vector<16x32xf32>
    %243 = vector.broadcast %120 : vector<1x32xf32> to vector<16x32xf32>
    %244 = arith.addf %242, %243 : vector<16x32xf32>
    %245 = vector.extract_strided_slice %236 {offsets = [0, 0], sizes = [16, 8], strides = [1, 1]} : vector<16x32xf32> to vector<16x8xf32>
    %246 = vector.extract_strided_slice %236 {offsets = [0, 8], sizes = [16, 8], strides = [1, 1]} : vector<16x32xf32> to vector<16x8xf32>
    %247 = vector.extract_strided_slice %236 {offsets = [0, 16], sizes = [16, 8], strides = [1, 1]} : vector<16x32xf32> to vector<16x8xf32>
    %248 = vector.extract_strided_slice %236 {offsets = [0, 24], sizes = [16, 8], strides = [1, 1]} : vector<16x32xf32> to vector<16x8xf32>
    %249 = vector.shape_cast %245 : vector<16x8xf32> to vector<1x16x8xf32>
    %250 = vector.shape_cast %246 : vector<16x8xf32> to vector<1x16x8xf32>
    %251 = vector.shape_cast %247 : vector<16x8xf32> to vector<1x16x8xf32>
    %252 = vector.shape_cast %248 : vector<16x8xf32> to vector<1x16x8xf32>
    %253 = tpu.concatenate %249, %250, %251, %252 in 0 : vector<1x16x8xf32>, vector<1x16x8xf32>, vector<1x16x8xf32>, vector<1x16x8xf32> -> vector<4x16x8xf32>
    %254 = vector.extract_strided_slice %240 {offsets = [0, 0], sizes = [16, 8], strides = [1, 1]} : vector<16x32xf32> to vector<16x8xf32>
    %255 = vector.extract_strided_slice %240 {offsets = [0, 8], sizes = [16, 8], strides = [1, 1]} : vector<16x32xf32> to vector<16x8xf32>
    %256 = vector.extract_strided_slice %240 {offsets = [0, 16], sizes = [16, 8], strides = [1, 1]} : vector<16x32xf32> to vector<16x8xf32>
    %257 = vector.extract_strided_slice %240 {offsets = [0, 24], sizes = [16, 8], strides = [1, 1]} : vector<16x32xf32> to vector<16x8xf32>
    %258 = vector.shape_cast %254 : vector<16x8xf32> to vector<1x16x8xf32>
    %259 = vector.shape_cast %255 : vector<16x8xf32> to vector<1x16x8xf32>
    %260 = vector.shape_cast %256 : vector<16x8xf32> to vector<1x16x8xf32>
    %261 = vector.shape_cast %257 : vector<16x8xf32> to vector<1x16x8xf32>
    %262 = tpu.concatenate %258, %259, %260, %261 in 0 : vector<1x16x8xf32>, vector<1x16x8xf32>, vector<1x16x8xf32>, vector<1x16x8xf32> -> vector<4x16x8xf32>
    %263 = vector.extract_strided_slice %244 {offsets = [0, 0], sizes = [16, 8], strides = [1, 1]} : vector<16x32xf32> to vector<16x8xf32>
    %264 = vector.extract_strided_slice %244 {offsets = [0, 8], sizes = [16, 8], strides = [1, 1]} : vector<16x32xf32> to vector<16x8xf32>
    %265 = vector.extract_strided_slice %244 {offsets = [0, 16], sizes = [16, 8], strides = [1, 1]} : vector<16x32xf32> to vector<16x8xf32>
    %266 = vector.extract_strided_slice %244 {offsets = [0, 24], sizes = [16, 8], strides = [1, 1]} : vector<16x32xf32> to vector<16x8xf32>
    %267 = vector.shape_cast %263 : vector<16x8xf32> to vector<1x16x8xf32>
    %268 = vector.shape_cast %264 : vector<16x8xf32> to vector<1x16x8xf32>
    %269 = vector.shape_cast %265 : vector<16x8xf32> to vector<1x16x8xf32>
    %270 = vector.shape_cast %266 : vector<16x8xf32> to vector<1x16x8xf32>
    %271 = tpu.concatenate %267, %268, %269, %270 in 0 : vector<1x16x8xf32>, vector<1x16x8xf32>, vector<1x16x8xf32>, vector<1x16x8xf32> -> vector<4x16x8xf32>
    "tpu.trace_start"() <{level = 10 : i32, message = "hqk,hsk->hqs"}> : () -> ()
    %cst_73 = arith.constant dense<0.000000e+00> : vector<4x16x16xf32>
    %272 = tpu.matmul %253, %262, %cst_73 {dimension_numbers = #tpu.dot_dimension_numbers<[2], [2], [1], [1], [0, 0, 0, 1, 1, 1], [0], [0]>} : vector<4x16x8xf32>, vector<4x16x8xf32>, vector<4x16x16xf32> -> vector<4x16x16xf32>
    "tpu.trace_stop"() : () -> ()
    %cst_74 = arith.constant 0.353553385 : f32
    %273 = vector.broadcast %cst_74 : f32 to vector<4x16x16xf32>
    %274 = arith.mulf %272, %273 : vector<4x16x16xf32>
    %cst_75 = arith.constant dense<0xFF800000> : vector<4x16xf32>
    %275 = vector.multi_reduction <maximumf>, %274, %cst_75 [2] : vector<4x16x16xf32> to vector<4x16xf32>
    %276 = vector.shape_cast %275 : vector<4x16xf32> to vector<4x16x1xf32>
    %277 = vector.broadcast %276 : vector<4x16x1xf32> to vector<4x16x16xf32>
    %278 = arith.subf %274, %277 : vector<4x16x16xf32>
    %279 = math.exp %278 : vector<4x16x16xf32>
    %cst_76 = arith.constant dense<0.000000e+00> : vector<4x16xf32>
    %280 = vector.multi_reduction <add>, %279, %cst_76 [2] : vector<4x16x16xf32> to vector<4x16xf32>
    %281 = vector.shape_cast %280 : vector<4x16xf32> to vector<4x16x1xf32>
    %282 = vector.broadcast %281 : vector<4x16x1xf32> to vector<4x16x16xf32>
    %283 = arith.divf %279, %282 : vector<4x16x16xf32>
    "tpu.trace_start"() <{level = 10 : i32, message = "hqs,hsk->hqk"}> : () -> ()
    %cst_77 = arith.constant dense<0.000000e+00> : vector<4x16x8xf32>
    %284 = tpu.matmul %283, %271, %cst_77 {dimension_numbers = #tpu.dot_dimension_numbers<[2], [1], [1], [2], [0, 0, 0, 1, 1, 2], [0], [0]>} : vector<4x16x16xf32>, vector<4x16x8xf32>, vector<4x16x8xf32> -> vector<4x16x8xf32>
    "tpu.trace_stop"() : () -> ()
    %285 = vector.extract_strided_slice %284 {offsets = [0, 0, 0], sizes = [1, 16, 8], strides = [1, 1, 1]} : vector<4x16x8xf32> to vector<1x16x8xf32>
    %286 = vector.shape_cast %285 : vector<1x16x8xf32> to vector<16x8xf32>
    %287 = vector.extract_strided_slice %284 {offsets = [1, 0, 0], sizes = [1, 16, 8], strides = [1, 1, 1]} : vector<4x16x8xf32> to vector<1x16x8xf32>
    %288 = vector.shape_cast %287 : vector<1x16x8xf32> to vector<16x8xf32>
    %289 = vector.extract_strided_slice %284 {offsets = [2, 0, 0], sizes = [1, 16, 8], strides = [1, 1, 1]} : vector<4x16x8xf32> to vector<1x16x8xf32>
    %290 = vector.shape_cast %289 : vector<1x16x8xf32> to vector<16x8xf32>
    %291 = vector.extract_strided_slice %284 {offsets = [3, 0, 0], sizes = [1, 16, 8], strides = [1, 1, 1]} : vector<4x16x8xf32> to vector<1x16x8xf32>
    %292 = vector.shape_cast %291 : vector<1x16x8xf32> to vector<16x8xf32>
    %293 = tpu.concatenate %286, %288, %290, %292 in 1 : vector<16x8xf32>, vector<16x8xf32>, vector<16x8xf32>, vector<16x8xf32> -> vector<16x32xf32>
    %294 = arith.truncf %293 : vector<16x32xf32> to vector<16x32xbf16>
    %cst_78 = arith.constant dense<0.000000e+00> : vector<16x32xf32>
    %295 = tpu.matmul %294, %232, %cst_78 {dimension_numbers = #tpu.dot_dimension_numbers<[1], [0], [0], [1], [0, 0, 1, 1], [], []>} : vector<16x32xbf16>, vector<32x32xbf16>, vector<16x32xf32> -> vector<16x32xf32>
    %296 = vector.broadcast %121 : vector<1x32xf32> to vector<16x32xf32>
    %297 = arith.addf %295, %296 : vector<16x32xf32>
    %298 = arith.addf %223, %297 : vector<16x32xf32>
    %cst_79 = arith.constant dense<0.000000e+00> : vector<16xf32>
    %299 = vector.multi_reduction <add>, %298, %cst_79 [1] : vector<16x32xf32> to vector<16xf32>
    %300 = vector.shape_cast %299 : vector<16xf32> to vector<16x1xf32>
    %cst_80 = arith.constant 3.200000e+01 : f32
    %301 = vector.broadcast %cst_80 : f32 to vector<16x1xf32>
    %302 = arith.divf %300, %301 : vector<16x1xf32>
    %303 = vector.broadcast %302 : vector<16x1xf32> to vector<16x32xf32>
    %304 = arith.subf %298, %303 : vector<16x32xf32>
    %305 = arith.mulf %304, %304 : vector<16x32xf32>
    %cst_81 = arith.constant dense<0.000000e+00> : vector<16xf32>
    %306 = vector.multi_reduction <add>, %305, %cst_81 [1] : vector<16x32xf32> to vector<16xf32>
    %307 = vector.shape_cast %306 : vector<16xf32> to vector<16x1xf32>
    %cst_82 = arith.constant 3.200000e+01 : f32
    %308 = vector.broadcast %cst_82 : f32 to vector<16x1xf32>
    %309 = arith.divf %307, %308 : vector<16x1xf32>
    %cst_83 = arith.constant 9.99999974E-6 : f32
    %310 = vector.broadcast %cst_83 : f32 to vector<16x1xf32>
    %311 = arith.addf %309, %310 : vector<16x1xf32>
    %312 = math.rsqrt %311 : vector<16x1xf32>
    %313 = vector.broadcast %312 : vector<16x1xf32> to vector<16x32xf32>
    %314 = arith.mulf %304, %313 : vector<16x32xf32>
    %315 = vector.broadcast %125 : vector<1x32xf32> to vector<16x32xf32>
    %316 = arith.mulf %314, %315 : vector<16x32xf32>
    %317 = vector.broadcast %126 : vector<1x32xf32> to vector<16x32xf32>
    %318 = arith.addf %316, %317 : vector<16x32xf32>
    %319 = arith.truncf %318 : vector<16x32xf32> to vector<16x32xbf16>
    %c0_84 = arith.constant 0 : index
    %c0_85 = arith.constant 0 : index
    %c0_86 = arith.constant 0 : index
    %320 = vector.load %arg7[%c0_84, %c0_85, %c0_86] : memref<2x32x64xbf16, #tpu.memory_space<vmem>>, vector<1x32x64xbf16>
    %321 = vector.shape_cast %320 : vector<1x32x64xbf16> to vector<32x64xbf16>
    %cst_87 = arith.constant dense<0.000000e+00> : vector<16x64xf32>
    %322 = tpu.matmul %319, %321, %cst_87 {dimension_numbers = #tpu.dot_dimension_numbers<[1], [0], [0], [1], [0, 0, 1, 1], [], []>} : vector<16x32xbf16>, vector<32x64xbf16>, vector<16x64xf32> -> vector<16x64xf32>
    %c0_88 = arith.constant 0 : index
    %c0_89 = arith.constant 0 : index
    %c0_90 = arith.constant 0 : index
    %323 = vector.load %arg8[%c0_88, %c0_89, %c0_90] : memref<2x1x64xf32, #tpu.memory_space<vmem>>, vector<1x1x64xf32>
    %324 = vector.shape_cast %323 : vector<1x1x64xf32> to vector<1x64xf32>
    %325 = vector.broadcast %324 : vector<1x64xf32> to vector<16x64xf32>
    %326 = arith.addf %322, %325 : vector<16x64xf32>
    %cst_91 = arith.constant 0.000000e+00 : f32
    %327 = vector.broadcast %cst_91 : f32 to vector<16x64xf32>
    %328 = arith.maximumf %326, %327 : vector<16x64xf32>
    %329 = arith.truncf %328 : vector<16x64xf32> to vector<16x64xbf16>
    %c0_92 = arith.constant 0 : index
    %c0_93 = arith.constant 0 : index
    %c0_94 = arith.constant 0 : index
    %330 = vector.load %arg9[%c0_92, %c0_93, %c0_94] : memref<2x64x32xbf16, #tpu.memory_space<vmem>>, vector<1x64x32xbf16>
    %331 = vector.shape_cast %330 : vector<1x64x32xbf16> to vector<64x32xbf16>
    %cst_95 = arith.constant dense<0.000000e+00> : vector<16x32xf32>
    %332 = tpu.matmul %329, %331, %cst_95 {dimension_numbers = #tpu.dot_dimension_numbers<[1], [0], [0], [1], [0, 0, 1, 1], [], []>} : vector<16x64xbf16>, vector<64x32xbf16>, vector<16x32xf32> -> vector<16x32xf32>
    %333 = vector.broadcast %122 : vector<1x32xf32> to vector<16x32xf32>
    %334 = arith.addf %332, %333 : vector<16x32xf32>
    %335 = arith.addf %318, %334 : vector<16x32xf32>
    %cst_96 = arith.constant dense<0.000000e+00> : vector<16xf32>
    %336 = vector.multi_reduction <add>, %335, %cst_96 [1] : vector<16x32xf32> to vector<16xf32>
    %337 = vector.shape_cast %336 : vector<16xf32> to vector<16x1xf32>
    %cst_97 = arith.constant 3.200000e+01 : f32
    %338 = vector.broadcast %cst_97 : f32 to vector<16x1xf32>
    %339 = arith.divf %337, %338 : vector<16x1xf32>
    %340 = vector.broadcast %339 : vector<16x1xf32> to vector<16x32xf32>
    %341 = arith.subf %335, %340 : vector<16x32xf32>
    %342 = arith.mulf %341, %341 : vector<16x32xf32>
    %cst_98 = arith.constant dense<0.000000e+00> : vector<16xf32>
    %343 = vector.multi_reduction <add>, %342, %cst_98 [1] : vector<16x32xf32> to vector<16xf32>
    %344 = vector.shape_cast %343 : vector<16xf32> to vector<16x1xf32>
    %cst_99 = arith.constant 3.200000e+01 : f32
    %345 = vector.broadcast %cst_99 : f32 to vector<16x1xf32>
    %346 = arith.divf %344, %345 : vector<16x1xf32>
    %cst_100 = arith.constant 9.99999974E-6 : f32
    %347 = vector.broadcast %cst_100 : f32 to vector<16x1xf32>
    %348 = arith.addf %346, %347 : vector<16x1xf32>
    %349 = math.rsqrt %348 : vector<16x1xf32>
    %350 = vector.broadcast %349 : vector<16x1xf32> to vector<16x32xf32>
    %351 = arith.mulf %341, %350 : vector<16x32xf32>
    %352 = vector.broadcast %127 : vector<1x32xf32> to vector<16x32xf32>
    %353 = arith.mulf %351, %352 : vector<16x32xf32>
    %354 = vector.broadcast %128 : vector<1x32xf32> to vector<16x32xf32>
    %355 = arith.addf %353, %354 : vector<16x32xf32>
    %c1_101 = arith.constant 1 : index
    %c0_102 = arith.constant 0 : index
    %c0_103 = arith.constant 0 : index
    %356 = vector.load %arg6[%c1_101, %c0_102, %c0_103] : memref<2x16x32xf32, #tpu.memory_space<vmem>>, vector<1x16x32xf32>
    %357 = vector.shape_cast %356 : vector<1x16x32xf32> to vector<16x32xf32>
    %358 = vector.extract_strided_slice %357 {offsets = [0, 0], sizes = [1, 32], strides = [1, 1]} : vector<16x32xf32> to vector<1x32xf32>
    %359 = vector.extract_strided_slice %357 {offsets = [1, 0], sizes = [1, 32], strides = [1, 1]} : vector<16x32xf32> to vector<1x32xf32>
    %360 = vector.extract_strided_slice %357 {offsets = [2, 0], sizes = [1, 32], strides = [1, 1]} : vector<16x32xf32> to vector<1x32xf32>
    %361 = vector.extract_strided_slice %357 {offsets = [3, 0], sizes = [1, 32], strides = [1, 1]} : vector<16x32xf32> to vector<1x32xf32>
    %362 = vector.extract_strided_slice %357 {offsets = [4, 0], sizes = [1, 32], strides = [1, 1]} : vector<16x32xf32> to vector<1x32xf32>
    %363 = vector.extract_strided_slice %357 {offsets = [5, 0], sizes = [1, 32], strides = [1, 1]} : vector<16x32xf32> to vector<1x32xf32>
    %364 = vector.extract_strided_slice %357 {offsets = [6, 0], sizes = [1, 32], strides = [1, 1]} : vector<16x32xf32> to vector<1x32xf32>
    %365 = vector.extract_strided_slice %357 {offsets = [7, 0], sizes = [1, 32], strides = [1, 1]} : vector<16x32xf32> to vector<1x32xf32>
    %366 = vector.extract_strided_slice %357 {offsets = [8, 0], sizes = [1, 32], strides = [1, 1]} : vector<16x32xf32> to vector<1x32xf32>
    %367 = vector.extract_strided_slice %357 {offsets = [9, 0], sizes = [1, 32], strides = [1, 1]} : vector<16x32xf32> to vector<1x32xf32>
    %368 = vector.extract_strided_slice %357 {offsets = [10, 0], sizes = [1, 32], strides = [1, 1]} : vector<16x32xf32> to vector<1x32xf32>
    %369 = vector.extract_strided_slice %357 {offsets = [11, 0], sizes = [1, 32], strides = [1, 1]} : vector<16x32xf32> to vector<1x32xf32>
    %370 = vector.extract_strided_slice %357 {offsets = [12, 0], sizes = [1, 32], strides = [1, 1]} : vector<16x32xf32> to vector<1x32xf32>
    %371 = vector.extract_strided_slice %357 {offsets = [13, 0], sizes = [1, 32], strides = [1, 1]} : vector<16x32xf32> to vector<1x32xf32>
    %372 = vector.extract_strided_slice %357 {offsets = [14, 0], sizes = [1, 32], strides = [1, 1]} : vector<16x32xf32> to vector<1x32xf32>
    %373 = arith.addf %355, %110 : vector<16x32xf32>
    %c1_104 = arith.constant 1 : index
    %c0_105 = arith.constant 0 : index
    %c0_106 = arith.constant 0 : index
    %c0_107 = arith.constant 0 : index
    %374 = vector.load %arg5[%c1_104, %c0_105, %c0_106, %c0_107] : memref<2x8x32x32xbf16, #tpu.memory_space<vmem>>, vector<1x1x32x32xbf16>
    %375 = vector.shape_cast %374 : vector<1x1x32x32xbf16> to vector<32x32xbf16>
    %c1_108 = arith.constant 1 : index
    %c1_109 = arith.constant 1 : index
    %c0_110 = arith.constant 0 : index
    %c0_111 = arith.constant 0 : index
    %376 = vector.load %arg5[%c1_108, %c1_109, %c0_110, %c0_111] : memref<2x8x32x32xbf16, #tpu.memory_space<vmem>>, vector<1x1x32x32xbf16>
    %377 = vector.shape_cast %376 : vector<1x1x32x32xbf16> to vector<32x32xbf16>
    %c1_112 = arith.constant 1 : index
    %c2_113 = arith.constant 2 : index
    %c0_114 = arith.constant 0 : index
    %c0_115 = arith.constant 0 : index
    %378 = vector.load %arg5[%c1_112, %c2_113, %c0_114, %c0_115] : memref<2x8x32x32xbf16, #tpu.memory_space<vmem>>, vector<1x1x32x32xbf16>
    %379 = vector.shape_cast %378 : vector<1x1x32x32xbf16> to vector<32x32xbf16>
    %c1_116 = arith.constant 1 : index
    %c3_117 = arith.constant 3 : index
    %c0_118 = arith.constant 0 : index
    %c0_119 = arith.constant 0 : index
    %380 = vector.load %arg5[%c1_116, %c3_117, %c0_118, %c0_119] : memref<2x8x32x32xbf16, #tpu.memory_space<vmem>>, vector<1x1x32x32xbf16>
    %381 = vector.shape_cast %380 : vector<1x1x32x32xbf16> to vector<32x32xbf16>
    %382 = arith.truncf %373 : vector<16x32xf32> to vector<16x32xbf16>
    %cst_120 = arith.constant dense<0.000000e+00> : vector<16x32xf32>
    %383 = tpu.matmul %382, %375, %cst_120 {dimension_numbers = #tpu.dot_dimension_numbers<[1], [0], [0], [1], [0, 0, 1, 1], [], []>} : vector<16x32xbf16>, vector<32x32xbf16>, vector<16x32xf32> -> vector<16x32xf32>
    %384 = vector.broadcast %358 : vector<1x32xf32> to vector<16x32xf32>
    %385 = arith.addf %383, %384 : vector<16x32xf32>
    %386 = arith.truncf %373 : vector<16x32xf32> to vector<16x32xbf16>
    %cst_121 = arith.constant dense<0.000000e+00> : vector<16x32xf32>
    %387 = tpu.matmul %386, %377, %cst_121 {dimension_numbers = #tpu.dot_dimension_numbers<[1], [0], [0], [1], [0, 0, 1, 1], [], []>} : vector<16x32xbf16>, vector<32x32xbf16>, vector<16x32xf32> -> vector<16x32xf32>
    %388 = vector.broadcast %359 : vector<1x32xf32> to vector<16x32xf32>
    %389 = arith.addf %387, %388 : vector<16x32xf32>
    %390 = arith.truncf %355 : vector<16x32xf32> to vector<16x32xbf16>
    %cst_122 = arith.constant dense<0.000000e+00> : vector<16x32xf32>
    %391 = tpu.matmul %390, %379, %cst_122 {dimension_numbers = #tpu.dot_dimension_numbers<[1], [0], [0], [1], [0, 0, 1, 1], [], []>} : vector<16x32xbf16>, vector<32x32xbf16>, vector<16x32xf32> -> vector<16x32xf32>
    %392 = vector.broadcast %360 : vector<1x32xf32> to vector<16x32xf32>
    %393 = arith.addf %391, %392 : vector<16x32xf32>
    %394 = vector.extract_strided_slice %385 {offsets = [0, 0], sizes = [16, 8], strides = [1, 1]} : vector<16x32xf32> to vector<16x8xf32>
    %395 = vector.extract_strided_slice %385 {offsets = [0, 8], sizes = [16, 8], strides = [1, 1]} : vector<16x32xf32> to vector<16x8xf32>
    %396 = vector.extract_strided_slice %385 {offsets = [0, 16], sizes = [16, 8], strides = [1, 1]} : vector<16x32xf32> to vector<16x8xf32>
    %397 = vector.extract_strided_slice %385 {offsets = [0, 24], sizes = [16, 8], strides = [1, 1]} : vector<16x32xf32> to vector<16x8xf32>
    %398 = vector.shape_cast %394 : vector<16x8xf32> to vector<1x16x8xf32>
    %399 = vector.shape_cast %395 : vector<16x8xf32> to vector<1x16x8xf32>
    %400 = vector.shape_cast %396 : vector<16x8xf32> to vector<1x16x8xf32>
    %401 = vector.shape_cast %397 : vector<16x8xf32> to vector<1x16x8xf32>
    %402 = tpu.concatenate %398, %399, %400, %401 in 0 : vector<1x16x8xf32>, vector<1x16x8xf32>, vector<1x16x8xf32>, vector<1x16x8xf32> -> vector<4x16x8xf32>
    %403 = vector.extract_strided_slice %389 {offsets = [0, 0], sizes = [16, 8], strides = [1, 1]} : vector<16x32xf32> to vector<16x8xf32>
    %404 = vector.extract_strided_slice %389 {offsets = [0, 8], sizes = [16, 8], strides = [1, 1]} : vector<16x32xf32> to vector<16x8xf32>
    %405 = vector.extract_strided_slice %389 {offsets = [0, 16], sizes = [16, 8], strides = [1, 1]} : vector<16x32xf32> to vector<16x8xf32>
    %406 = vector.extract_strided_slice %389 {offsets = [0, 24], sizes = [16, 8], strides = [1, 1]} : vector<16x32xf32> to vector<16x8xf32>
    %407 = vector.shape_cast %403 : vector<16x8xf32> to vector<1x16x8xf32>
    %408 = vector.shape_cast %404 : vector<16x8xf32> to vector<1x16x8xf32>
    %409 = vector.shape_cast %405 : vector<16x8xf32> to vector<1x16x8xf32>
    %410 = vector.shape_cast %406 : vector<16x8xf32> to vector<1x16x8xf32>
    %411 = tpu.concatenate %407, %408, %409, %410 in 0 : vector<1x16x8xf32>, vector<1x16x8xf32>, vector<1x16x8xf32>, vector<1x16x8xf32> -> vector<4x16x8xf32>
    %412 = vector.extract_strided_slice %393 {offsets = [0, 0], sizes = [16, 8], strides = [1, 1]} : vector<16x32xf32> to vector<16x8xf32>
    %413 = vector.extract_strided_slice %393 {offsets = [0, 8], sizes = [16, 8], strides = [1, 1]} : vector<16x32xf32> to vector<16x8xf32>
    %414 = vector.extract_strided_slice %393 {offsets = [0, 16], sizes = [16, 8], strides = [1, 1]} : vector<16x32xf32> to vector<16x8xf32>
    %415 = vector.extract_strided_slice %393 {offsets = [0, 24], sizes = [16, 8], strides = [1, 1]} : vector<16x32xf32> to vector<16x8xf32>
    %416 = vector.shape_cast %412 : vector<16x8xf32> to vector<1x16x8xf32>
    %417 = vector.shape_cast %413 : vector<16x8xf32> to vector<1x16x8xf32>
    %418 = vector.shape_cast %414 : vector<16x8xf32> to vector<1x16x8xf32>
    %419 = vector.shape_cast %415 : vector<16x8xf32> to vector<1x16x8xf32>
    %420 = tpu.concatenate %416, %417, %418, %419 in 0 : vector<1x16x8xf32>, vector<1x16x8xf32>, vector<1x16x8xf32>, vector<1x16x8xf32> -> vector<4x16x8xf32>
    "tpu.trace_start"() <{level = 10 : i32, message = "hqk,hsk->hqs"}> : () -> ()
    %cst_123 = arith.constant dense<0.000000e+00> : vector<4x16x16xf32>
    %421 = tpu.matmul %402, %411, %cst_123 {dimension_numbers = #tpu.dot_dimension_numbers<[2], [2], [1], [1], [0, 0, 0, 1, 1, 1], [0], [0]>} : vector<4x16x8xf32>, vector<4x16x8xf32>, vector<4x16x16xf32> -> vector<4x16x16xf32>
    "tpu.trace_stop"() : () -> ()
    %cst_124 = arith.constant 0.353553385 : f32
    %422 = vector.broadcast %cst_124 : f32 to vector<4x16x16xf32>
    %423 = arith.mulf %421, %422 : vector<4x16x16xf32>
    %cst_125 = arith.constant dense<0xFF800000> : vector<4x16xf32>
    %424 = vector.multi_reduction <maximumf>, %423, %cst_125 [2] : vector<4x16x16xf32> to vector<4x16xf32>
    %425 = vector.shape_cast %424 : vector<4x16xf32> to vector<4x16x1xf32>
    %426 = vector.broadcast %425 : vector<4x16x1xf32> to vector<4x16x16xf32>
    %427 = arith.subf %423, %426 : vector<4x16x16xf32>
    %428 = math.exp %427 : vector<4x16x16xf32>
    %cst_126 = arith.constant dense<0.000000e+00> : vector<4x16xf32>
    %429 = vector.multi_reduction <add>, %428, %cst_126 [2] : vector<4x16x16xf32> to vector<4x16xf32>
    %430 = vector.shape_cast %429 : vector<4x16xf32> to vector<4x16x1xf32>
    %431 = vector.broadcast %430 : vector<4x16x1xf32> to vector<4x16x16xf32>
    %432 = arith.divf %428, %431 : vector<4x16x16xf32>
    "tpu.trace_start"() <{level = 10 : i32, message = "hqs,hsk->hqk"}> : () -> ()
    %cst_127 = arith.constant dense<0.000000e+00> : vector<4x16x8xf32>
    %433 = tpu.matmul %432, %420, %cst_127 {dimension_numbers = #tpu.dot_dimension_numbers<[2], [1], [1], [2], [0, 0, 0, 1, 1, 2], [0], [0]>} : vector<4x16x16xf32>, vector<4x16x8xf32>, vector<4x16x8xf32> -> vector<4x16x8xf32>
    "tpu.trace_stop"() : () -> ()
    %434 = vector.extract_strided_slice %433 {offsets = [0, 0, 0], sizes = [1, 16, 8], strides = [1, 1, 1]} : vector<4x16x8xf32> to vector<1x16x8xf32>
    %435 = vector.shape_cast %434 : vector<1x16x8xf32> to vector<16x8xf32>
    %436 = vector.extract_strided_slice %433 {offsets = [1, 0, 0], sizes = [1, 16, 8], strides = [1, 1, 1]} : vector<4x16x8xf32> to vector<1x16x8xf32>
    %437 = vector.shape_cast %436 : vector<1x16x8xf32> to vector<16x8xf32>
    %438 = vector.extract_strided_slice %433 {offsets = [2, 0, 0], sizes = [1, 16, 8], strides = [1, 1, 1]} : vector<4x16x8xf32> to vector<1x16x8xf32>
    %439 = vector.shape_cast %438 : vector<1x16x8xf32> to vector<16x8xf32>
    %440 = vector.extract_strided_slice %433 {offsets = [3, 0, 0], sizes = [1, 16, 8], strides = [1, 1, 1]} : vector<4x16x8xf32> to vector<1x16x8xf32>
    %441 = vector.shape_cast %440 : vector<1x16x8xf32> to vector<16x8xf32>
    %442 = tpu.concatenate %435, %437, %439, %441 in 1 : vector<16x8xf32>, vector<16x8xf32>, vector<16x8xf32>, vector<16x8xf32> -> vector<16x32xf32>
    %443 = arith.truncf %442 : vector<16x32xf32> to vector<16x32xbf16>
    %cst_128 = arith.constant dense<0.000000e+00> : vector<16x32xf32>
    %444 = tpu.matmul %443, %381, %cst_128 {dimension_numbers = #tpu.dot_dimension_numbers<[1], [0], [0], [1], [0, 0, 1, 1], [], []>} : vector<16x32xbf16>, vector<32x32xbf16>, vector<16x32xf32> -> vector<16x32xf32>
    %445 = vector.broadcast %361 : vector<1x32xf32> to vector<16x32xf32>
    %446 = arith.addf %444, %445 : vector<16x32xf32>
    %447 = arith.addf %355, %446 : vector<16x32xf32>
    %cst_129 = arith.constant dense<0.000000e+00> : vector<16xf32>
    %448 = vector.multi_reduction <add>, %447, %cst_129 [1] : vector<16x32xf32> to vector<16xf32>
    %449 = vector.shape_cast %448 : vector<16xf32> to vector<16x1xf32>
    %cst_130 = arith.constant 3.200000e+01 : f32
    %450 = vector.broadcast %cst_130 : f32 to vector<16x1xf32>
    %451 = arith.divf %449, %450 : vector<16x1xf32>
    %452 = vector.broadcast %451 : vector<16x1xf32> to vector<16x32xf32>
    %453 = arith.subf %447, %452 : vector<16x32xf32>
    %454 = arith.mulf %453, %453 : vector<16x32xf32>
    %cst_131 = arith.constant dense<0.000000e+00> : vector<16xf32>
    %455 = vector.multi_reduction <add>, %454, %cst_131 [1] : vector<16x32xf32> to vector<16xf32>
    %456 = vector.shape_cast %455 : vector<16xf32> to vector<16x1xf32>
    %cst_132 = arith.constant 3.200000e+01 : f32
    %457 = vector.broadcast %cst_132 : f32 to vector<16x1xf32>
    %458 = arith.divf %456, %457 : vector<16x1xf32>
    %cst_133 = arith.constant 9.99999974E-6 : f32
    %459 = vector.broadcast %cst_133 : f32 to vector<16x1xf32>
    %460 = arith.addf %458, %459 : vector<16x1xf32>
    %461 = math.rsqrt %460 : vector<16x1xf32>
    %462 = vector.broadcast %461 : vector<16x1xf32> to vector<16x32xf32>
    %463 = arith.mulf %453, %462 : vector<16x32xf32>
    %464 = vector.broadcast %367 : vector<1x32xf32> to vector<16x32xf32>
    %465 = arith.mulf %463, %464 : vector<16x32xf32>
    %466 = vector.broadcast %368 : vector<1x32xf32> to vector<16x32xf32>
    %467 = arith.addf %465, %466 : vector<16x32xf32>
    %468 = arith.addf %467, %110 : vector<16x32xf32>
    %c1_134 = arith.constant 1 : index
    %c4_135 = arith.constant 4 : index
    %c0_136 = arith.constant 0 : index
    %c0_137 = arith.constant 0 : index
    %469 = vector.load %arg5[%c1_134, %c4_135, %c0_136, %c0_137] : memref<2x8x32x32xbf16, #tpu.memory_space<vmem>>, vector<1x1x32x32xbf16>
    %470 = vector.shape_cast %469 : vector<1x1x32x32xbf16> to vector<32x32xbf16>
    %c1_138 = arith.constant 1 : index
    %c5_139 = arith.constant 5 : index
    %c0_140 = arith.constant 0 : index
    %c0_141 = arith.constant 0 : index
    %471 = vector.load %arg5[%c1_138, %c5_139, %c0_140, %c0_141] : memref<2x8x32x32xbf16, #tpu.memory_space<vmem>>, vector<1x1x32x32xbf16>
    %472 = vector.shape_cast %471 : vector<1x1x32x32xbf16> to vector<32x32xbf16>
    %c1_142 = arith.constant 1 : index
    %c6_143 = arith.constant 6 : index
    %c0_144 = arith.constant 0 : index
    %c0_145 = arith.constant 0 : index
    %473 = vector.load %arg5[%c1_142, %c6_143, %c0_144, %c0_145] : memref<2x8x32x32xbf16, #tpu.memory_space<vmem>>, vector<1x1x32x32xbf16>
    %474 = vector.shape_cast %473 : vector<1x1x32x32xbf16> to vector<32x32xbf16>
    %c1_146 = arith.constant 1 : index
    %c7_147 = arith.constant 7 : index
    %c0_148 = arith.constant 0 : index
    %c0_149 = arith.constant 0 : index
    %475 = vector.load %arg5[%c1_146, %c7_147, %c0_148, %c0_149] : memref<2x8x32x32xbf16, #tpu.memory_space<vmem>>, vector<1x1x32x32xbf16>
    %476 = vector.shape_cast %475 : vector<1x1x32x32xbf16> to vector<32x32xbf16>
    %477 = arith.truncf %468 : vector<16x32xf32> to vector<16x32xbf16>
    %cst_150 = arith.constant dense<0.000000e+00> : vector<16x32xf32>
    %478 = tpu.matmul %477, %470, %cst_150 {dimension_numbers = #tpu.dot_dimension_numbers<[1], [0], [0], [1], [0, 0, 1, 1], [], []>} : vector<16x32xbf16>, vector<32x32xbf16>, vector<16x32xf32> -> vector<16x32xf32>
    %479 = vector.broadcast %362 : vector<1x32xf32> to vector<16x32xf32>
    %480 = arith.addf %478, %479 : vector<16x32xf32>
    %481 = arith.truncf %109 : vector<16x32xf32> to vector<16x32xbf16>
    %cst_151 = arith.constant dense<0.000000e+00> : vector<16x32xf32>
    %482 = tpu.matmul %481, %472, %cst_151 {dimension_numbers = #tpu.dot_dimension_numbers<[1], [0], [0], [1], [0, 0, 1, 1], [], []>} : vector<16x32xbf16>, vector<32x32xbf16>, vector<16x32xf32> -> vector<16x32xf32>
    %483 = vector.broadcast %363 : vector<1x32xf32> to vector<16x32xf32>
    %484 = arith.addf %482, %483 : vector<16x32xf32>
    %485 = arith.truncf %109 : vector<16x32xf32> to vector<16x32xbf16>
    %cst_152 = arith.constant dense<0.000000e+00> : vector<16x32xf32>
    %486 = tpu.matmul %485, %474, %cst_152 {dimension_numbers = #tpu.dot_dimension_numbers<[1], [0], [0], [1], [0, 0, 1, 1], [], []>} : vector<16x32xbf16>, vector<32x32xbf16>, vector<16x32xf32> -> vector<16x32xf32>
    %487 = vector.broadcast %364 : vector<1x32xf32> to vector<16x32xf32>
    %488 = arith.addf %486, %487 : vector<16x32xf32>
    %489 = vector.extract_strided_slice %480 {offsets = [0, 0], sizes = [16, 8], strides = [1, 1]} : vector<16x32xf32> to vector<16x8xf32>
    %490 = vector.extract_strided_slice %480 {offsets = [0, 8], sizes = [16, 8], strides = [1, 1]} : vector<16x32xf32> to vector<16x8xf32>
    %491 = vector.extract_strided_slice %480 {offsets = [0, 16], sizes = [16, 8], strides = [1, 1]} : vector<16x32xf32> to vector<16x8xf32>
    %492 = vector.extract_strided_slice %480 {offsets = [0, 24], sizes = [16, 8], strides = [1, 1]} : vector<16x32xf32> to vector<16x8xf32>
    %493 = vector.shape_cast %489 : vector<16x8xf32> to vector<1x16x8xf32>
    %494 = vector.shape_cast %490 : vector<16x8xf32> to vector<1x16x8xf32>
    %495 = vector.shape_cast %491 : vector<16x8xf32> to vector<1x16x8xf32>
    %496 = vector.shape_cast %492 : vector<16x8xf32> to vector<1x16x8xf32>
    %497 = tpu.concatenate %493, %494, %495, %496 in 0 : vector<1x16x8xf32>, vector<1x16x8xf32>, vector<1x16x8xf32>, vector<1x16x8xf32> -> vector<4x16x8xf32>
    %498 = vector.extract_strided_slice %484 {offsets = [0, 0], sizes = [16, 8], strides = [1, 1]} : vector<16x32xf32> to vector<16x8xf32>
    %499 = vector.extract_strided_slice %484 {offsets = [0, 8], sizes = [16, 8], strides = [1, 1]} : vector<16x32xf32> to vector<16x8xf32>
    %500 = vector.extract_strided_slice %484 {offsets = [0, 16], sizes = [16, 8], strides = [1, 1]} : vector<16x32xf32> to vector<16x8xf32>
    %501 = vector.extract_strided_slice %484 {offsets = [0, 24], sizes = [16, 8], strides = [1, 1]} : vector<16x32xf32> to vector<16x8xf32>
    %502 = vector.shape_cast %498 : vector<16x8xf32> to vector<1x16x8xf32>
    %503 = vector.shape_cast %499 : vector<16x8xf32> to vector<1x16x8xf32>
    %504 = vector.shape_cast %500 : vector<16x8xf32> to vector<1x16x8xf32>
    %505 = vector.shape_cast %501 : vector<16x8xf32> to vector<1x16x8xf32>
    %506 = tpu.concatenate %502, %503, %504, %505 in 0 : vector<1x16x8xf32>, vector<1x16x8xf32>, vector<1x16x8xf32>, vector<1x16x8xf32> -> vector<4x16x8xf32>
    %507 = vector.extract_strided_slice %488 {offsets = [0, 0], sizes = [16, 8], strides = [1, 1]} : vector<16x32xf32> to vector<16x8xf32>
    %508 = vector.extract_strided_slice %488 {offsets = [0, 8], sizes = [16, 8], strides = [1, 1]} : vector<16x32xf32> to vector<16x8xf32>
    %509 = vector.extract_strided_slice %488 {offsets = [0, 16], sizes = [16, 8], strides = [1, 1]} : vector<16x32xf32> to vector<16x8xf32>
    %510 = vector.extract_strided_slice %488 {offsets = [0, 24], sizes = [16, 8], strides = [1, 1]} : vector<16x32xf32> to vector<16x8xf32>
    %511 = vector.shape_cast %507 : vector<16x8xf32> to vector<1x16x8xf32>
    %512 = vector.shape_cast %508 : vector<16x8xf32> to vector<1x16x8xf32>
    %513 = vector.shape_cast %509 : vector<16x8xf32> to vector<1x16x8xf32>
    %514 = vector.shape_cast %510 : vector<16x8xf32> to vector<1x16x8xf32>
    %515 = tpu.concatenate %511, %512, %513, %514 in 0 : vector<1x16x8xf32>, vector<1x16x8xf32>, vector<1x16x8xf32>, vector<1x16x8xf32> -> vector<4x16x8xf32>
    "tpu.trace_start"() <{level = 10 : i32, message = "hqk,hsk->hqs"}> : () -> ()
    %cst_153 = arith.constant dense<0.000000e+00> : vector<4x16x16xf32>
    %516 = tpu.matmul %497, %506, %cst_153 {dimension_numbers = #tpu.dot_dimension_numbers<[2], [2], [1], [1], [0, 0, 0, 1, 1, 1], [0], [0]>} : vector<4x16x8xf32>, vector<4x16x8xf32>, vector<4x16x16xf32> -> vector<4x16x16xf32>
    "tpu.trace_stop"() : () -> ()
    %cst_154 = arith.constant 0.353553385 : f32
    %517 = vector.broadcast %cst_154 : f32 to vector<4x16x16xf32>
    %518 = arith.mulf %516, %517 : vector<4x16x16xf32>
    %cst_155 = arith.constant dense<0xFF800000> : vector<4x16xf32>
    %519 = vector.multi_reduction <maximumf>, %518, %cst_155 [2] : vector<4x16x16xf32> to vector<4x16xf32>
    %520 = vector.shape_cast %519 : vector<4x16xf32> to vector<4x16x1xf32>
    %521 = vector.broadcast %520 : vector<4x16x1xf32> to vector<4x16x16xf32>
    %522 = arith.subf %518, %521 : vector<4x16x16xf32>
    %523 = math.exp %522 : vector<4x16x16xf32>
    %cst_156 = arith.constant dense<0.000000e+00> : vector<4x16xf32>
    %524 = vector.multi_reduction <add>, %523, %cst_156 [2] : vector<4x16x16xf32> to vector<4x16xf32>
    %525 = vector.shape_cast %524 : vector<4x16xf32> to vector<4x16x1xf32>
    %526 = vector.broadcast %525 : vector<4x16x1xf32> to vector<4x16x16xf32>
    %527 = arith.divf %523, %526 : vector<4x16x16xf32>
    "tpu.trace_start"() <{level = 10 : i32, message = "hqs,hsk->hqk"}> : () -> ()
    %cst_157 = arith.constant dense<0.000000e+00> : vector<4x16x8xf32>
    %528 = tpu.matmul %527, %515, %cst_157 {dimension_numbers = #tpu.dot_dimension_numbers<[2], [1], [1], [2], [0, 0, 0, 1, 1, 2], [0], [0]>} : vector<4x16x16xf32>, vector<4x16x8xf32>, vector<4x16x8xf32> -> vector<4x16x8xf32>
    "tpu.trace_stop"() : () -> ()
    %529 = vector.extract_strided_slice %528 {offsets = [0, 0, 0], sizes = [1, 16, 8], strides = [1, 1, 1]} : vector<4x16x8xf32> to vector<1x16x8xf32>
    %530 = vector.shape_cast %529 : vector<1x16x8xf32> to vector<16x8xf32>
    %531 = vector.extract_strided_slice %528 {offsets = [1, 0, 0], sizes = [1, 16, 8], strides = [1, 1, 1]} : vector<4x16x8xf32> to vector<1x16x8xf32>
    %532 = vector.shape_cast %531 : vector<1x16x8xf32> to vector<16x8xf32>
    %533 = vector.extract_strided_slice %528 {offsets = [2, 0, 0], sizes = [1, 16, 8], strides = [1, 1, 1]} : vector<4x16x8xf32> to vector<1x16x8xf32>
    %534 = vector.shape_cast %533 : vector<1x16x8xf32> to vector<16x8xf32>
    %535 = vector.extract_strided_slice %528 {offsets = [3, 0, 0], sizes = [1, 16, 8], strides = [1, 1, 1]} : vector<4x16x8xf32> to vector<1x16x8xf32>
    %536 = vector.shape_cast %535 : vector<1x16x8xf32> to vector<16x8xf32>
    %537 = tpu.concatenate %530, %532, %534, %536 in 1 : vector<16x8xf32>, vector<16x8xf32>, vector<16x8xf32>, vector<16x8xf32> -> vector<16x32xf32>
    %cst_158 = arith.constant dense<0.000000e+00> : vector<16x16xf32>
    %538 = vector.multi_reduction <add>, %527, %cst_158 [0] : vector<4x16x16xf32> to vector<16x16xf32>
    %cst_159 = arith.constant 4.000000e+00 : f32
    %539 = vector.broadcast %cst_159 : f32 to vector<16x16xf32>
    %540 = arith.divf %538, %539 : vector<16x16xf32>
    %541 = arith.truncf %537 : vector<16x32xf32> to vector<16x32xbf16>
    %cst_160 = arith.constant dense<0.000000e+00> : vector<16x32xf32>
    %542 = tpu.matmul %541, %476, %cst_160 {dimension_numbers = #tpu.dot_dimension_numbers<[1], [0], [0], [1], [0, 0, 1, 1], [], []>} : vector<16x32xbf16>, vector<32x32xbf16>, vector<16x32xf32> -> vector<16x32xf32>
    %543 = vector.broadcast %365 : vector<1x32xf32> to vector<16x32xf32>
    %544 = arith.addf %542, %543 : vector<16x32xf32>
    %545 = vector.shape_cast %540 : vector<16x16xf32> to vector<1x16x16xf32>
    %546 = arith.addf %467, %544 : vector<16x32xf32>
    %cst_161 = arith.constant dense<0.000000e+00> : vector<16xf32>
    %547 = vector.multi_reduction <add>, %546, %cst_161 [1] : vector<16x32xf32> to vector<16xf32>
    %548 = vector.shape_cast %547 : vector<16xf32> to vector<16x1xf32>
    %cst_162 = arith.constant 3.200000e+01 : f32
    %549 = vector.broadcast %cst_162 : f32 to vector<16x1xf32>
    %550 = arith.divf %548, %549 : vector<16x1xf32>
    %551 = vector.broadcast %550 : vector<16x1xf32> to vector<16x32xf32>
    %552 = arith.subf %546, %551 : vector<16x32xf32>
    %553 = arith.mulf %552, %552 : vector<16x32xf32>
    %cst_163 = arith.constant dense<0.000000e+00> : vector<16xf32>
    %554 = vector.multi_reduction <add>, %553, %cst_163 [1] : vector<16x32xf32> to vector<16xf32>
    %555 = vector.shape_cast %554 : vector<16xf32> to vector<16x1xf32>
    %cst_164 = arith.constant 3.200000e+01 : f32
    %556 = vector.broadcast %cst_164 : f32 to vector<16x1xf32>
    %557 = arith.divf %555, %556 : vector<16x1xf32>
    %cst_165 = arith.constant 9.99999974E-6 : f32
    %558 = vector.broadcast %cst_165 : f32 to vector<16x1xf32>
    %559 = arith.addf %557, %558 : vector<16x1xf32>
    %560 = math.rsqrt %559 : vector<16x1xf32>
    %561 = vector.broadcast %560 : vector<16x1xf32> to vector<16x32xf32>
    %562 = arith.mulf %552, %561 : vector<16x32xf32>
    %563 = vector.broadcast %369 : vector<1x32xf32> to vector<16x32xf32>
    %564 = arith.mulf %562, %563 : vector<16x32xf32>
    %565 = vector.broadcast %370 : vector<1x32xf32> to vector<16x32xf32>
    %566 = arith.addf %564, %565 : vector<16x32xf32>
    %567 = arith.truncf %566 : vector<16x32xf32> to vector<16x32xbf16>
    %c1_166 = arith.constant 1 : index
    %c0_167 = arith.constant 0 : index
    %c0_168 = arith.constant 0 : index
    %568 = vector.load %arg7[%c1_166, %c0_167, %c0_168] : memref<2x32x64xbf16, #tpu.memory_space<vmem>>, vector<1x32x64xbf16>
    %569 = vector.shape_cast %568 : vector<1x32x64xbf16> to vector<32x64xbf16>
    %cst_169 = arith.constant dense<0.000000e+00> : vector<16x64xf32>
    %570 = tpu.matmul %567, %569, %cst_169 {dimension_numbers = #tpu.dot_dimension_numbers<[1], [0], [0], [1], [0, 0, 1, 1], [], []>} : vector<16x32xbf16>, vector<32x64xbf16>, vector<16x64xf32> -> vector<16x64xf32>
    %c1_170 = arith.constant 1 : index
    %c0_171 = arith.constant 0 : index
    %c0_172 = arith.constant 0 : index
    %571 = vector.load %arg8[%c1_170, %c0_171, %c0_172] : memref<2x1x64xf32, #tpu.memory_space<vmem>>, vector<1x1x64xf32>
    %572 = vector.shape_cast %571 : vector<1x1x64xf32> to vector<1x64xf32>
    %573 = vector.broadcast %572 : vector<1x64xf32> to vector<16x64xf32>
    %574 = arith.addf %570, %573 : vector<16x64xf32>
    %cst_173 = arith.constant 0.000000e+00 : f32
    %575 = vector.broadcast %cst_173 : f32 to vector<16x64xf32>
    %576 = arith.maximumf %574, %575 : vector<16x64xf32>
    %577 = arith.truncf %576 : vector<16x64xf32> to vector<16x64xbf16>
    %c1_174 = arith.constant 1 : index
    %c0_175 = arith.constant 0 : index
    %c0_176 = arith.constant 0 : index
    %578 = vector.load %arg9[%c1_174, %c0_175, %c0_176] : memref<2x64x32xbf16, #tpu.memory_space<vmem>>, vector<1x64x32xbf16>
    %579 = vector.shape_cast %578 : vector<1x64x32xbf16> to vector<64x32xbf16>
    %cst_177 = arith.constant dense<0.000000e+00> : vector<16x32xf32>
    %580 = tpu.matmul %577, %579, %cst_177 {dimension_numbers = #tpu.dot_dimension_numbers<[1], [0], [0], [1], [0, 0, 1, 1], [], []>} : vector<16x64xbf16>, vector<64x32xbf16>, vector<16x32xf32> -> vector<16x32xf32>
    %581 = vector.broadcast %366 : vector<1x32xf32> to vector<16x32xf32>
    %582 = arith.addf %580, %581 : vector<16x32xf32>
    %583 = arith.addf %566, %582 : vector<16x32xf32>
    %cst_178 = arith.constant dense<0.000000e+00> : vector<16xf32>
    %584 = vector.multi_reduction <add>, %583, %cst_178 [1] : vector<16x32xf32> to vector<16xf32>
    %585 = vector.shape_cast %584 : vector<16xf32> to vector<16x1xf32>
    %cst_179 = arith.constant 3.200000e+01 : f32
    %586 = vector.broadcast %cst_179 : f32 to vector<16x1xf32>
    %587 = arith.divf %585, %586 : vector<16x1xf32>
    %588 = vector.broadcast %587 : vector<16x1xf32> to vector<16x32xf32>
    %589 = arith.subf %583, %588 : vector<16x32xf32>
    %590 = arith.mulf %589, %589 : vector<16x32xf32>
    %cst_180 = arith.constant dense<0.000000e+00> : vector<16xf32>
    %591 = vector.multi_reduction <add>, %590, %cst_180 [1] : vector<16x32xf32> to vector<16xf32>
    %592 = vector.shape_cast %591 : vector<16xf32> to vector<16x1xf32>
    %cst_181 = arith.constant 3.200000e+01 : f32
    %593 = vector.broadcast %cst_181 : f32 to vector<16x1xf32>
    %594 = arith.divf %592, %593 : vector<16x1xf32>
    %cst_182 = arith.constant 9.99999974E-6 : f32
    %595 = vector.broadcast %cst_182 : f32 to vector<16x1xf32>
    %596 = arith.addf %594, %595 : vector<16x1xf32>
    %597 = math.rsqrt %596 : vector<16x1xf32>
    %598 = vector.broadcast %597 : vector<16x1xf32> to vector<16x32xf32>
    %599 = arith.mulf %589, %598 : vector<16x32xf32>
    %600 = vector.broadcast %371 : vector<1x32xf32> to vector<16x32xf32>
    %601 = arith.mulf %599, %600 : vector<16x32xf32>
    %602 = vector.broadcast %372 : vector<1x32xf32> to vector<16x32xf32>
    %603 = arith.addf %601, %602 : vector<16x32xf32>
    %cst_183 = arith.constant dense<0.000000e+00> : vector<16xf32>
    %604 = vector.multi_reduction <add>, %603, %cst_183 [1] : vector<16x32xf32> to vector<16xf32>
    %605 = vector.shape_cast %604 : vector<16xf32> to vector<16x1xf32>
    %cst_184 = arith.constant 3.200000e+01 : f32
    %606 = vector.broadcast %cst_184 : f32 to vector<16x1xf32>
    %607 = arith.divf %605, %606 : vector<16x1xf32>
    %608 = vector.broadcast %607 : vector<16x1xf32> to vector<16x32xf32>
    %609 = arith.subf %603, %608 : vector<16x32xf32>
    %610 = arith.mulf %609, %609 : vector<16x32xf32>
    %cst_185 = arith.constant dense<0.000000e+00> : vector<16xf32>
    %611 = vector.multi_reduction <add>, %610, %cst_185 [1] : vector<16x32xf32> to vector<16xf32>
    %612 = vector.shape_cast %611 : vector<16xf32> to vector<16x1xf32>
    %cst_186 = arith.constant 3.200000e+01 : f32
    %613 = vector.broadcast %cst_186 : f32 to vector<16x1xf32>
    %614 = arith.divf %612, %613 : vector<16x1xf32>
    %cst_187 = arith.constant 9.99999974E-6 : f32
    %615 = vector.broadcast %cst_187 : f32 to vector<16x1xf32>
    %616 = arith.addf %614, %615 : vector<16x1xf32>
    %617 = math.rsqrt %616 : vector<16x1xf32>
    %618 = vector.broadcast %617 : vector<16x1xf32> to vector<16x32xf32>
    %619 = arith.mulf %609, %618 : vector<16x32xf32>
    %620 = vector.broadcast %104 : vector<1x32xf32> to vector<16x32xf32>
    %621 = arith.mulf %619, %620 : vector<16x32xf32>
    %622 = vector.broadcast %105 : vector<1x32xf32> to vector<16x32xf32>
    %623 = arith.addf %621, %622 : vector<16x32xf32>
    %624 = vector.shape_cast %623 : vector<16x32xf32> to vector<1x16x32xf32>
    %625 = vector.shape_cast %111 : vector<16x32xf32> to vector<1x16x32xf32>
    %626 = arith.mulf %625, %624 : vector<1x16x32xf32>
    %cst_188 = arith.constant dense<0.000000e+00> : vector<1x16xf32>
    %627 = vector.multi_reduction <add>, %626, %cst_188 [2] : vector<1x16x32xf32> to vector<1x16xf32>
    %c0_189 = arith.constant 0 : index
    %c0_190 = arith.constant 0 : index
    %628 = vector.load %arg10[%c0_189, %c0_190] : memref<1x16xf32, #tpu.memory_space<vmem>>, vector<1x16xf32>
    %629 = arith.addf %627, %628 : vector<1x16xf32>
    %630 = vector.extract_strided_slice %545 {offsets = [0, 0, 0], sizes = [1, 1, 16], strides = [1, 1, 1]} : vector<1x16x16xf32> to vector<1x1x16xf32>
    %631 = vector.shape_cast %630 : vector<1x1x16xf32> to vector<1x16xf32>
    %c0_191 = arith.constant 0 : index
    %c0_192 = arith.constant 0 : index
    %c0_193 = arith.constant 0 : index
    %632 = vector.load %arg11[%c0_191, %c0_192, %c0_193] : memref<1x1x272xf32, #tpu.memory_space<vmem>>, vector<1x1x16xf32>
    %633 = vector.shape_cast %632 : vector<1x1x16xf32> to vector<1x16xf32>
    %634 = vector.shape_cast %631 : vector<1x16xf32> to vector<1x1x16xf32>
    tpu.vector_store %arg11[%c0_191, %c0_192, %c0_193], %634 {strides = array<i32>} : memref<1x1x272xf32, #tpu.memory_space<vmem>>, vector<1x1x16xf32>,
    %635 = vector.extract_strided_slice %545 {offsets = [0, 1, 0], sizes = [1, 1, 16], strides = [1, 1, 1]} : vector<1x16x16xf32> to vector<1x1x16xf32>
    %636 = vector.shape_cast %635 : vector<1x1x16xf32> to vector<1x16xf32>
    %c0_194 = arith.constant 0 : index
    %c0_195 = arith.constant 0 : index
    %c16_196 = arith.constant 16 : index
    %637 = vector.load %arg11[%c0_194, %c0_195, %c16_196] : memref<1x1x272xf32, #tpu.memory_space<vmem>>, vector<1x1x16xf32>
    %638 = vector.shape_cast %637 : vector<1x1x16xf32> to vector<1x16xf32>
    %639 = vector.shape_cast %636 : vector<1x16xf32> to vector<1x1x16xf32>
    tpu.vector_store %arg11[%c0_194, %c0_195, %c16_196], %639 {strides = array<i32>} : memref<1x1x272xf32, #tpu.memory_space<vmem>>, vector<1x1x16xf32>,
    %640 = vector.extract_strided_slice %545 {offsets = [0, 2, 0], sizes = [1, 1, 16], strides = [1, 1, 1]} : vector<1x16x16xf32> to vector<1x1x16xf32>
    %641 = vector.shape_cast %640 : vector<1x1x16xf32> to vector<1x16xf32>
    %c0_197 = arith.constant 0 : index
    %c0_198 = arith.constant 0 : index
    %c32_199 = arith.constant 32 : index
    %642 = vector.load %arg11[%c0_197, %c0_198, %c32_199] : memref<1x1x272xf32, #tpu.memory_space<vmem>>, vector<1x1x16xf32>
    %643 = vector.shape_cast %642 : vector<1x1x16xf32> to vector<1x16xf32>
    %644 = vector.shape_cast %641 : vector<1x16xf32> to vector<1x1x16xf32>
    tpu.vector_store %arg11[%c0_197, %c0_198, %c32_199], %644 {strides = array<i32>} : memref<1x1x272xf32, #tpu.memory_space<vmem>>, vector<1x1x16xf32>,
    %645 = vector.extract_strided_slice %545 {offsets = [0, 3, 0], sizes = [1, 1, 16], strides = [1, 1, 1]} : vector<1x16x16xf32> to vector<1x1x16xf32>
    %646 = vector.shape_cast %645 : vector<1x1x16xf32> to vector<1x16xf32>
    %c0_200 = arith.constant 0 : index
    %c0_201 = arith.constant 0 : index
    %c48 = arith.constant 48 : index
    %647 = vector.load %arg11[%c0_200, %c0_201, %c48] : memref<1x1x272xf32, #tpu.memory_space<vmem>>, vector<1x1x16xf32>
    %648 = vector.shape_cast %647 : vector<1x1x16xf32> to vector<1x16xf32>
    %649 = vector.shape_cast %646 : vector<1x16xf32> to vector<1x1x16xf32>
    tpu.vector_store %arg11[%c0_200, %c0_201, %c48], %649 {strides = array<i32>} : memref<1x1x272xf32, #tpu.memory_space<vmem>>, vector<1x1x16xf32>,
    %650 = vector.extract_strided_slice %545 {offsets = [0, 4, 0], sizes = [1, 1, 16], strides = [1, 1, 1]} : vector<1x16x16xf32> to vector<1x1x16xf32>
    %651 = vector.shape_cast %650 : vector<1x1x16xf32> to vector<1x16xf32>
    %c0_202 = arith.constant 0 : index
    %c0_203 = arith.constant 0 : index
    %c64 = arith.constant 64 : index
    %652 = vector.load %arg11[%c0_202, %c0_203, %c64] : memref<1x1x272xf32, #tpu.memory_space<vmem>>, vector<1x1x16xf32>
    %653 = vector.shape_cast %652 : vector<1x1x16xf32> to vector<1x16xf32>
    %654 = vector.shape_cast %651 : vector<1x16xf32> to vector<1x1x16xf32>
    tpu.vector_store %arg11[%c0_202, %c0_203, %c64], %654 {strides = array<i32>} : memref<1x1x272xf32, #tpu.memory_space<vmem>>, vector<1x1x16xf32>,
    %655 = vector.extract_strided_slice %545 {offsets = [0, 5, 0], sizes = [1, 1, 16], strides = [1, 1, 1]} : vector<1x16x16xf32> to vector<1x1x16xf32>
    %656 = vector.shape_cast %655 : vector<1x1x16xf32> to vector<1x16xf32>
    %c0_204 = arith.constant 0 : index
    %c0_205 = arith.constant 0 : index
    %c80 = arith.constant 80 : index
    %657 = vector.load %arg11[%c0_204, %c0_205, %c80] : memref<1x1x272xf32, #tpu.memory_space<vmem>>, vector<1x1x16xf32>
    %658 = vector.shape_cast %657 : vector<1x1x16xf32> to vector<1x16xf32>
    %659 = vector.shape_cast %656 : vector<1x16xf32> to vector<1x1x16xf32>
    tpu.vector_store %arg11[%c0_204, %c0_205, %c80], %659 {strides = array<i32>} : memref<1x1x272xf32, #tpu.memory_space<vmem>>, vector<1x1x16xf32>,
    %660 = vector.extract_strided_slice %545 {offsets = [0, 6, 0], sizes = [1, 1, 16], strides = [1, 1, 1]} : vector<1x16x16xf32> to vector<1x1x16xf32>
    %661 = vector.shape_cast %660 : vector<1x1x16xf32> to vector<1x16xf32>
    %c0_206 = arith.constant 0 : index
    %c0_207 = arith.constant 0 : index
    %c96 = arith.constant 96 : index
    %662 = vector.load %arg11[%c0_206, %c0_207, %c96] : memref<1x1x272xf32, #tpu.memory_space<vmem>>, vector<1x1x16xf32>
    %663 = vector.shape_cast %662 : vector<1x1x16xf32> to vector<1x16xf32>
    %664 = vector.shape_cast %661 : vector<1x16xf32> to vector<1x1x16xf32>
    tpu.vector_store %arg11[%c0_206, %c0_207, %c96], %664 {strides = array<i32>} : memref<1x1x272xf32, #tpu.memory_space<vmem>>, vector<1x1x16xf32>,
    %665 = vector.extract_strided_slice %545 {offsets = [0, 7, 0], sizes = [1, 1, 16], strides = [1, 1, 1]} : vector<1x16x16xf32> to vector<1x1x16xf32>
    %666 = vector.shape_cast %665 : vector<1x1x16xf32> to vector<1x16xf32>
    %c0_208 = arith.constant 0 : index
    %c0_209 = arith.constant 0 : index
    %c112 = arith.constant 112 : index
    %667 = vector.load %arg11[%c0_208, %c0_209, %c112] : memref<1x1x272xf32, #tpu.memory_space<vmem>>, vector<1x1x16xf32>
    %668 = vector.shape_cast %667 : vector<1x1x16xf32> to vector<1x16xf32>
    %669 = vector.shape_cast %666 : vector<1x16xf32> to vector<1x1x16xf32>
    tpu.vector_store %arg11[%c0_208, %c0_209, %c112], %669 {strides = array<i32>} : memref<1x1x272xf32, #tpu.memory_space<vmem>>, vector<1x1x16xf32>,
    %670 = vector.extract_strided_slice %545 {offsets = [0, 8, 0], sizes = [1, 1, 16], strides = [1, 1, 1]} : vector<1x16x16xf32> to vector<1x1x16xf32>
    %671 = vector.shape_cast %670 : vector<1x1x16xf32> to vector<1x16xf32>
    %c0_210 = arith.constant 0 : index
    %c0_211 = arith.constant 0 : index
    %c128 = arith.constant 128 : index
    %672 = vector.load %arg11[%c0_210, %c0_211, %c128] : memref<1x1x272xf32, #tpu.memory_space<vmem>>, vector<1x1x16xf32>
    %673 = vector.shape_cast %672 : vector<1x1x16xf32> to vector<1x16xf32>
    %674 = vector.shape_cast %671 : vector<1x16xf32> to vector<1x1x16xf32>
    tpu.vector_store %arg11[%c0_210, %c0_211, %c128], %674 {strides = array<i32>} : memref<1x1x272xf32, #tpu.memory_space<vmem>>, vector<1x1x16xf32>,
    %675 = vector.extract_strided_slice %545 {offsets = [0, 9, 0], sizes = [1, 1, 16], strides = [1, 1, 1]} : vector<1x16x16xf32> to vector<1x1x16xf32>
    %676 = vector.shape_cast %675 : vector<1x1x16xf32> to vector<1x16xf32>
    %c0_212 = arith.constant 0 : index
    %c0_213 = arith.constant 0 : index
    %c144 = arith.constant 144 : index
    %677 = vector.load %arg11[%c0_212, %c0_213, %c144] : memref<1x1x272xf32, #tpu.memory_space<vmem>>, vector<1x1x16xf32>
    %678 = vector.shape_cast %677 : vector<1x1x16xf32> to vector<1x16xf32>
    %679 = vector.shape_cast %676 : vector<1x16xf32> to vector<1x1x16xf32>
    tpu.vector_store %arg11[%c0_212, %c0_213, %c144], %679 {strides = array<i32>} : memref<1x1x272xf32, #tpu.memory_space<vmem>>, vector<1x1x16xf32>,
    %680 = vector.extract_strided_slice %545 {offsets = [0, 10, 0], sizes = [1, 1, 16], strides = [1, 1, 1]} : vector<1x16x16xf32> to vector<1x1x16xf32>
    %681 = vector.shape_cast %680 : vector<1x1x16xf32> to vector<1x16xf32>
    %c0_214 = arith.constant 0 : index
    %c0_215 = arith.constant 0 : index
    %c160 = arith.constant 160 : index
    %682 = vector.load %arg11[%c0_214, %c0_215, %c160] : memref<1x1x272xf32, #tpu.memory_space<vmem>>, vector<1x1x16xf32>
    %683 = vector.shape_cast %682 : vector<1x1x16xf32> to vector<1x16xf32>
    %684 = vector.shape_cast %681 : vector<1x16xf32> to vector<1x1x16xf32>
    tpu.vector_store %arg11[%c0_214, %c0_215, %c160], %684 {strides = array<i32>} : memref<1x1x272xf32, #tpu.memory_space<vmem>>, vector<1x1x16xf32>,
    %685 = vector.extract_strided_slice %545 {offsets = [0, 11, 0], sizes = [1, 1, 16], strides = [1, 1, 1]} : vector<1x16x16xf32> to vector<1x1x16xf32>
    %686 = vector.shape_cast %685 : vector<1x1x16xf32> to vector<1x16xf32>
    %c0_216 = arith.constant 0 : index
    %c0_217 = arith.constant 0 : index
    %c176 = arith.constant 176 : index
    %687 = vector.load %arg11[%c0_216, %c0_217, %c176] : memref<1x1x272xf32, #tpu.memory_space<vmem>>, vector<1x1x16xf32>
    %688 = vector.shape_cast %687 : vector<1x1x16xf32> to vector<1x16xf32>
    %689 = vector.shape_cast %686 : vector<1x16xf32> to vector<1x1x16xf32>
    tpu.vector_store %arg11[%c0_216, %c0_217, %c176], %689 {strides = array<i32>} : memref<1x1x272xf32, #tpu.memory_space<vmem>>, vector<1x1x16xf32>,
    %690 = vector.extract_strided_slice %545 {offsets = [0, 12, 0], sizes = [1, 1, 16], strides = [1, 1, 1]} : vector<1x16x16xf32> to vector<1x1x16xf32>
    %691 = vector.shape_cast %690 : vector<1x1x16xf32> to vector<1x16xf32>
    %c0_218 = arith.constant 0 : index
    %c0_219 = arith.constant 0 : index
    %c192 = arith.constant 192 : index
    %692 = vector.load %arg11[%c0_218, %c0_219, %c192] : memref<1x1x272xf32, #tpu.memory_space<vmem>>, vector<1x1x16xf32>
    %693 = vector.shape_cast %692 : vector<1x1x16xf32> to vector<1x16xf32>
    %694 = vector.shape_cast %691 : vector<1x16xf32> to vector<1x1x16xf32>
    tpu.vector_store %arg11[%c0_218, %c0_219, %c192], %694 {strides = array<i32>} : memref<1x1x272xf32, #tpu.memory_space<vmem>>, vector<1x1x16xf32>,
    %695 = vector.extract_strided_slice %545 {offsets = [0, 13, 0], sizes = [1, 1, 16], strides = [1, 1, 1]} : vector<1x16x16xf32> to vector<1x1x16xf32>
    %696 = vector.shape_cast %695 : vector<1x1x16xf32> to vector<1x16xf32>
    %c0_220 = arith.constant 0 : index
    %c0_221 = arith.constant 0 : index
    %c208 = arith.constant 208 : index
    %697 = vector.load %arg11[%c0_220, %c0_221, %c208] : memref<1x1x272xf32, #tpu.memory_space<vmem>>, vector<1x1x16xf32>
    %698 = vector.shape_cast %697 : vector<1x1x16xf32> to vector<1x16xf32>
    %699 = vector.shape_cast %696 : vector<1x16xf32> to vector<1x1x16xf32>
    tpu.vector_store %arg11[%c0_220, %c0_221, %c208], %699 {strides = array<i32>} : memref<1x1x272xf32, #tpu.memory_space<vmem>>, vector<1x1x16xf32>,
    %700 = vector.extract_strided_slice %545 {offsets = [0, 14, 0], sizes = [1, 1, 16], strides = [1, 1, 1]} : vector<1x16x16xf32> to vector<1x1x16xf32>
    %701 = vector.shape_cast %700 : vector<1x1x16xf32> to vector<1x16xf32>
    %c0_222 = arith.constant 0 : index
    %c0_223 = arith.constant 0 : index
    %c224 = arith.constant 224 : index
    %702 = vector.load %arg11[%c0_222, %c0_223, %c224] : memref<1x1x272xf32, #tpu.memory_space<vmem>>, vector<1x1x16xf32>
    %703 = vector.shape_cast %702 : vector<1x1x16xf32> to vector<1x16xf32>
    %704 = vector.shape_cast %701 : vector<1x16xf32> to vector<1x1x16xf32>
    tpu.vector_store %arg11[%c0_222, %c0_223, %c224], %704 {strides = array<i32>} : memref<1x1x272xf32, #tpu.memory_space<vmem>>, vector<1x1x16xf32>,
    %705 = vector.extract_strided_slice %545 {offsets = [0, 15, 0], sizes = [1, 1, 16], strides = [1, 1, 1]} : vector<1x16x16xf32> to vector<1x1x16xf32>
    %706 = vector.shape_cast %705 : vector<1x1x16xf32> to vector<1x16xf32>
    %c0_224 = arith.constant 0 : index
    %c0_225 = arith.constant 0 : index
    %c240 = arith.constant 240 : index
    %707 = vector.load %arg11[%c0_224, %c0_225, %c240] : memref<1x1x272xf32, #tpu.memory_space<vmem>>, vector<1x1x16xf32>
    %708 = vector.shape_cast %707 : vector<1x1x16xf32> to vector<1x16xf32>
    %709 = vector.shape_cast %706 : vector<1x16xf32> to vector<1x1x16xf32>
    tpu.vector_store %arg11[%c0_224, %c0_225, %c240], %709 {strides = array<i32>} : memref<1x1x272xf32, #tpu.memory_space<vmem>>, vector<1x1x16xf32>,
    %c0_226 = arith.constant 0 : index
    %c0_227 = arith.constant 0 : index
    %c256 = arith.constant 256 : index
    %710 = vector.load %arg11[%c0_226, %c0_227, %c256] : memref<1x1x272xf32, #tpu.memory_space<vmem>>, vector<1x1x16xf32>
    %711 = vector.shape_cast %710 : vector<1x1x16xf32> to vector<1x16xf32>
    %712 = vector.shape_cast %629 : vector<1x16xf32> to vector<1x1x16xf32>
    tpu.vector_store %arg11[%c0_226, %c0_227, %c256], %712 {strides = array<i32>} : memref<1x1x272xf32, #tpu.memory_space<vmem>>, vector<1x1x16xf32>,
    return
  }
  func.func @transform_0(%arg0: i32) -> (i32, i32, i32) {
    %c0_i32 = arith.constant 0 : i32
    %c0_i32_0 = arith.constant 0 : i32
    %c0_i32_1 = arith.constant 0 : i32
    return %arg0, %c0_i32, %c0_i32_0 : i32, i32, i32
  }
  func.func @transform_1(%arg0: i32) -> (i32, i32) {
    %c0_i32 = arith.constant 0 : i32
    %c0_i32_0 = arith.constant 0 : i32
    %c0_i32_1 = arith.constant 0 : i32
    return %c0_i32, %c0_i32_0 : i32, i32
  }
  func.func @transform_2(%arg0: i32) -> (i32, i32) {
    %c0_i32 = arith.constant 0 : i32
    %c0_i32_0 = arith.constant 0 : i32
    %c0_i32_1 = arith.constant 0 : i32
    return %c0_i32, %c0_i32_0 : i32, i32
  }
  func.func @transform_3(%arg0: i32) -> (i32, i32) {
    %c0_i32 = arith.constant 0 : i32
    %c0_i32_0 = arith.constant 0 : i32
    %c0_i32_1 = arith.constant 0 : i32
    return %c0_i32, %c0_i32_0 : i32, i32
  }
  func.func @transform_4(%arg0: i32) -> (i32, i32, i32, i32) {
    %c0_i32 = arith.constant 0 : i32
    %c0_i32_0 = arith.constant 0 : i32
    %c0_i32_1 = arith.constant 0 : i32
    %c0_i32_2 = arith.constant 0 : i32
    %c0_i32_3 = arith.constant 0 : i32
    return %c0_i32, %c0_i32_0, %c0_i32_1, %c0_i32_2 : i32, i32, i32, i32
  }
  func.func @transform_5(%arg0: i32) -> (i32, i32, i32) {
    %c0_i32 = arith.constant 0 : i32
    %c0_i32_0 = arith.constant 0 : i32
    %c0_i32_1 = arith.constant 0 : i32
    %c0_i32_2 = arith.constant 0 : i32
    return %c0_i32, %c0_i32_0, %c0_i32_1 : i32, i32, i32
  }
  func.func @transform_6(%arg0: i32) -> (i32, i32, i32) {
    %c0_i32 = arith.constant 0 : i32
    %c0_i32_0 = arith.constant 0 : i32
    %c0_i32_1 = arith.constant 0 : i32
    %c0_i32_2 = arith.constant 0 : i32
    return %c0_i32, %c0_i32_0, %c0_i32_1 : i32, i32, i32
  }
  func.func @transform_7(%arg0: i32) -> (i32, i32, i32) {
    %c0_i32 = arith.constant 0 : i32
    %c0_i32_0 = arith.constant 0 : i32
    %c0_i32_1 = arith.constant 0 : i32
    %c0_i32_2 = arith.constant 0 : i32
    return %c0_i32, %c0_i32_0, %c0_i32_1 : i32, i32, i32
  }
  func.func @transform_8(%arg0: i32) -> (i32, i32, i32) {
    %c0_i32 = arith.constant 0 : i32
    %c0_i32_0 = arith.constant 0 : i32
    %c0_i32_1 = arith.constant 0 : i32
    %c0_i32_2 = arith.constant 0 : i32
    return %c0_i32, %c0_i32_0, %c0_i32_1 : i32, i32, i32
  }
  func.func @transform_9(%arg0: i32) -> (i32, i32) {
    %c0_i32 = arith.constant 0 : i32
    %c0_i32_0 = arith.constant 0 : i32
    %c0_i32_1 = arith.constant 0 : i32
    return %c0_i32, %c0_i32_0 : i32, i32
  }
  func.func @transform_10(%arg0: i32) -> (i32, i32, i32) {
    %c0_i32 = arith.constant 0 : i32
    %c0_i32_0 = arith.constant 0 : i32
    %c0_i32_1 = arith.constant 0 : i32
    return %arg0, %c0_i32, %c0_i32_0 : i32, i32, i32
  }
}

</mosaic_0001>

<bundles_post_ra>
// kernel: _lambda_.1
= control target key start
LH: loop header
LB: loop body
LE: loop exit
PB: predicated region body
PF: predicated region fallthrough
CT: control target
= control target key end

     0   :  { %s9981_s13 = smov 0   ;;  %s11839_s0 = inlined_call_operand.vmem [shape: f32[2,16,3], index: 0, kind: input, shape index: {}]   ;;  %s11840_s1 = inlined_call_operand.vmem [shape: f32[4,2048], index: 1, kind: input, shape index: {}]   ;;  %s11841_s2 = inlined_call_operand.vmem [shape: bf16[2048,32], index: 2, kind: input, shape index: {}]   ;;  %s11842_s3 = inlined_call_operand.vmem [shape: f32[35,32], index: 3, kind: input, shape index: {}]   ;;  %s11843_s4 = inlined_call_operand.vmem [shape: bf16[2,8,32,32], index: 4, kind: input, shape index: {}]   ;;  %s11844_s5 = inlined_call_operand.vmem [shape: f32[2,16,32], index: 5, kind: input, shape index: {}]   ;;  %s11845_s6 = inlined_call_operand.vmem [shape: bf16[2,32,64], index: 6, kind: input, shape index: {}]   ;;  %s11846_s7 = inlined_call_operand.vmem [shape: f32[2,1,64], index: 7, kind: input, shape index: {}]   ;;  %s11847_s8 = inlined_call_operand.vmem [shape: bf16[2,64,32], index: 8, kind: input, shape index: {}]   ;;  %s11848_s9 = inlined_call_operand.vmem [shape: f32[1,16], index: 9, kind: input, shape index: {}]   ;;  %s11849_s10 = inlined_call_operand.vmem [shape: f32[2,1,272], index: 10, kind: output, shape index: {}]  }
   0x1 LB: > { %s8056_s14 = sadd.s32 4294967295, %s9907_s13   ;;  %p8060_p0 = scmp.ge.s32.totalorder %s9907_s13, 1  ;;  %s9907_s13 = sphi %s9981_s13, %s20_s13  }
   0x2   : > { %p312_p1 = scmp.lt.s32.totalorder %s9907_s13, 3 }
   0x4   : > { %p313_p2 = pnand %p8060_p0, %p312_p1 }
   0x5   : > { %p349_p3 = scmp.lt.s32.totalorder (!%p313_p2), %s8056_s14, 1  ;;  %v9909_v0 = vmov (!%p313_p2), 1   ;;  %v9910_v1 = vmov (!%p313_p2), 0   ;;  %v9568_v2 = vld [vmem:[%s11841_s2 + $0x140] sm:$0xff] (!%p313_p2)   ;;  %v9572_v6 = vld [vmem:[%s11841_s2 + $0x148] sm:$0xff] (!%p313_p2)   ;;  %v9576_v12 = vld [vmem:[%s11841_s2 + $0x150] sm:$0xff] (!%p313_p2)   ;;  %v11850_v39 = vlaneseq (!%p313_p2) }
   0x6   : > { %316 = sbr.rel (%p313_p2) target bundleno = 9413 (0x24c5), region = 60  ;;  %9383 = vset.pattern.permute.xlu1 (!%p313_p2), %v9909_v0  ;;  %9382 = vset.pattern.permute.xlu0 (!%p313_p2), %v9910_v1  ;;  %v9569_v3 = vld [vmem:[%s11841_s2 + $0x1c0] sm:$0xff] (!%p313_p2)   ;;  %v9573_v9 = vld [vmem:[%s11841_s2 + $0x1c8] sm:$0xff] (!%p313_p2)   ;;  %v9577_v13 = vld [vmem:[%s11841_s2 + $0x1d0] sm:$0xff] (!%p313_p2)   ;;  %v9911_v17 = vmov (!%p313_p2), 2   ;;  %vm9913_vm0 = vmmov (!%p313_p2), 0  }
   0x7   : > { %8436 = vmatprep.subr.bf16.mxu0 (!%p313_p2), %v9568_v2  ;;  %v9570_v4 = vld [vmem:[%s11841_s2 + $0x100] sm:$0xff] (!%p313_p2)   ;;  %8458 = vmatprep.subr.bf16.mxu1 (!%p313_p2), %v9569_v3  ;;  %v9574_v10 = vld [vmem:[%s11841_s2 + $0x108] sm:$0xff] (!%p313_p2)   ;;  %v9578_v14 = vld [vmem:[%s11841_s2 + $0x110] sm:$0xff] (!%p313_p2)   ;;  %v10098_v40 = vshrl.u32 (!%p313_p2), %v11850_v39, 7  ;;  %vm2628_vm1 = vcmask (!%p313_p2), 261120   ;;  %vm2839_vm2 = vcmask (!%p313_p2), 64512  }
   0x8   : > { %v9571_v5 = vld [vmem:[%s11841_s2 + $0x180] sm:$0xff] (!%p313_p2)   ;;  %8437 = vmatpush3.bf16.msra.mxu0 (!%p313_p2), %v9570_v4  ;;  %v9575_v11 = vld [vmem:[%s11841_s2 + $0x188] sm:$0xff] (!%p313_p2)   ;;  %v9579_v15 = vld [vmem:[%s11841_s2 + $0x190] sm:$0xff] (!%p313_p2)   ;;  %s9914_s23 = smov (!%p313_p2), 112   ;;  %s9915_s24 = smov (!%p313_p2), 120   ;;  %vm3180_vm4 = vcmask (!%p313_p2), 130048  }
   0x9   : > { %8459 = vmatpush3.bf16.msra.mxu1 (!%p313_p2), %v9571_v5  ;;  %8438 = vmatprep.subr.bf16.mxu0 (!%p313_p2), %v9572_v6  ;;  %v9580_v16 = vld [vmem:[%s11841_s2 + $0x158] sm:$0xff] (!%p313_p2)   ;;  %v9584_v21 = vld [vmem:[%s11841_s2 + $0x160] sm:$0xff] (!%p313_p2)   ;;  %v9588_v25 = vld [vmem:[%s11841_s2 + $0x168] sm:$0xff] (!%p313_p2)   ;;  %v10101_v41 = vsub.s32 (!%p313_p2), 4, %v10098_v40  ;;  %v10104_v42 = vsub.s32 (!%p313_p2), 5, %v10098_v40  ;;  %v10107_v43 = vsub.s32 (!%p313_p2), 6, %v10098_v40 }
   0xa   : > { %8460 = vmatprep.subr.bf16.mxu1 (!%p313_p2), %v9573_v9  ;;  %v9581_v18 = vld [vmem:[%s11841_s2 + $0x1d8] sm:$0xff] (!%p313_p2)   ;;  %v9585_v22 = vld [vmem:[%s11841_s2 + $0x1e0] sm:$0xff] (!%p313_p2)   ;;  %v9589_v26 = vld [vmem:[%s11841_s2 + $0x1e8] sm:$0xff] (!%p313_p2)   ;;  %v10110_v44 = vsub.s32 (!%p313_p2), 7, %v10098_v40  ;;  %v10124_v52 = vsub.s32 (!%p313_p2), 0, %v10098_v40  ;;  %v10127_v53 = vsub.s32 (!%p313_p2), 1, %v10098_v40 }
   0xb   : > { %v9582_v19 = vld [vmem:[%s11841_s2 + $0x118] sm:$0xff] (!%p313_p2)   ;;  %v9586_v23 = vld [vmem:[%s11841_s2 + $0x120] sm:$0xff] (!%p313_p2)   ;;  %v9590_v27 = vld [vmem:[%s11841_s2 + $0x128] sm:$0xff] (!%p313_p2)   ;;  %v10132_v56 = vsub.s32 (!%p313_p2), 2, %v10098_v40  ;;  %v10135_v57 = vsub.s32 (!%p313_p2), 3, %v10098_v40  ;;  %s9916_s25 = smov (!%p313_p2), 104  }
   0xc   : > { %8439 = vmatpush3.bf16.msra.mxu0 (!%p313_p2), %v9574_v10  ;;  %v9583_v20 = vld [vmem:[%s11841_s2 + $0x198] sm:$0xff] (!%p313_p2)   ;;  %v9587_v24 = vld [vmem:[%s11841_s2 + $0x1a0] sm:$0xff] (!%p313_p2)   ;;  %v9591_v28 = vld [vmem:[%s11841_s2 + $0x1a8] sm:$0xff] (!%p313_p2)   ;;  %s9917_s30 = smov (!%p313_p2), 8   ;;  %s9918_s11 = smov (!%p313_p2), 16   ;;  %vm3621_vm5 = vcmask (!%p313_p2), 195584  }
   0xd   : > { %s11884_s14 = smov (!%p349_p3, %s8056_s14), 1  ;;  %8461 = vmatpush3.bf16.msra.mxu1 %v9575_v11  ;;  %8440 = vmatprep.subr.bf16.mxu0 %v9576_v12  ;;  %v9592_v29 = vld [vmem:[%s11841_s2 + $0x170] sm:$0xff]   ;;  %v9596_v33 = vld [vmem:[%s11841_s2 + $0x178] sm:$0xff]   ;;  %v9600_v37 = vld [vmem:[%s11841_s2 + $0x40] sm:$0xff]   ;;  %s9919_s12 = smov 24   ;;  %vm4965_vm6 = vcmask 523264  }
   0xe   : > { %s8435_s21 = sshll.u32 %s11884_s14, 4  ;;  %8462 = vmatprep.subr.bf16.mxu1 %v9577_v13  ;;  %v9593_v30 = vld [vmem:[%s11841_s2 + $0x1f0] sm:$0xff]   ;;  %v9597_v34 = vld [vmem:[%s11841_s2 + $0x1f8] sm:$0xff]   ;;  %v9601_v38 = vld [vmem:[%s11841_s2 + $0xc0] sm:$0xff]   ;;  %s9921_s27 = smov 32  }
   0xf   : > { %s353_s28 = scalar_lea.vmem %s11839_s0, %s8435_s21  ;;  %v9594_v31 = vld [vmem:[%s11841_s2 + $0x130] sm:$0xff]   ;;  %v9598_v35 = vld [vmem:[%s11841_s2 + $0x138] sm:$0xff]   ;;  %v10156_v0 = vld [vmem:[%s11840_s1] sm:$0xff] }
  0x10   : > { %v359_v7 = vld [vmem:[%s353_s28] sm:$0xff]  ;;  %v360_v8 = vld [vmem:[%s353_s28 + $0x8] sm:$0xff]  ;;  %8441 = vmatpush3.bf16.msra.mxu0 %v9578_v14  ;;  %v9595_v32 = vld [vmem:[%s11841_s2 + $0x1b0] sm:$0xff]   ;;  %v382_v12 = vrot.slane %v10156_v0, %v10101_v41  ;;  %v434_v13 = vrot.slane %v10156_v0, %v10104_v42 }
  0x11   : > { %420 = vperm.xlu1 %9383, %v359_v7   ;;  %365 = vperm.xlu0 %9382, %v359_v7   ;;  %v9599_v36 = vld [vmem:[%s11841_s2 + $0x1b8] sm:$0xff]   ;;  %v659_v45 = vld [vmem:[%s11840_s1 + $0x10] sm:$0xff]  ;;  %v10169_v5 = vld [vmem:[%s11840_s1 + $0x8] sm:$0xff] }
  0x12   : > { %8463 = vmatpush3.bf16.msra.mxu1 %v9579_v15  ;;  %8442 = vmatprep.subr.bf16.mxu0 %v9580_v16  ;;  %v660_v46 = vld [vmem:[%s11840_s1 + $0x18] sm:$0xff]  ;;  %v670_v47 = vrot.slane %v659_v45, %v10101_v41  ;;  %v714_v48 = vrot.slane %v659_v45, %v10104_v42  ;;  %v766_v49 = vrot.slane %v659_v45, %v10107_v43  ;;  %vm10903_vm3 = vmpackc.low %vm2839_vm2, %vm2839_vm2 }
  0x13   : > { %8464 = vmatprep.subr.bf16.mxu1 %v9581_v18  ;;  %v818_v50 = vrot.slane %v659_v45, %v10110_v44  ;;  %v678_v51 = vrot.slane %v660_v46, %v10101_v41  ;;  %v722_v54 = vrot.slane %v660_v46, %v10104_v42  ;;  %v774_v55 = vrot.slane %v660_v46, %v10107_v43 }
  0x14   : > { %8443 = vmatpush3.bf16.msra.mxu0 %v9582_v19  ;;  %v10138_v58 = vrot.slane %v670_v47, %v10124_v52  ;;  %v10141_v59 = vrot.slane %v714_v48, %v10127_v53  ;;  %v10144_v60 = vrot.slane %v766_v49, %v10132_v56  ;;  %v826_v63 = vrot.slane %v660_v46, %v10110_v44 }
  0x15   : > { %424 = vperm.xlu1 %9383, %v360_v8   ;;  %370 = vperm.xlu0 %9382, %v360_v8   ;;  %v10147_v61 = vrot.slane %v818_v50, %v10135_v57  ;;  %v10150_v62 = vrot.slane %v678_v51, %v10124_v52  ;;  %v10162_v2 = vrot.slane %v774_v55, %v10132_v56 }
  0x16   : > { %8444 = vmatprep.subr.bf16.mxu0 %v9584_v21  ;;  %8465 = vmatpush3.bf16.msra.mxu1 %v9583_v20  ;;  %v666_v3 = vrot.slane %v659_v45, %v10124_v52  ;;  %v710_v4 = vrot.slane %v659_v45, %v10127_v53  ;;  %v762_v6 = vrot.slane %v659_v45, %v10132_v56 }
  0x17   : > { %8466 = vmatprep.subr.bf16.mxu1 %v9585_v22  ;;  %v718_v9 = vrot.slane %v660_v46, %v10127_v53  ;;  %v770_v10 = vrot.slane %v660_v46, %v10132_v56  ;;  %v822_v11 = vrot.slane %v660_v46, %v10135_v57  ;;  %v10182_v14 = vrot.slane %v826_v63, %v10135_v57 }
  0x18   : > { %8445 = vmatpush3.bf16.msra.mxu0 %v9586_v23  ;;  %v494_v15 = vrot.slane %v10156_v0, %v10107_v43  ;;  %v546_v16 = vrot.slane %v10156_v0, %v10110_v44  ;;  %v686_v18 = vrot.slane %v666_v3, %v10124_v52  ;;  %v730_v19 = vrot.slane %v710_v4, %v10127_v53 }
  0x19   : > { %9385 = vset.pattern.permute.xlu1 %v9911_v17  ;;  %9384 = vset.pattern.permute.xlu0 %v9911_v17  ;;  %v390_v17 = vrot.slane %v10169_v5, %v10101_v41  ;;  %v442_v20 = vrot.slane %v10169_v5, %v10104_v42  ;;  %v502_v21 = vrot.slane %v10169_v5, %v10107_v43 }
  0x1a   : > { %484 = vperm.xlu1 %9385, %v360_v8   ;;  %480 = vperm.xlu0 %9384, %v359_v7   ;;  %v814_v7 = vrot.slane %v659_v45, %v10135_v57  ;;  %v674_v8 = vrot.slane %v660_v46, %v10124_v52  ;;  %v10197_v22 = vrot.slane %v762_v6, %v10132_v56 }
  0x1b   : > { %8446 = vmatprep.subr.bf16.mxu0 %v9588_v25  ;;  %8467 = vmatpush3.bf16.msra.mxu1 %v9587_v24  ;;  %v738_v25 = vrot.slane %v718_v9, %v10127_v53 }
  0x1c   : > { %8468 = vmatprep.subr.bf16.mxu1 %v9589_v26  ;;  %8447 = vmatpush3.bf16.msra.mxu0 %v9590_v27  ;;  %v10200_v23 = vrot.slane %v814_v7, %v10135_v57  ;;  %v694_v24 = vrot.slane %v674_v8, %v10124_v52  ;;  %v10205_v26 = vrot.slane %v770_v10, %v10132_v56 }
  0x1d   : > { %8448 = vmatprep.subr.bf16.mxu0 %v9592_v29  ;;  %v10208_v27 = vrot.slane %v822_v11, %v10135_v57  ;;  %v454_v29 = vrot.slane %v434_v13, %v10127_v53 }
  0x1e   : > { %9566 = vset.pattern.permute.xlu1 %v9910_v1  ;;  %9567 = vset.pattern.permute.xlu0 %v9910_v1  ;;  %v10159_v1 = vrot.slane %v722_v54, %v10127_v53 }
  0x1f   : > { %8469 = vmatpush3.bf16.msra.mxu1 %v9591_v28  ;;  %v402_v28 = vrot.slane %v382_v12, %v10124_v52 }
  0x20   : > { %8470 = vmatprep.subr.bf16.mxu1 %v9593_v30  ;;  %8449 = vmatpush3.bf16.msra.mxu0 %v9594_v31  ;;  %v10213_v30 = vrot.slane %v494_v15, %v10132_v56  ;;  %v10216_v31 = vrot.slane %v546_v16, %v10135_v57 }
  0x21   : > { %8450 = vmatprep.subr.bf16.mxu0 %v9596_v33  ;;  %v554_v33 = vrot.slane %v10169_v5, %v10110_v44 }
  0x23   : > { %8471 = vmatpush3.bf16.msra.mxu1 %v9595_v32  ;;  %v410_v32 = vrot.slane %v390_v17, %v10124_v52  ;;  %v10253_v6 = vrot.slane %v554_v33, %v10135_v57 }
  0x24   : > { %8472 = vmatprep.subr.bf16.mxu1 %v9597_v34  ;;  %8451 = vmatpush3.bf16.msra.mxu0 %v9598_v35  ;;  %v462_v34 = vrot.slane %v442_v20, %v10127_v53  ;;  %v10223_v35 = vrot.slane %v502_v21, %v10132_v56 }
  0x25   : > { %8480 = vmatprep.subr.bf16.mxu0 %v9600_v37  ;;  %v430_v37 = vrot.slane %v10156_v0, %v10127_v53 }
  0x27   : > { %8473 = vmatpush3.bf16.msra.mxu1 %v9599_v36  ;;  %v378_v36 = vrot.slane %v10156_v0, %v10124_v52 }
  0x28   : > { %8502 = vmatprep.subr.bf16.mxu1 %v9601_v38 }
  0x90   : > { %v10229_v38 = vpop.permute.xlu1 %420  ;;  %v10231_v45 = vpop.permute.xlu0 %365 }
  0x91   : > { %v700_v50 = vmul.f32 %v10138_v58, %v10231_v45  ;;  %v744_v51 = vmul.f32 %v10141_v59, %v10229_v38  ;;  %v702_v54 = vmul.f32 %v10150_v62, %v10231_v45  ;;  %v746_v55 = vmul.f32 %v10159_v1, %v10229_v38 }
  0x92   : > { %v699_v63 = vmul.f32 %v686_v18, %v10231_v45  ;;  %v743_v3 = vmul.f32 %v730_v19, %v10229_v38  ;;  %v701_v4 = vmul.f32 %v694_v24, %v10231_v45  ;;  %v745_v9 = vmul.f32 %v738_v25, %v10229_v38 }
  0x93   : > { %v752_v7 = vadd.f32 %v744_v51, %v700_v50  ;;  %v754_v8 = vadd.f32 %v746_v55, %v702_v54  ;;  %v412_v10 = vmul.f32 %v402_v28, %v10231_v45  ;;  %v464_v15 = vmul.f32 %v454_v29, %v10229_v38 }
  0x94   : > { %v10257_v11 = vpop.permute.xlu1 %424  ;;  %v10259_v12 = vpop.permute.xlu0 %370  ;;  %v751_v13 = vadd.f32 %v743_v3, %v699_v63  ;;  %v414_v16 = vmul.f32 %v410_v32, %v10231_v45  ;;  %v466_v17 = vmul.f32 %v462_v34, %v10229_v38  ;;  %v753_v39 = vadd.f32 %v745_v9, %v701_v4 }
  0x95   : > { %v704_v20 = vmul.f32 %v10138_v58, %v10259_v12  ;;  %v748_v21 = vmul.f32 %v10141_v59, %v10257_v11  ;;  %v706_v33 = vmul.f32 %v10150_v62, %v10259_v12  ;;  %v750_v50 = vmul.f32 %v10159_v1, %v10257_v11 }
  0x96   : > { %v703_v51 = vmul.f32 %v686_v18, %v10259_v12  ;;  %v747_v54 = vmul.f32 %v730_v19, %v10257_v11  ;;  %v705_v55 = vmul.f32 %v694_v24, %v10259_v12  ;;  %v749_v63 = vmul.f32 %v738_v25, %v10257_v11 }
  0x97   : > { %v756_v3 = vadd.f32 %v748_v21, %v704_v20  ;;  %v416_v58 = vmul.f32 %v402_v28, %v10259_v12  ;;  %v468_v59 = vmul.f32 %v454_v29, %v10257_v11  ;;  %v758_v49 = vadd.f32 %v750_v50, %v706_v33 }
  0x98   : > { %v755_v48 = vadd.f32 %v747_v54, %v703_v51  ;;  %v757_v62 = vadd.f32 %v749_v63, %v705_v55  ;;  %v472_v47 = vadd.f32 %v464_v15, %v412_v10  ;;  %v418_v19 = vmul.f32 %v410_v32, %v10259_v12 }
  0x99   : > { %v10278_v46 = vpop.permute.xlu1 %484  ;;  %v10280_v1 = vpop.permute.xlu0 %480  ;;  %v476_v18 = vadd.f32 %v468_v59, %v416_v58  ;;  %v470_v24 = vmul.f32 %v462_v34, %v10257_v11  ;;  %v474_v25 = vadd.f32 %v466_v17, %v414_v16 }
  0x9a   : > { %v796_v4 = vmul.f32 %v10144_v60, %v10280_v1  ;;  %v800_v28 = vmul.f32 %v10144_v60, %v10278_v46  ;;  %v798_v29 = vmul.f32 %v10162_v2, %v10280_v1  ;;  %v802_v9 = vmul.f32 %v10162_v2, %v10278_v46 }
  0x9b   : > { %v795_v10 = vmul.f32 %v10197_v22, %v10280_v1  ;;  %v799_v32 = vmul.f32 %v10197_v22, %v10278_v46  ;;  %v797_v34 = vmul.f32 %v10205_v26, %v10280_v1  ;;  %v801_v15 = vmul.f32 %v10205_v26, %v10278_v46 }
  0x9c   : > { %v804_v16 = vadd.f32 %v796_v4, %v752_v7  ;;  %v808_v60 = vadd.f32 %v800_v28, %v756_v3  ;;  %v806_v17 = vadd.f32 %v798_v29, %v754_v8  ;;  %v810_v20 = vadd.f32 %v802_v9, %v758_v49 }
  0x9d   : > { %v803_v21 = vadd.f32 %v795_v10, %v751_v13  ;;  %v807_v33 = vadd.f32 %v799_v32, %v755_v48  ;;  %v805_v50 = vadd.f32 %v797_v34, %v753_v39  ;;  %v809_v2 = vadd.f32 %v801_v15, %v757_v62  ;;  %v9605_v62 = vld [vmem:[%s11841_s2 + $0xc8] sm:$0xff]  }
  0x9e   : > { %v848_v51 = vadd.f32 %v10147_v61, %v804_v16  ;;  %v852_v54 = vadd.f32 %v10147_v61, %v808_v60  ;;  %v850_v22 = vadd.f32 %v10182_v14, %v806_v17  ;;  %v854_v55 = vadd.f32 %v10182_v14, %v810_v20  ;;  %v9602_v61 = vld [vmem:[%s11841_s2] sm:$0xff]   ;;  %v9606_v20 = vld [vmem:[%s11841_s2 + $0x8] sm:$0xff]  }
  0x9f   : > { %v847_v63 = vadd.f32 %v10200_v23, %v803_v21  ;;  %v851_v26 = vadd.f32 %v10200_v23, %v807_v33  ;;  %v849_v7 = vadd.f32 %v10208_v27, %v805_v50  ;;  %v853_v49 = vadd.f32 %v10208_v27, %v809_v2  ;;  %v9603_v14 = vld [vmem:[%s11841_s2 + $0x80] sm:$0xff]   ;;  %v9604_v27 = vld [vmem:[%s11841_s2 + $0x48] sm:$0xff]  }
  0xa0   : > { %v856_v8 = vmax.f32 %v848_v51, 0.0  ;;  %v860_v48 = vmax.f32 %v852_v54, 0.0  ;;  %v858_v39 = vmax.f32 %v850_v22, 0.0  ;;  %v862_v13 = vmax.f32 %v854_v55, 0.0  ;;  %v10358_v2 = vld [vmem:[%s11840_s1 + $0x28] sm:$0xff] }
  0xa1   : > { %v855_v3 = vmax.f32 %v847_v63, 0.0  ;;  %v859_v58 = vmax.f32 %v851_v26, 0.0  ;;  %v857_v59 = vmax.f32 %v849_v7, 0.0  ;;  %v861_v23 = vmax.f32 %v853_v49, 0.0  ;;  %v9610_v63 = vld [vmem:[%s11841_s2 + $0x10] sm:$0xff]  }
  0xa2   : > { %v864_v4 = vpack.c.bf16 %v860_v48, %v856_v8  ;;  %v866_v28 = vpack.c.bf16 %v862_v13, %v858_v39  ;;  %v524_v29 = vmul.f32 %v10213_v30, %v10280_v1  ;;  %v528_v9 = vmul.f32 %v10213_v30, %v10278_v46  ;;  %v9607_v30 = vld [vmem:[%s11841_s2 + $0x88] sm:$0xff]   ;;  %v9611_v8 = vld [vmem:[%s11841_s2 + $0x90] sm:$0xff]   ;;  %v9612_v48 = vld [vmem:[%s11841_s2 + $0x58] sm:$0xff]  }
  0xa3   : > { %v863_v10 = vpack.c.bf16 %v859_v58, %v855_v3  ;;  %v865_v32 = vpack.c.bf16 %v861_v23, %v857_v59  ;;  %v478_v34 = vadd.f32 %v470_v24, %v418_v19  ;;  %v526_v15 = vmul.f32 %v10223_v35, %v10280_v1  ;;  %v10337_v19 = vld [vmem:[%s11840_s1 + $0x20] sm:$0xff]  ;;  %v9613_v3 = vld [vmem:[%s11841_s2 + $0xd8] sm:$0xff]  }
  0xa4   : > { %1155 = vmatprep.mubr.bf16.mxu0 %v864_v4  ;;  %1196 = vmatprep.mubr.bf16.mxu1 %v866_v28  ;;  %v532_v16 = vadd.f32 %v524_v29, %v472_v47  ;;  %v536_v60 = vadd.f32 %v528_v9, %v476_v18  ;;  %v530_v17 = vmul.f32 %v10223_v35, %v10278_v46  ;;  %v9608_v35 = vld [vmem:[%s11841_s2 + $0x50] sm:$0xff]   ;;  %v9614_v28 = vld [vmem:[%s11841_s2 + $0x18] sm:$0xff]  }
  0xa5   : > { %1156 = vmatmul.mubr.bf16.vlgmr.msra.gmra.mrb[0].mxu0 %v863_v10  ;;  %1197 = vmatmul.mubr.bf16.vlgmr.msra.gmra.mrb[0].mxu1 %v865_v32  ;;  %v534_v47 = vadd.f32 %v526_v15, %v474_v25  ;;  %v9609_v18 = vld [vmem:[%s11841_s2 + $0xd0] sm:$0xff]   ;;  %v398_v24 = vrot.slane %v378_v36, %v10124_v52  ;;  %v450_v21 = vrot.slane %v430_v37, %v10127_v53 }
  0xa6   : > { %8481 = vmatpush3.bf16.msra.mxu0 %v9602_v61  ;;  %8503 = vmatpush3.bf16.msra.mxu1 %v9603_v14  ;;  %v576_v25 = vadd.f32 %v10216_v31, %v532_v16  ;;  %v580_v33 = vadd.f32 %v10216_v31, %v536_v60  ;;  %v538_v50 = vadd.f32 %v530_v17, %v478_v34  ;;  %v9615_v17 = vld [vmem:[%s11841_s2 + $0x98] sm:$0xff]  }
  0xa7   : > { %v578_v51 = vadd.f32 %v10253_v6, %v534_v47  ;;  %8482 = vmatprep.subr.bf16.mxu0 %v9604_v27  ;;  %8504 = vmatprep.subr.bf16.mxu1 %v9605_v62  ;;  %v11852_v36 = vrot.slane %v10156_v0, %v10132_v56  ;;  %v498_v54 = vrot.slane %v10169_v5, %v10132_v56  ;;  %v9616_v47 = vld [vmem:[%s11841_s2 + $0x60] sm:$0xff]  }
  0xa8   : > { %v584_v22 = vmax.f32 %v576_v25, 0.0  ;;  %v588_v31 = vmax.f32 %v580_v33, 0.0  ;;  %v582_v55 = vadd.f32 %v10253_v6, %v538_v50  ;;  %v11853_v26 = vrot.slane %v10156_v0, %v10135_v57  ;;  %v9617_v33 = vld [vmem:[%s11841_s2 + $0xe0] sm:$0xff]  }
  0xa9   : > { %v510_v37 = vrot.slane %v11852_v36, %v10132_v56  ;;  %v586_v49 = vmax.f32 %v578_v51, 0.0  ;;  %v11854_v6 = vrot.slane %v10169_v5, %v10124_v52  ;;  %v550_v13 = vrot.slane %v10169_v5, %v10135_v57 }
  0xaa   : > { %v10375_v7 = vrot.slane %v11853_v26, %v10135_v57  ;;  %v1490_v0 = vrot.slane %v10337_v19, %v10101_v41  ;;  %v592_v61 = vpack.c.bf16 %v588_v31, %v584_v22  ;;  %v590_v14 = vmax.f32 %v582_v55, 0.0  ;;  %8483 = vmatpush3.bf16.msra.mxu0 %v9606_v20  ;;  %8505 = vmatpush3.bf16.msra.mxu1 %v9607_v30  ;;  %v9618_v26 = vld [vmem:[%s11841_s2 + $0x20] sm:$0xff]  }
  0xab   : > { %v406_v39 = vrot.slane %v11854_v6, %v10124_v52  ;;  %v1534_v58 = vrot.slane %v10337_v19, %v10104_v42  ;;  %v1586_v59 = vrot.slane %v10337_v19, %v10107_v43  ;;  %8484 = vmatprep.subr.bf16.mxu0 %v9608_v35  ;;  %8506 = vmatprep.subr.bf16.mxu1 %v9609_v18 }
  0xac   : > { %v1498_v23 = vrot.slane %v10358_v2, %v10101_v41  ;;  %v1542_v27 = vrot.slane %v10358_v2, %v10104_v42  ;;  %v1594_v62 = vrot.slane %v10358_v2, %v10107_v43  ;;  %1429 = vmatprep.mubr.bf16.mxu0 %v592_v61  ;;  %v594_v4 = vpack.c.bf16 %v590_v14, %v586_v49 }
  0xad   : > { %v411_v29 = vmul.f32 %v398_v24, %v10231_v45  ;;  %v463_v9 = vmul.f32 %v450_v21, %v10229_v38  ;;  %v11855_v10 = vrot.slane %v10169_v5, %v10127_v53  ;;  %v518_v34 = vrot.slane %v498_v54, %v10132_v56 }
  0xae   : > { %v10415_v15 = vrot.slane %v550_v13, %v10135_v57  ;;  %v1510_v16 = vrot.slane %v1490_v0, %v10124_v52  ;;  %v1638_v60 = vrot.slane %v10337_v19, %v10110_v44  ;;  %1470 = vmatprep.mubr.bf16.mxu1 %v594_v4  ;;  %8485 = vmatpush3.bf16.msra.mxu0 %v9610_v63  ;;  %v9621_v0 = vld [vmem:[%s11841_s2 + $0xe8] sm:$0xff]  }
  0xaf   : > { %v458_v32 = vrot.slane %v11855_v10, %v10127_v53  ;;  %v1554_v20 = vrot.slane %v1534_v58, %v10127_v53  ;;  %v1606_v5 = vrot.slane %v1586_v59, %v10132_v56  ;;  %v1646_v30 = vrot.slane %v10358_v2, %v10110_v44  ;;  %8507 = vmatpush3.bf16.msra.mxu1 %v9611_v8  ;;  %v9622_v4 = vld [vmem:[%s11841_s2 + $0x28] sm:$0xff]  }
  0xb0   : > { %8486 = vmatprep.subr.bf16.mxu0 %v9612_v48  ;;  %v1518_v35 = vrot.slane %v1498_v23, %v10124_v52  ;;  %v1562_v18 = vrot.slane %v1542_v27, %v10127_v53  ;;  %v1614_v25 = vrot.slane %v1594_v62, %v10132_v56  ;;  %8508 = vmatprep.subr.bf16.mxu1 %v9613_v3  ;;  %v9620_v48 = vld [vmem:[%s11841_s2 + $0x68] sm:$0xff]  }
  0xb1   : > { %v415_v50 = vmul.f32 %v398_v24, %v10259_v12  ;;  %v467_v51 = vmul.f32 %v450_v21, %v10257_v11  ;;  %v471_v36 = vadd.f32 %v463_v9, %v411_v29  ;;  %v523_v54 = vmul.f32 %v510_v37, %v10280_v1 }
  0xb2   : > { %v527_v22 = vmul.f32 %v510_v37, %v10278_v46  ;;  %v413_v31 = vmul.f32 %v406_v39, %v10231_v45  ;;  %v417_v55 = vmul.f32 %v406_v39, %v10259_v12  ;;  %v465_v63 = vmul.f32 %v458_v32, %v10229_v38  ;;  %8487 = vmatpush3.bf16.msra.mxu0 %v9614_v28  ;;  %v9619_v37 = vld [vmem:[%s11841_s2 + $0xa0] sm:$0xff]  }
  0xb3   : > { %v469_v24 = vmul.f32 %v458_v32, %v10257_v11  ;;  %v525_v21 = vmul.f32 %v518_v34, %v10280_v1  ;;  %v529_v49 = vmul.f32 %v518_v34, %v10278_v46  ;;  %v1520_v8 = vmul.f32 %v1510_v16, %v10231_v45  ;;  %8509 = vmatpush3.bf16.msra.mxu1 %v9615_v17  ;;  %v9623_v32 = vld [vmem:[%s11841_s2 + $0xa8] sm:$0xff]   ;;  %v9624_v34 = vld [vmem:[%s11841_s2 + $0x70] sm:$0xff]  }
  0xb4   : > { %8488 = vmatprep.subr.bf16.mxu0 %v9616_v47  ;;  %v1524_v6 = vmul.f32 %v1510_v16, %v10259_v12  ;;  %v1564_v39 = vmul.f32 %v1554_v20, %v10229_v38  ;;  %v1568_v13 = vmul.f32 %v1554_v20, %v10257_v11  ;;  %8510 = vmatprep.subr.bf16.mxu1 %v9617_v33 }
  0xb5   : > { %v1522_v61 = vmul.f32 %v1518_v35, %v10231_v45  ;;  %v1526_v14 = vmul.f32 %v1518_v35, %v10259_v12  ;;  %v1566_v3 = vmul.f32 %v1562_v18, %v10229_v38  ;;  %v1570_v58 = vmul.f32 %v1562_v18, %v10257_v11 }
  0xb6   : > { %v475_v59 = vadd.f32 %v467_v51, %v415_v50  ;;  %v531_v23 = vadd.f32 %v523_v54, %v471_v36  ;;  %v1616_v27 = vmul.f32 %v1606_v5, %v10280_v1  ;;  %v1620_v62 = vmul.f32 %v1606_v5, %v10278_v46  ;;  %8489 = vmatpush3.bf16.msra.mxu0 %v9618_v26  ;;  %v9625_v5 = vld [vmem:[%s11841_s2 + $0xf0] sm:$0xff]  }
  0xb7   : > { %v473_v28 = vadd.f32 %v465_v63, %v413_v31  ;;  %v477_v29 = vadd.f32 %v469_v24, %v417_v55  ;;  %v1618_v9 = vmul.f32 %v1614_v25, %v10280_v1  ;;  %v1622_v10 = vmul.f32 %v1614_v25, %v10278_v46  ;;  %8511 = vmatpush3.bf16.msra.mxu1 %v9619_v37  ;;  %v9626_v36 = vld [vmem:[%s11841_s2 + $0x30] sm:$0xff]   ;;  %v9629_v24 = vld [vmem:[%s11841_s2 + $0xf8] sm:$0xff]  }
  0xb8   : > { %8490 = vmatprep.subr.bf16.mxu0 %v9620_v48  ;;  %v535_v16 = vadd.f32 %v527_v22, %v475_v59  ;;  %v1572_v17 = vadd.f32 %v1564_v39, %v1520_v8  ;;  %v1576_v20 = vadd.f32 %v1568_v13, %v1524_v6  ;;  %8512 = vmatprep.subr.bf16.mxu1 %v9621_v0  ;;  %v9627_v55 = vld [vmem:[%s11841_s2 + $0xb0] sm:$0xff]   ;;  %v9630_v37 = vld [vmem:[%s11841_s2 + $0x38] sm:$0xff]   ;;  %v9634_v59 = vld [vmem:[%s11841_s2 + $0x200] sm:$0xff]  }
  0xb9   : > { %v533_v47 = vadd.f32 %v525_v21, %v473_v28  ;;  %v537_v35 = vadd.f32 %v529_v49, %v477_v29  ;;  %v1574_v18 = vadd.f32 %v1566_v3, %v1522_v61  ;;  %v1578_v25 = vadd.f32 %v1570_v58, %v1526_v14  ;;  %v9633_v14 = vld [vmem:[%s11841_s2 + $0x2c0] sm:$0xff]   ;;  %v9636_v29 = vld [vmem:[%s11841_s2 + $0x248] sm:$0xff]  }
  0xba   : > { %v1624_v33 = vadd.f32 %v1616_v27, %v1572_v17  ;;  %v1628_v50 = vadd.f32 %v1620_v62, %v1576_v20  ;;  %v1658_v51 = vrot.slane %v1638_v60, %v10135_v57  ;;  %8491 = vmatpush3.bf16.msra.mxu0 %v9622_v4  ;;  %v1666_v31 = vrot.slane %v1646_v30, %v10135_v57  ;;  %v9628_v60 = vld [vmem:[%s11841_s2 + $0x78] sm:$0xff]   ;;  %v9635_v4 = vld [vmem:[%s11841_s2 + $0x280] sm:$0xff]   ;;  %v9638_v17 = vld [vmem:[%s11841_s2 + $0x208] sm:$0xff]  }
  0xbb   : > { %v1626_v54 = vadd.f32 %v1618_v9, %v1574_v18  ;;  %v1630_v22 = vadd.f32 %v1622_v10, %v1578_v25  ;;  %8513 = vmatpush3.bf16.msra.mxu1 %v9623_v32  ;;  %8492 = vmatprep.subr.bf16.mxu0 %v9624_v34  ;;  %v575_v63 = vadd.f32 %v10375_v7, %v531_v23  ;;  %v9637_v34 = vld [vmem:[%s11841_s2 + $0x2c8] sm:$0xff]   ;;  %v10550_v18 = vld [vmem:[%s11840_s1 + $0x30] sm:$0xff] }
  0xbc   : > { %v579_v26 = vadd.f32 %v10375_v7, %v535_v16  ;;  %8514 = vmatprep.subr.bf16.mxu1 %v9625_v5  ;;  %v577_v30 = vadd.f32 %v10415_v15, %v533_v47  ;;  %v581_v21 = vadd.f32 %v10415_v15, %v537_v35  ;;  %v1668_v49 = vadd.f32 %v1658_v51, %v1624_v33  ;;  %v9631_v7 = vld [vmem:[%s11841_s2 + $0xb8] sm:$0xff]   ;;  %v9632_v15 = vld [vmem:[%s11841_s2 + $0x240] sm:$0xff]   ;;  %v9639_v5 = vld [vmem:[%s11841_s2 + $0x288] sm:$0xff]  }
  0xbd   : > { %v1672_v8 = vadd.f32 %v1658_v51, %v1628_v50  ;;  %v1670_v48 = vadd.f32 %v1666_v31, %v1626_v54  ;;  %v1674_v6 = vadd.f32 %v1666_v31, %v1630_v22  ;;  %v583_v39 = vmax.f32 %v575_v63, 0.0  ;;  %v9640_v47 = vld [vmem:[%s11841_s2 + $0x250] sm:$0xff]  }
  0xbe   : > { %8493 = vmatpush3.bf16.msra.mxu0 %v9626_v36  ;;  %v587_v13 = vmax.f32 %v579_v26, 0.0  ;;  %v585_v0 = vmax.f32 %v577_v30, 0.0  ;;  %v589_v61 = vmax.f32 %v581_v21, 0.0  ;;  %v1676_v3 = vmax.f32 %v1668_v49, 0.0  ;;  %v9641_v25 = vld [vmem:[%s11841_s2 + $0x2d0] sm:$0xff]  }
  0xbf   : > { %8515 = vmatpush3.bf16.msra.mxu1 %v9627_v55  ;;  %8494 = vmatprep.subr.bf16.mxu0 %v9628_v60  ;;  %v1680_v58 = vmax.f32 %v1672_v8, 0.0  ;;  %v1678_v23 = vmax.f32 %v1670_v48, 0.0  ;;  %v1682_v27 = vmax.f32 %v1674_v6, 0.0  ;;  %v1486_v9 = vrot.slane %v10337_v19, %v10124_v52  ;;  %v9642_v31 = vld [vmem:[%s11841_s2 + $0x210] sm:$0xff]   ;;  %v9645_v8 = vld [vmem:[%s11841_s2 + $0x2d8] sm:$0xff]  }
  0xc0   : > { %8516 = vmatprep.subr.bf16.mxu1 %v9629_v24  ;;  %v591_v62 = vpack.c.bf16 %v587_v13, %v583_v39  ;;  %v593_v28 = vpack.c.bf16 %v589_v61, %v585_v0  ;;  %v1530_v10 = vrot.slane %v10337_v19, %v10127_v53  ;;  %v1582_v20 = vrot.slane %v10337_v19, %v10132_v56  ;;  %v9644_v24 = vld [vmem:[%s11841_s2 + $0x258] sm:$0xff]  }
  0xc1   : > { %v1684_v32 = vpack.c.bf16 %v1680_v58, %v1676_v3  ;;  %v1686_v16 = vpack.c.bf16 %v1682_v27, %v1678_v23  ;;  %v1634_v35 = vrot.slane %v10337_v19, %v10135_v57  ;;  %v1506_v33 = vrot.slane %v1486_v9, %v10124_v52  ;;  %v10562_v19 = vld [vmem:[%s11840_s1 + $0x38] sm:$0xff]  ;;  %v9648_v27 = vld [vmem:[%s11841_s2 + $0x260] sm:$0xff]  }
  0xc2   : > { %8495 = vmatpush3.bf16.msra.mxu0 %v9630_v37  ;;  %v1550_v50 = vrot.slane %v1530_v10, %v10127_v53  ;;  %v1494_v51 = vrot.slane %v10358_v2, %v10124_v52  ;;  %v1538_v36 = vrot.slane %v10358_v2, %v10127_v53  ;;  %v1590_v54 = vrot.slane %v10358_v2, %v10132_v56  ;;  %v9646_v61 = vld [vmem:[%s11841_s2 + $0x218] sm:$0xff]  }
  0xc3   : > { %8517 = vmatpush3.bf16.msra.mxu1 %v9631_v7  ;;  %8524 = vmatprep.subr.bf16.mxu0 %v9632_v15  ;;  %v1642_v22 = vrot.slane %v10358_v2, %v10135_v57  ;;  %v1602_v55 = vrot.slane %v1582_v20, %v10132_v56  ;;  %v2038_v60 = vrot.slane %v10550_v18, %v10101_v41  ;;  %v9643_v2 = vld [vmem:[%s11841_s2 + $0x290] sm:$0xff]   ;;  %v9647_v23 = vld [vmem:[%s11841_s2 + $0x298] sm:$0xff]  }
  0xc4   : > { %8546 = vmatprep.subr.bf16.mxu1 %v9633_v14  ;;  %v2082_v63 = vrot.slane %v10550_v18, %v10104_v42  ;;  %v2134_v26 = vrot.slane %v10550_v18, %v10107_v43  ;;  %v2046_v30 = vrot.slane %v10562_v19, %v10101_v41  ;;  %v2090_v21 = vrot.slane %v10562_v19, %v10104_v42 }
  0xc5   : > { %1430 = vmatmul.mubr.bf16.vlgmr.msra.gmra.mrb[4].mxu0 %v591_v62  ;;  %v2142_v49 = vrot.slane %v10562_v19, %v10107_v43  ;;  %v1519_v37 = vmul.f32 %v1506_v33, %v10231_v45  ;;  %v1563_v48 = vmul.f32 %v1550_v50, %v10229_v38  ;;  %v10598_v6 = vrot.slane %v1634_v35, %v10135_v57 }
  0xc6   : > { %1471 = vmatmul.mubr.bf16.vlgmr.msra.gmra.mrb[4].mxu1 %v593_v28  ;;  %8525 = vmatpush3.bf16.msra.mxu0 %v9634_v59  ;;  %v1514_v7 = vrot.slane %v1494_v51, %v10124_v52  ;;  %v1558_v39 = vrot.slane %v1538_v36, %v10127_v53  ;;  %v1610_v13 = vrot.slane %v1590_v54, %v10132_v56  ;;  %v9651_v51 = vld [vmem:[%s11841_s2 + $0x2a0] sm:$0xff]   ;;  %v9652_v36 = vld [vmem:[%s11841_s2 + $0x268] sm:$0xff]  }
  0xc7   : > { %1975 = vmatprep.mubr.bf16.mxu0 %v1684_v32  ;;  %8547 = vmatpush3.bf16.msra.mxu1 %v9635_v4  ;;  %v10604_v15 = vrot.slane %v1642_v22, %v10135_v57  ;;  %v2186_v0 = vrot.slane %v10550_v18, %v10110_v44  ;;  %v2058_v14 = vrot.slane %v2038_v60, %v10124_v52 }
  0xc8   : > { %2016 = vmatprep.mubr.bf16.mxu1 %v1686_v16  ;;  %8526 = vmatprep.subr.bf16.mxu0 %v9636_v29  ;;  %v2102_v3 = vrot.slane %v2082_v63, %v10127_v53  ;;  %v2154_v58 = vrot.slane %v2134_v26, %v10132_v56  ;;  %v2194_v59 = vrot.slane %v10562_v19, %v10110_v44  ;;  %v9649_v29 = vld [vmem:[%s11841_s2 + $0x2e0] sm:$0xff]  }
  0xc9   : > { %8548 = vmatprep.subr.bf16.mxu1 %v9637_v34  ;;  %v2066_v62 = vrot.slane %v2046_v30, %v10124_v52  ;;  %v2110_v4 = vrot.slane %v2090_v21, %v10127_v53  ;;  %v2162_v28 = vrot.slane %v2142_v49, %v10132_v56  ;;  %v1523_v9 = vmul.f32 %v1506_v33, %v10259_v12 }
  0xca   : > { %8527 = vmatpush3.bf16.msra.mxu0 %v9638_v17  ;;  %v1567_v10 = vmul.f32 %v1550_v50, %v10257_v11  ;;  %v1571_v32 = vadd.f32 %v1563_v48, %v1519_v37  ;;  %v1615_v34 = vmul.f32 %v1602_v55, %v10280_v1  ;;  %v1619_v16 = vmul.f32 %v1602_v55, %v10278_v46  ;;  %v9653_v55 = vld [vmem:[%s11841_s2 + $0x2e8] sm:$0xff]  }
  0xcb   : > { %8549 = vmatpush3.bf16.msra.mxu1 %v9639_v5  ;;  %8528 = vmatprep.subr.bf16.mxu0 %v9640_v47  ;;  %v1521_v17 = vmul.f32 %v1514_v7, %v10231_v45  ;;  %v1525_v20 = vmul.f32 %v1514_v7, %v10259_v12  ;;  %v1565_v5 = vmul.f32 %v1558_v39, %v10229_v38  ;;  %v9650_v47 = vld [vmem:[%s11841_s2 + $0x220] sm:$0xff]  }
  0xcc   : > { %8550 = vmatprep.subr.bf16.mxu1 %v9641_v25  ;;  %v1569_v35 = vmul.f32 %v1558_v39, %v10257_v11  ;;  %v1617_v25 = vmul.f32 %v1610_v13, %v10280_v1  ;;  %v1621_v33 = vmul.f32 %v1610_v13, %v10278_v46  ;;  %v2068_v50 = vmul.f32 %v2058_v14, %v10231_v45  ;;  %v9655_v13 = vld [vmem:[%s11841_s2 + $0x2a8] sm:$0xff]  }
  0xcd   : > { %v2072_v54 = vmul.f32 %v2058_v14, %v10259_v12  ;;  %v2112_v22 = vmul.f32 %v2102_v3, %v10229_v38  ;;  %v2070_v60 = vmul.f32 %v2066_v62, %v10231_v45  ;;  %v2074_v63 = vmul.f32 %v2066_v62, %v10259_v12 }
  0xce   : > { %8529 = vmatpush3.bf16.msra.mxu0 %v9642_v31  ;;  %v2116_v31 = vmul.f32 %v2102_v3, %v10257_v11  ;;  %v2114_v26 = vmul.f32 %v2110_v4, %v10229_v38  ;;  %v1623_v30 = vadd.f32 %v1615_v34, %v1571_v32  ;;  %v2164_v21 = vmul.f32 %v2154_v58, %v10280_v1  ;;  %v9658_v32 = vld [vmem:[%s11841_s2 + $0x230] sm:$0xff]  }
  0xcf   : > { %8551 = vmatpush3.bf16.msra.mxu1 %v9643_v2  ;;  %8530 = vmatprep.subr.bf16.mxu0 %v9644_v24  ;;  %v2118_v2 = vmul.f32 %v2110_v4, %v10257_v11  ;;  %v1575_v24 = vadd.f32 %v1567_v10, %v1523_v9  ;;  %v2168_v49 = vmul.f32 %v2154_v58, %v10278_v46 }
  0xd0   : > { %8552 = vmatprep.subr.bf16.mxu1 %v9645_v8  ;;  %v9654_v8 = vld [vmem:[%s11841_s2 + $0x228] sm:$0xff]   ;;  %v1573_v37 = vadd.f32 %v1565_v5, %v1521_v17  ;;  %v1577_v48 = vadd.f32 %v1569_v35, %v1525_v20  ;;  %v2166_v7 = vmul.f32 %v2162_v28, %v10280_v1  ;;  %v2170_v39 = vmul.f32 %v2162_v28, %v10278_v46  ;;  %v9659_v20 = vld [vmem:[%s11841_s2 + $0x2b0] sm:$0xff]   ;;  %v9661_v35 = vld [vmem:[%s11841_s2 + $0x2f8] sm:$0xff]  }
  0xd1   : > { %v1627_v14 = vadd.f32 %v1619_v16, %v1575_v24  ;;  %v2120_v3 = vadd.f32 %v2112_v22, %v2068_v50  ;;  %v2124_v58 = vadd.f32 %v2116_v31, %v2072_v54  ;;  %v2122_v4 = vadd.f32 %v2114_v26, %v2070_v60  ;;  %v9666_v24 = vld [vmem:[%s11841_s2 + $0x300] sm:$0xff]  }
  0xd2   : > { %8531 = vmatpush3.bf16.msra.mxu0 %v9646_v61  ;;  %v9656_v61 = vld [vmem:[%s11841_s2 + $0x270] sm:$0xff]   ;;  %v1629_v62 = vadd.f32 %v1621_v33, %v1577_v48  ;;  %v2126_v28 = vadd.f32 %v2118_v2, %v2074_v63  ;;  %v2206_v10 = vrot.slane %v2186_v0, %v10135_v57  ;;  %v2214_v17 = vrot.slane %v2194_v59, %v10135_v57  ;;  %v9660_v0 = vld [vmem:[%s11841_s2 + $0x278] sm:$0xff]   ;;  %v9665_v63 = vld [vmem:[%s11841_s2 + $0x3c0] sm:$0xff]  }
  0xd3   : > { %8553 = vmatpush3.bf16.msra.mxu1 %v9647_v23  ;;  %8532 = vmatprep.subr.bf16.mxu0 %v9648_v27  ;;  %v9657_v23 = vld [vmem:[%s11841_s2 + $0x2f0] sm:$0xff]   ;;  %v1625_v27 = vadd.f32 %v1617_v25, %v1573_v37  ;;  %v2176_v9 = vadd.f32 %v2168_v49, %v2124_v58  ;;  %v2174_v34 = vadd.f32 %v2166_v7, %v2122_v4  ;;  %v9668_v48 = vld [vmem:[%s11841_s2 + $0x348] sm:$0xff]  }
  0xd4   : > { %8554 = vmatprep.subr.bf16.mxu1 %v9649_v29  ;;  %v2172_v29 = vadd.f32 %v2164_v21, %v2120_v3  ;;  %v2178_v16 = vadd.f32 %v2170_v39, %v2126_v28  ;;  %v1667_v5 = vadd.f32 %v10598_v6, %v1623_v30  ;;  %v1673_v25 = vadd.f32 %v10604_v15, %v1629_v62  ;;  %v9669_v39 = vld [vmem:[%s11841_s2 + $0x3c8] sm:$0xff]   ;;  %v9672_v3 = vld [vmem:[%s11841_s2 + $0x350] sm:$0xff]  }
  0xd5   : > { %v1669_v59 = vadd.f32 %v10604_v15, %v1625_v27  ;;  %v2220_v50 = vadd.f32 %v2206_v10, %v2176_v9  ;;  %v9664_v15 = vld [vmem:[%s11841_s2 + $0x340] sm:$0xff]   ;;  %v9673_v58 = vld [vmem:[%s11841_s2 + $0x3d0] sm:$0xff]   ;;  %v2078_v27 = vrot.slane %v10550_v18, %v10127_v53  ;;  %v2042_v4 = vrot.slane %v10562_v19, %v10124_v52  ;;  %v9676_v9 = vld [vmem:[%s11841_s2 + $0x358] sm:$0xff]  }
  0xd6   : > { %8533 = vmatpush3.bf16.msra.mxu0 %v9650_v47  ;;  %v1671_v47 = vadd.f32 %v10598_v6, %v1627_v14  ;;  %v2216_v33 = vadd.f32 %v2206_v10, %v2172_v29  ;;  %v2222_v54 = vadd.f32 %v2214_v17, %v2178_v16  ;;  %v9663_v6 = vld [vmem:[%s11841_s2 + $0x2b8] sm:$0xff]   ;;  %v1675_v22 = vmax.f32 %v1667_v5, 0.0  ;;  %v9671_v14 = vld [vmem:[%s11841_s2 + $0x388] sm:$0xff]   ;;  %v9674_v62 = vld [vmem:[%s11841_s2 + $0x310] sm:$0xff]  }
  0xd7   : > { %8555 = vmatpush3.bf16.msra.mxu1 %v9651_v51  ;;  %8534 = vmatprep.subr.bf16.mxu0 %v9652_v36  ;;  %v9662_v51 = vld [vmem:[%s11841_s2 + $0x238] sm:$0xff]   ;;  %v2218_v36 = vadd.f32 %v2214_v17, %v2174_v34  ;;  %v1681_v60 = vmax.f32 %v1673_v25, 0.0  ;;  %v2228_v2 = vmax.f32 %v2220_v50, 0.0  ;;  %v2086_v28 = vrot.slane %v10562_v19, %v10127_v53  ;;  %v9675_v29 = vld [vmem:[%s11841_s2 + $0x390] sm:$0xff]   ;;  %v9681_v25 = vld [vmem:[%s11841_s2 + $0x3e0] sm:$0xff]  }
  0xd8   : > { %8556 = vmatprep.subr.bf16.mxu1 %v9653_v55  ;;  %v1679_v31 = vmax.f32 %v1671_v47, 0.0  ;;  %v1677_v55 = vmax.f32 %v1669_v59, 0.0  ;;  %v2224_v26 = vmax.f32 %v2216_v33, 0.0  ;;  %v2230_v21 = vmax.f32 %v2222_v54, 0.0  ;;  %v9679_v47 = vld [vmem:[%s11841_s2 + $0x398] sm:$0xff]  }
  0xd9   : > { %v2226_v30 = vmax.f32 %v2218_v36, 0.0  ;;  %v2130_v10 = vrot.slane %v10550_v18, %v10132_v56  ;;  %v2138_v34 = vrot.slane %v10562_v19, %v10132_v56  ;;  %v2098_v17 = vrot.slane %v2078_v27, %v10127_v53 }
  0xda   : > { %8535 = vmatpush3.bf16.msra.mxu0 %v9654_v8  ;;  %v1683_v49 = vpack.c.bf16 %v1679_v31, %v1675_v22  ;;  %v9667_v8 = vld [vmem:[%s11841_s2 + $0x380] sm:$0xff]   ;;  %v1685_v37 = vpack.c.bf16 %v1681_v60, %v1677_v55  ;;  %v2232_v7 = vpack.c.bf16 %v2228_v2, %v2224_v26  ;;  %v2106_v5 = vrot.slane %v2086_v28, %v10127_v53 }
  0xdb   : > { %8557 = vmatpush3.bf16.msra.mxu1 %v9655_v13  ;;  %8536 = vmatprep.subr.bf16.mxu0 %v9656_v61  ;;  %v2234_v13 = vpack.c.bf16 %v2230_v21, %v2226_v30  ;;  %v9670_v61 = vld [vmem:[%s11841_s2 + $0x308] sm:$0xff]   ;;  %v2150_v59 = vrot.slane %v2130_v10, %v10132_v56  ;;  %v2158_v33 = vrot.slane %v2138_v34, %v10132_v56  ;;  %v9683_v60 = vld [vmem:[%s11841_s2 + $0x3a0] sm:$0xff]  }
  0xdc   : > { %8558 = vmatprep.subr.bf16.mxu1 %v9657_v23  ;;  %v2034_v23 = vrot.slane %v10550_v18, %v10124_v52  ;;  %v2111_v36 = vmul.f32 %v2098_v17, %v10229_v38  ;;  %v2115_v54 = vmul.f32 %v2098_v17, %v10257_v11  ;;  %v2117_v55 = vmul.f32 %v2106_v5, %v10257_v11 }
  0xdd   : > { %v2163_v26 = vmul.f32 %v2150_v59, %v10280_v1  ;;  %v2165_v11 = vmul.f32 %v2158_v33, %v10280_v1  ;;  %v2169_v2 = vmul.f32 %v2158_v33, %v10278_v46  ;;  %v9687_v1 = vld [vmem:[%s11841_s2 + $0x3a8] sm:$0xff]  }
  0xde   : > { %8537 = vmatpush3.bf16.msra.mxu0 %v9658_v32  ;;  %v9677_v32 = vld [vmem:[%s11841_s2 + $0x3d8] sm:$0xff]   ;;  %v2054_v16 = vrot.slane %v2034_v23, %v10124_v52  ;;  %v9697_v33 = vld [vmem:[%s11843_s4 + $0x8] sm:$0xff]  }
  0xdf   : > { %8559 = vmatpush3.bf16.msra.mxu1 %v9659_v20  ;;  %8538 = vmatprep.subr.bf16.mxu0 %v9660_v0  ;;  %v9678_v20 = vld [vmem:[%s11841_s2 + $0x318] sm:$0xff]   ;;  %v2062_v0 = vrot.slane %v2042_v4, %v10124_v52 }
  0xe0   : > { %8560 = vmatprep.subr.bf16.mxu1 %v9661_v35  ;;  %v9680_v35 = vld [vmem:[%s11841_s2 + $0x360] sm:$0xff]   ;;  %v2067_v50 = vmul.f32 %v2054_v16, %v10231_v45 }
  0xe1   : > { %v2069_v22 = vmul.f32 %v2062_v0, %v10231_v45  ;;  %v2073_v31 = vmul.f32 %v2062_v0, %v10259_v12  ;;  %v2167_v45 = vmul.f32 %v2150_v59, %v10278_v46  ;;  %v9688_v46 = vld [vmem:[%s11841_s2 + $0x370] sm:$0xff]   ;;  %v10842_v0 = vld [vmem:[%s11842_s3] sm:$0xff] }
  0xe2   : > { %8539 = vmatpush3.bf16.msra.mxu0 %v9662_v51  ;;  %v2071_v51 = vmul.f32 %v2054_v16, %v10259_v12  ;;  %v2182_v12 = vrot.slane %v10550_v18, %v10135_v57  ;;  %v2119_v30 = vadd.f32 %v2111_v36, %v2067_v50  ;;  %v2590_v59 = vadd.f32 %v10842_v0, %v10842_v0  ;;  %v9699_v36 = vld [vmem:[%s11843_s4 + $0x18] sm:$0xff]  }
  0xe3   : > { %8561 = vmatpush3.bf16.msra.mxu1 %v9663_v6  ;;  %8568 = vmatprep.subr.bf16.mxu0 %v9664_v15  ;;  %v9682_v6 = vld [vmem:[%s11841_s2 + $0x320] sm:$0xff]   ;;  %v2113_v15 = vmul.f32 %v2106_v5, %v10229_v38  ;;  %v9685_v38 = vld [vmem:[%s11841_s2 + $0x3e8] sm:$0xff]  }
  0xe4   : > { %8590 = vmatprep.subr.bf16.mxu1 %v9665_v63  ;;  %v9684_v63 = vld [vmem:[%s11841_s2 + $0x368] sm:$0xff]   ;;  %v2123_v21 = vadd.f32 %v2115_v54, %v2071_v51  ;;  %v9698_v51 = vld [vmem:[%s11843_s4 + $0x10] sm:$0xff]  }
  0xe5   : > { %1976 = vmatmul.mubr.bf16.vlgmr.msra.gmra.mrb[8].mxu0 %v1683_v49  ;;  %v9686_v49 = vld [vmem:[%s11841_s2 + $0x328] sm:$0xff]   ;;  %v2121_v18 = vadd.f32 %v2113_v15, %v2069_v22 }
  0xe6   : > { %2017 = vmatmul.mubr.bf16.vlgmr.msra.gmra.mrb[8].mxu1 %v1685_v37  ;;  %8569 = vmatpush3.bf16.msra.mxu0 %v9666_v24  ;;  %v2190_v24 = vrot.slane %v10562_v19, %v10135_v57  ;;  %v2171_v19 = vadd.f32 %v2163_v26, %v2119_v30  ;;  %v2175_v37 = vadd.f32 %v2167_v45, %v2123_v21  ;;  %v10847_v5 = vld [vmem:[%s11842_s3 + $0x8] sm:$0xff] }
  0xe7   : > { %2523 = vmatprep.mubr.bf16.mxu0 %v2232_v7  ;;  %8591 = vmatpush3.bf16.msra.mxu1 %v9667_v8  ;;  %v2125_v8 = vadd.f32 %v2117_v55, %v2073_v31  ;;  %v9689_v7 = vld [vmem:[%s11841_s2 + $0x3f0] sm:$0xff]   ;;  %v9701_v30 = vld [vmem:[%s11843_s4 + $0x28] sm:$0xff]  }
  0xe8   : > { %2564 = vmatprep.mubr.bf16.mxu1 %v2234_v13  ;;  %8570 = vmatprep.subr.bf16.mxu0 %v9668_v48  ;;  %v2202_v48 = vrot.slane %v2182_v12, %v10135_v57 }
  0xe9   : > { %8592 = vmatprep.subr.bf16.mxu1 %v9669_v39  ;;  %v2173_v39 = vadd.f32 %v2165_v11, %v2121_v18  ;;  %v2177_v13 = vadd.f32 %v2169_v2, %v2125_v8 }
  0xea   : > { %8571 = vmatpush3.bf16.msra.mxu0 %v9670_v61  ;;  %v2210_v61 = vrot.slane %v2190_v24, %v10135_v57  ;;  %v2215_v23 = vadd.f32 %v2202_v48, %v2171_v19  ;;  %v2219_v27 = vadd.f32 %v2202_v48, %v2175_v37  ;;  %v9700_v24 = vld [vmem:[%s11843_s4 + $0x20] sm:$0xff]  }
  0xeb   : > { %8593 = vmatpush3.bf16.msra.mxu1 %v9671_v14  ;;  %8572 = vmatprep.subr.bf16.mxu0 %v9672_v3  ;;  %v9690_v14 = vld [vmem:[%s11841_s2 + $0x330] sm:$0xff]  }
  0xec   : > { %8594 = vmatprep.subr.bf16.mxu1 %v9673_v58  ;;  %v9691_v3 = vld [vmem:[%s11841_s2 + $0x3b0] sm:$0xff]   ;;  %v9692_v58 = vld [vmem:[%s11841_s2 + $0x378] sm:$0xff]   ;;  %v2217_v4 = vadd.f32 %v2210_v61, %v2173_v39  ;;  %v2221_v28 = vadd.f32 %v2210_v61, %v2177_v13  ;;  %v2223_v10 = vmax.f32 %v2215_v23, 0.0 }
  0xee   : > { %8573 = vmatpush3.bf16.msra.mxu0 %v9674_v62  ;;  %v9693_v62 = vld [vmem:[%s11841_s2 + $0x3f8] sm:$0xff]   ;;  %v2225_v34 = vmax.f32 %v2217_v4, 0.0  ;;  %v2229_v16 = vmax.f32 %v2221_v28, 0.0 }
  0xef   : > { %8595 = vmatpush3.bf16.msra.mxu1 %v9675_v29  ;;  %8574 = vmatprep.subr.bf16.mxu0 %v9676_v9  ;;  %v9694_v29 = vld [vmem:[%s11841_s2 + $0x338] sm:$0xff]  }
  0xf0   : > { %8596 = vmatprep.subr.bf16.mxu1 %v9677_v32  ;;  %v9695_v9 = vld [vmem:[%s11841_s2 + $0x3b8] sm:$0xff]   ;;  %v2227_v32 = vmax.f32 %v2219_v27, 0.0 }
  0xf2   : > { %8575 = vmatpush3.bf16.msra.mxu0 %v9678_v20  ;;  %v2231_v17 = vpack.c.bf16 %v2227_v32, %v2223_v10  ;;  %v9696_v20 = vld [vmem:[%s11843_s4] sm:$0xff]  }
  0xf3   : > { %8597 = vmatpush3.bf16.msra.mxu1 %v9679_v47  ;;  %8576 = vmatprep.subr.bf16.mxu0 %v9680_v35  ;;  %v9912_v47 = vmov 0.0   ;;  %v2233_v35 = vpack.c.bf16 %v2229_v16, %v2225_v34 }
  0xf4   : > { %8598 = vmatprep.subr.bf16.mxu1 %v9681_v25  ;;  %v2591_v25 = vadd.f32 %v10847_v5, %v10847_v5 }
  0xf6   : > { %8577 = vmatpush3.bf16.msra.mxu0 %v9682_v6  ;;  %v2611_v50 = vpack.c.bf16 %v2591_v25, %v2590_v59 }
  0xf7   : > { %8599 = vmatpush3.bf16.msra.mxu1 %v9683_v60  ;;  %8578 = vmatprep.subr.bf16.mxu0 %v9684_v63 }
  0xf8   : > { %8600 = vmatprep.subr.bf16.mxu1 %v9685_v38 }
  0xfa   : > { %8579 = vmatpush3.bf16.msra.mxu0 %v9686_v49 }
  0xfb   : > { %8601 = vmatpush3.bf16.msra.mxu1 %v9687_v1  ;;  %8580 = vmatprep.subr.bf16.mxu0 %v9688_v46 }
  0xfc   : > { %8602 = vmatprep.subr.bf16.mxu1 %v9689_v7 }
  0xfe   : > { %8581 = vmatpush3.bf16.msra.mxu0 %v9690_v14 }
  0xff   : > { %8603 = vmatpush3.bf16.msra.mxu1 %v9691_v3  ;;  %8582 = vmatprep.subr.bf16.mxu0 %v9692_v58 }
 0x100   : > { %8604 = vmatprep.subr.bf16.mxu1 %v9693_v62 }
 0x102   : > { %8583 = vmatpush3.bf16.msra.mxu0 %v9694_v29 }
 0x103   : > { %8605 = vmatpush3.bf16.msra.mxu1 %v9695_v9  ;;  %8820 = vmatprep.subr.bf16.mxu0 %v9912_v47 }
 0x104   : > { %8804 = vmatprep.subr.bf16.mxu1 %v9912_v47 }
 0x105   : > { %2524 = vmatmul.mubr.bf16.vlgmr.msra.gmra.mrb[12].mxu0 %v2231_v17 }
 0x106   : > { %2565 = vmatmul.mubr.bf16.vlgmr.msra.gmra.mrb[12].mxu1 %v2233_v35  ;;  %8824 = vmatprep.mubr.msk.bf16.mxu0 %vm9913_vm0, %v9912_v47 }
 0x107   : > { %8805 = vmatpush3.bf16.msra.mxu1 %v9696_v20  ;;  %8808 = vmatprep.mubr.msk.bf16.mxu1 %vm9913_vm0, %v9912_v47 }
 0x108   : > { %8806 = vmatprep.subr.bf16.mxu1 %v9912_v47  ;;  %8821 = vmatpush3.bf16.msra.mxu0 %v9700_v24 }
 0x109   : > { %8822 = vmatprep.subr.bf16.mxu0 %v9912_v47 }
 0x10b   : > { %8807 = vmatpush3.bf16.msra.mxu1 %v9697_v33 }
 0x10c   : > { %8812 = vmatprep.subr.bf16.mxu1 %v9912_v47  ;;  %8823 = vmatpush3.bf16.msra.mxu0 %v9701_v30 }
 0x10e   : > { %8809 = vmatmul.mubr.msk.bf16.vlgmr.msra.gmra.mrb[16].mxu1 %vm2628_vm1, %v2611_v50 }
 0x10f   : > { %8813 = vmatpush3.bf16.msra.mxu1 %v9698_v51  ;;  %8816 = vmatprep.mubr.msk.bf16.mxu1 %vm9913_vm0, %v9912_v47 }
 0x110   : > { %8814 = vmatprep.subr.bf16.mxu1 %v9912_v47 }
 0x113   : > { %8815 = vmatpush3.bf16.msra.mxu1 %v9699_v36 }
 0x116   : > { %8817 = vmatmul.mubr.msk.bf16.vlgmr.msra.gmra.mrb[20].mxu1 %vm2628_vm1, %v2611_v50 }
 0x178   : > { %v8452_v54 = vpop.f32.mrb[0].mxu0  ;;  %v8474_v6 = vpop.f32.mrb[0].mxu1 }
 0x179   : > { %v8453_v22 = vpop.f32.mrb[1].mxu0  ;;  %v8475_v31 = vpop.f32.mrb[1].mxu1 }
 0x17a   : > { %v8454_v15 = vadd.f32 %v8453_v22, %v8452_v54  ;;  %v8476_v55 = vadd.f32 %v8475_v31, %v8474_v6  ;;  %v8455_v60 = vpop.f32.mrb[2].mxu0  ;;  %v8477_v63 = vpop.f32.mrb[2].mxu1  ;;  %v2575_v6 = vld [vmem:[%s11842_s3 + $0x20] sm:$0x7] }
 0x17b   : > { %v8456_v26 = vpop.f32.mrb[3].mxu0  ;;  %v8478_v45 = vpop.f32.mrb[3].mxu1 }
 0x17c   : > { %v1199_v12 = vadd.f32 %v8476_v55, %v8454_v15  ;;  %v8457_v38 = vadd.f32 %v8456_v26, %v8455_v60  ;;  %v8479_v11 = vadd.f32 %v8478_v45, %v8477_v63  ;;  %v10888_v60 = vld [vmem:[%s11844_s5] sm:$0xff] }
 0x17e   : > { %v1202_v2 = vadd.f32 %v8479_v11, %v8457_v38  ;;  %v2615_v11 = vrot.slane %v10888_v60, %v10124_v52 }
 0x198   : > { %v8496_v21 = vpop.f32.mrb[4].mxu0 }
 0x199   : > { %v8518_v49 = vpop.f32.mrb[4].mxu1  ;;  %v8497_v18 = vpop.f32.mrb[5].mxu0 }
 0x19a   : > { %v8498_v8 = vadd.f32 %v8497_v18, %v8496_v21  ;;  %v8519_v1 = vpop.f32.mrb[5].mxu1  ;;  %v8499_v46 = vpop.f32.mrb[6].mxu0 }
 0x19b   : > { %v8520_v19 = vadd.f32 %v8519_v1, %v8518_v49  ;;  %v8521_v37 = vpop.f32.mrb[6].mxu1  ;;  %v8500_v48 = vpop.f32.mrb[7].mxu0 }
 0x19c   : > { %v1432_v7 = vadd.f32 %v8498_v8, %v1199_v12  ;;  %v8501_v39 = vadd.f32 %v8500_v48, %v8499_v46  ;;  %v8522_v13 = vpop.f32.mrb[7].mxu1  ;;  %v2579_v12 = vrot.slane %v2575_v6, %v10124_v52 }
 0x19d   : > { %v8523_v61 = vadd.f32 %v8522_v13, %v8521_v37  ;;  %v2676_v13 = vrot.slane %v10888_v60, %v10127_v53 }
 0x19e   : > { %v1473_v14 = vadd.f32 %v8520_v19, %v1432_v7  ;;  %v1435_v3 = vadd.f32 %v8501_v39, %v1202_v2  ;;  %v2730_v7 = vpack.c.bf16 %v10847_v5, %v10842_v0 }
 0x1a0   : > { %v1476_v58 = vadd.f32 %v8523_v61, %v1435_v3  ;;  %8825 = vmatmul.mubr.msk.bf16.vlgmr.msra.gmra.mrb[16].mxu0 %vm2628_vm1, %v2730_v7 }
 0x1b8   : > { %v8540_v23 = vpop.f32.mrb[8].mxu0 }
 0x1b9   : > { %v8562_v27 = vpop.f32.mrb[8].mxu1  ;;  %v8541_v62 = vpop.f32.mrb[9].mxu0 }
 0x1ba   : > { %v8542_v4 = vadd.f32 %v8541_v62, %v8540_v23  ;;  %v8563_v28 = vpop.f32.mrb[9].mxu1  ;;  %v8543_v29 = vpop.f32.mrb[10].mxu0 }
 0x1bb   : > { %v8564_v9 = vadd.f32 %v8563_v28, %v8562_v27  ;;  %v8565_v10 = vpop.f32.mrb[10].mxu1  ;;  %v8544_v32 = vpop.f32.mrb[11].mxu0 }
 0x1bc   : > { %v8545_v34 = vadd.f32 %v8544_v32, %v8543_v29  ;;  %v8566_v16 = vpop.f32.mrb[11].mxu1 }
 0x1bd   : > { %v2019_v17 = vadd.f32 %v8564_v9, %v8542_v4  ;;  %v8567_v20 = vadd.f32 %v8566_v16, %v8565_v10 }
 0x1bf   : > { %v2025_v35 = vadd.f32 %v2019_v17, %v1473_v14  ;;  %v2022_v59 = vadd.f32 %v8567_v20, %v8545_v34 }
 0x1c1   : > { %v2026_v25 = vadd.f32 %v2022_v59, %v1476_v58 }
 0x1d8   : > { %v8584_v33 = vpop.f32.mrb[12].mxu0 }
 0x1d9   : > { %v8606_v50 = vpop.f32.mrb[12].mxu1  ;;  %v8585_v51 = vpop.f32.mrb[13].mxu0 }
 0x1da   : > { %v8586_v36 = vadd.f32 %v8585_v51, %v8584_v33  ;;  %v8607_v54 = vpop.f32.mrb[13].mxu1  ;;  %v8587_v22 = vpop.f32.mrb[14].mxu0 }
 0x1db   : > { %v8608_v31 = vadd.f32 %v8607_v54, %v8606_v50  ;;  %v8609_v15 = vpop.f32.mrb[14].mxu1  ;;  %v8588_v55 = vpop.f32.mrb[15].mxu0 }
 0x1dc   : > { %v8589_v63 = vadd.f32 %v8588_v55, %v8587_v22  ;;  %v8610_v26 = vpop.f32.mrb[15].mxu1 }
 0x1dd   : > { %v2567_v45 = vadd.f32 %v8608_v31, %v8586_v36  ;;  %v8611_v38 = vadd.f32 %v8610_v26, %v8609_v15  ;;  %v2734_v15 = vrot.slane %v10888_v60, %v10132_v56 }
 0x1df   : > { %v2573_v2 = vadd.f32 %v2567_v45, %v2025_v35  ;;  %v2570_v24 = vadd.f32 %v8611_v38, %v8589_v63 }
 0x1e1   : > { %v2580_v30 = vadd.f32 %v2579_v12, %v2573_v2  ;;  %v2574_v21 = vadd.f32 %v2570_v24, %v2026_v25  ;;  %v2666_v49 = vpop.f32.mrb[16].mxu1 }
 0x1e2   : > { %v2667_v18 = vadd.f32 %v2666_v49, %v2615_v11  ;;  %v8810_v8 = vpop.f32.mrb[17].mxu1 }
 0x1e3   : > { %v2581_v1 = vadd.f32 %v2579_v12, %v2574_v21  ;;  %v2669_v46 = vpop.f32.mrb[18].mxu1  ;;  %v2582_v37 = vmax.f32 %v2580_v30, 0.0 }
 0x1e4   : > { %v8811_v19 = vpop.f32.mrb[19].mxu1  ;;  %8832 = vmatprep.mubr.msk.f32.mxu1 %vm2839_vm2, %v2667_v18  ;;  %v2670_v29 = vadd.f32 %v2669_v46, %v2615_v11 }
 0x1e5   : > { %v2583_v48 = vmax.f32 %v2581_v1, 0.0 }
 0x1e7   : > { %v10896_v39 = vpack.c.bf16 %v2583_v48, %v2582_v37 }
 0x1e9   : > { %v2723_v61 = vpop.f32.mrb[20].mxu1 }
 0x1ea   : > { %v8818_v14 = vpop.f32.mrb[21].mxu1  ;;  %v2724_v58 = vadd.f32 %v2723_v61, %v2676_v13 }
 0x1eb   : > { %v2726_v3 = vpop.f32.mrb[22].mxu1 }
 0x1ec   : > { %v2727_v23 = vadd.f32 %v2726_v3, %v2676_v13  ;;  %v8819_v27 = vpop.f32.mrb[23].mxu1 }
 0x1ee   : > { %v9391_v62 = vpack.i.bf16 %v2727_v23, %v2724_v58  ;;  %v9196_v4 = vpack.c.bf16 %v2727_v23, %v2724_v58 }
 0x1f0   : > { %9392 = vrot.lane.b32.xlu0 %v9391_v62, %s9914_s23  ;;  %9387 = vrot.lane.b32.xlu1 %v9391_v62, %s9915_s24 }
 0x1f1   : > { %9198 = vmatprep.subr.msk.bf16.mxu1 %vm10903_vm3, %v9196_v4 }
 0x1f2   : > { %9201 = vmatpush3.bf16.xpose.msk.msra.mxu1 %vm10903_vm3, %v9196_v4 }
 0x1f4   : > { %2793 = vrot.lane.b32.xlu0 %v2667_v18, %s9915_s24  ;;  %9397 = vrot.lane.b32.xlu1 %v9391_v62, %s9916_s25 }
 0x1f8   : > { %2797 = vrot.lane.b32.xlu0 %v2667_v18, %s9914_s23  ;;  %2795 = vrot.lane.b32.xlu1 %v2670_v29, %s9915_s24 }
 0x1f9   : > { %8833 = vmatmul.mubr.msk.f32.vlgmr.msra.gmra.mrb[24].mxu1 %vm2839_vm2, %v2670_v29 }
 0x1fc   : > { %2801 = vrot.lane.b32.xlu0 %v2667_v18, %s9916_s25  ;;  %2799 = vrot.lane.b32.xlu1 %v2670_v29, %s9914_s23 }
 0x200   : > { %2803 = vrot.lane.b32.xlu1 %v2670_v29, %s9916_s25 }
 0x262   : > { %v9393_v9 = vpop.permute.xlu0 %9392  ;;  %v9388_v10 = vpop.permute.xlu1 %9387 }
 0x263   : > { %v9395_v32 = vunpack.i.h.bf16 %v9393_v9  ;;  %v9394_v34 = vunpack.i.l.bf16 %v9393_v9  ;;  %v9390_v16 = vunpack.i.h.bf16 %v9388_v10  ;;  %v9389_v17 = vunpack.i.l.bf16 %v9388_v10 }
 0x265   : > { %v9208_v20 = vpack.c.bf16 %v9395_v32, %v9394_v34  ;;  %v9202_v35 = vpack.c.bf16 %v9390_v16, %v9389_v17 }
 0x266   : > { %v2794_v59 = vpop.permute.xlu0 %2793  ;;  %v9398_v25 = vpop.permute.xlu1 %9397 }
 0x267   : > { %v9400_v33 = vunpack.i.h.bf16 %v9398_v25  ;;  %v9399_v50 = vunpack.i.l.bf16 %v9398_v25  ;;  %9204 = vmatprep.subr.msk.bf16.mxu0 %vm10903_vm3, %v9202_v35  ;;  %8839 = vmatprep.mubr.msk.f32.mxu0 %vm2839_vm2, %v2794_v59 }
 0x268   : > { %9210 = vmatprep.subr.msk.bf16.mxu1 %vm10903_vm3, %v9208_v20  ;;  %9207 = vmatpush3.bf16.xpose.msk.msra.mxu0 %vm10903_vm3, %v9202_v35 }
 0x269   : > { %v9214_v51 = vpack.c.bf16 %v9400_v33, %v9399_v50  ;;  %9213 = vmatpush3.bf16.xpose.msk.msra.mxu1 %vm10903_vm3, %v9208_v20 }
 0x26a   : > { %v2798_v36 = vpop.permute.xlu0 %2797  ;;  %v2796_v54 = vpop.permute.xlu1 %2795 }
 0x26b   : > { %8846 = vmatprep.mubr.msk.f32.mxu1 %vm2839_vm2, %v2798_v36  ;;  %9216 = vmatprep.subr.msk.bf16.mxu0 %vm10903_vm3, %v9214_v51 }
 0x26e   : > { %v2802_v6 = vpop.permute.xlu0 %2801  ;;  %v2800_v22 = vpop.permute.xlu1 %2799 }
 0x26f   : > { %8840 = vmatmul.mubr.msk.f32.vlgmr.msra.gmra.mrb[20].mxu0 %vm2839_vm2, %v2796_v54 }
 0x270   : > { %8847 = vmatmul.mubr.msk.f32.vlgmr.msra.gmra.mrb[26].mxu1 %vm2839_vm2, %v2800_v22  ;;  %9219 = vmatpush3.bf16.xpose.msk.msra.mxu0 %vm10903_vm3, %v9214_v51 }
 0x271   : > { %8853 = vmatprep.mubr.msk.f32.mxu0 %vm2839_vm2, %v2802_v6 }
 0x272   : > { %v2804_v31 = vpop.permute.xlu1 %2803 }
 0x273   : > { %v2784_v55 = vpop.f32.mrb[16].mxu0 }
 0x274   : > { %v2785_v63 = vadd.f32 %v2784_v55, %v2734_v15  ;;  %v8826_v26 = vpop.f32.mrb[17].mxu0 }
 0x275   : > { %v2787_v45 = vpop.f32.mrb[18].mxu0 }
 0x276   : > { %v2788_v12 = vadd.f32 %v2787_v45, %v2734_v15  ;;  %v8827_v38 = vpop.f32.mrb[19].mxu0 }
 0x277   : > { %8854 = vmatmul.mubr.msk.f32.vlgmr.msra.gmra.mrb[22].mxu0 %vm2839_vm2, %v2804_v31 }
 0x278   : > { %v9220_v11 = vpack.c.bf16 %v2788_v12, %v2785_v63  ;;  %v10943_v8 = vpack.i.bf16 %v2788_v12, %v2785_v63 }
 0x27a   : > { %9221 = vmatprep.subr.bf16.mxu1 %v9220_v11 }
 0x27b   : > { %9223 = vmatpush3.bf16.msra.mxu1 %v9220_v11 }
 0x2cc   : > { %v8834_v2 = vpop.f32.mrb[24].mxu1 }
 0x2cd   : > { %v3173_v24 = vmul.f32 0.35355338, %v8834_v2  ;;  %v2914_v30 = vpop.f32.mrb[25].mxu1 }
 0x2ce   : > { %v3172_v21 = vmul.f32 0.35355338, %v2914_v30 }
 0x2cf   : > { %v3184_v49 = vsel %vm3180_vm4, %v3173_v24, -inf }
 0x2d0   : > { %3185 = vmax.xlane.f32.xlu1 %v3184_v49  ;;  %v3181_v18 = vsel %vm3180_vm4, %v3172_v21, -inf }
 0x2d1   : > { %3182 = vmax.xlane.f32.xlu0 %v3181_v18 }
 0x342   : > { %v8841_v1 = vpop.f32.mrb[20].mxu0 }
 0x343   : > { %v3175_v46 = vmul.f32 0.35355338, %v8841_v1  ;;  %v8848_v19 = vpop.f32.mrb[26].mxu1  ;;  %v2997_v37 = vpop.f32.mrb[21].mxu0 }
 0x344   : > { %v3080_v48 = vpop.f32.mrb[27].mxu1  ;;  %v3174_v7 = vmul.f32 0.35355338, %v2997_v37  ;;  %v3177_v3 = vmul.f32 0.35355338, %v8848_v19 }
 0x345   : > { %v3176_v13 = vmul.f32 0.35355338, %v3080_v48  ;;  %v3190_v61 = vsel %vm3180_vm4, %v3175_v46, -inf }
 0x346   : > { %3191 = vmax.xlane.f32.xlu0 %v3190_v61  ;;  %v3187_v58 = vsel %vm3180_vm4, %v3174_v7, -inf  ;;  %v3196_v29 = vsel %vm3180_vm4, %v3177_v3, -inf }
 0x347   : > { %v3193_v14 = vsel %vm3180_vm4, %v3176_v13, -inf }
 0x348   : > { %3194 = vmax.xlane.f32.xlu1 %v3193_v14 }
 0x34a   : > { %3188 = vmax.xlane.f32.xlu0 %v3187_v58  ;;  %v8855_v23 = vpop.f32.mrb[22].mxu0 }
 0x34b   : > { %v3163_v27 = vpop.f32.mrb[23].mxu0  ;;  %v3179_v4 = vmul.f32 0.35355338, %v8855_v23 }
 0x34c   : > { %v3178_v62 = vmul.f32 0.35355338, %v3163_v27 }
 0x34d   : > { %v3202_v10 = vsel %vm3180_vm4, %v3179_v4, -inf }
 0x34e   : > { %3197 = vmax.xlane.f32.xlu0 %v3196_v29  ;;  %v3199_v9 = vsel %vm3180_vm4, %v3178_v62, -inf }
 0x34f   : > { %3200 = vmax.xlane.f32.xlu1 %v3199_v9 }
 0x352   : > { %3203 = vmax.xlane.f32.xlu0 %v3202_v10 }
 0x35d   : > { %v3186_v32 = vpop.xlane.xlu1 %3185 }
 0x35e   : > { %v3206_v34 = vsub.f32 %v3173_v24, %v3186_v32  ;;  %v3183_v17 = vpop.xlane.xlu0 %3182 }
 0x35f   : > { %v3205_v59 = vsub.f32 %v3172_v21, %v3183_v17 }
 0x360   : > { %v3215_v16 = vmul.f32 1.442695, %v3206_v34  ;;  %9402 = vrot.lane.b32.xlu1 %v10943_v8, %s9915_s24 }
 0x361   : > { %v3213_v25 = vmul.f32 1.442695, %v3205_v59 }
 0x362   : > { %9740 = vpow2.f32 %v3215_v16 }
 0x363   : > { %9742 = vpow2.f32 %v3213_v25 }
 0x36c   : > { %v10953_v20 = vpop.eup %9740 }
 0x36d   : > { %v3232_v35 = vsel %vm3180_vm4, %v10953_v20, 0.0  ;;  %v9743_v33 = vpop.eup %9742 }
 0x36e   : > { %3233 = vadd.xlane.f32.xlu0 %v3232_v35  ;;  %v3229_v50 = vsel %vm3180_vm4, %v9743_v33, 0.0 }
 0x384   : > { %3230 = vadd.xlane.f32.xlu1 %v3229_v50 }
 0x3d3   : > { %v3192_v51 = vpop.xlane.xlu0 %3191 }
 0x3d4   : > { %v3208_v36 = vsub.f32 %v3175_v46, %v3192_v51 }
 0x3d5   : > { %v3195_v54 = vpop.xlane.xlu1 %3194 }
 0x3d6   : > { %v3219_v6 = vmul.f32 1.442695, %v3208_v36  ;;  %v3209_v22 = vsub.f32 %v3176_v13, %v3195_v54 }
 0x3d7   : > { %v3189_v31 = vpop.xlane.xlu0 %3188 }
 0x3d8   : > { %9744 = vpow2.f32 %v3219_v6  ;;  %v3207_v15 = vsub.f32 %v3174_v7, %v3189_v31  ;;  %v3221_v55 = vmul.f32 1.442695, %v3209_v22 }
 0x3da   : > { %v3217_v63 = vmul.f32 1.442695, %v3207_v15 }
 0x3db   : > { %v3198_v26 = vpop.xlane.xlu0 %3197 }
 0x3dc   : > { %9746 = vpow2.f32 %v3217_v63  ;;  %v3210_v45 = vsub.f32 %v3177_v3, %v3198_v26  ;;  %v3201_v12 = vpop.xlane.xlu1 %3200 }
 0x3dd   : > { %v3211_v38 = vsub.f32 %v3178_v62, %v3201_v12  ;;  %9748 = vpow2.f32 %v3221_v55 }
 0x3de   : > { %v3223_v11 = vmul.f32 1.442695, %v3210_v45 }
 0x3df   : > { %v3225_v2 = vmul.f32 1.442695, %v3211_v38  ;;  %v3204_v24 = vpop.xlane.xlu0 %3203 }
 0x3e0   : > { %9750 = vpow2.f32 %v3223_v11  ;;  %v3212_v30 = vsub.f32 %v3179_v4, %v3204_v24  ;;  %v9403_v21 = vpop.permute.xlu1 %9402 }
 0x3e1   : > { %v9405_v49 = vunpack.i.h.bf16 %v9403_v21  ;;  %v9404_v18 = vunpack.i.l.bf16 %v9403_v21  ;;  %9752 = vpow2.f32 %v3225_v2 }
 0x3e2   : > { %v9745_v1 = vpop.eup %9744  ;;  %v3227_v46 = vmul.f32 1.442695, %v3212_v30 }
 0x3e3   : > { %v3238_v19 = vsel %vm3180_vm4, %v9745_v1, 0.0  ;;  %v9224_v37 = vpack.c.bf16 %v9405_v49, %v9404_v18  ;;  %v9702_v18 = vld [vmem:[%s11843_s4 + $0x30] sm:$0xff]  }
 0x3e4   : > { %9754 = vpow2.f32 %v3227_v46  ;;  %3239 = vadd.xlane.f32.xlu0 %v3238_v19 }
 0x3e5   : > { %9225 = vmatprep.subr.bf16.mxu1 %v9224_v37 }
 0x3e6   : > { %v9747_v48 = vpop.eup %9746 }
 0x3e7   : > { %v3235_v7 = vsel %vm3180_vm4, %v9747_v48, 0.0  ;;  %v9749_v13 = vpop.eup %9748 }
 0x3e8   : > { %3236 = vadd.xlane.f32.xlu1 %v3235_v7  ;;  %v3241_v3 = vsel %vm3180_vm4, %v9749_v13, 0.0 }
 0x3ea   : > { %v9751_v61 = vpop.eup %9750 }
 0x3eb   : > { %v3244_v14 = vsel %vm3180_vm4, %v9751_v61, 0.0  ;;  %v9753_v58 = vpop.eup %9752 }
 0x3ec   : > { %3245 = vadd.xlane.f32.xlu0 %v3244_v14  ;;  %3242 = vadd.xlane.f32.xlu1 %v3241_v3  ;;  %v3247_v62 = vsel %vm3180_vm4, %v9753_v58, 0.0 }
 0x3ee   : > { %v9755_v23 = vpop.eup %9754 }
 0x3ef   : > { %v3250_v27 = vsel %vm3180_vm4, %v9755_v23, 0.0 }
 0x3f0   : > { %3251 = vadd.xlane.f32.xlu0 %v3250_v27  ;;  %3248 = vadd.xlane.f32.xlu1 %v3247_v62 }
 0x3fb   : > { %v3234_v4 = vpop.xlane.xlu0 %3233 }
 0x3fc   : > { %9756 = vrcp.f32 %v3234_v4 }
 0x401   : > { %9412 = vrot.lane.b32.xlu1 %v10943_v8, %s9916_s25 }
 0x406   : > { %9407 = vrot.lane.b32.xlu0 %v10943_v8, %s9914_s23  ;;  %v9757_v9 = vpop.eup %9756 }
 0x407   : > { %v3256_v34 = vmul.f32 %v9757_v9, %v10953_v20 }
 0x411   : > { %v3231_v29 = vpop.xlane.xlu1 %3230 }
 0x412   : > { %9758 = vrcp.f32 %v3231_v29 }
 0x41c   : > { %v9759_v10 = vpop.eup %9758 }
 0x41d   : > { %v3254_v32 = vmul.f32 %v9759_v10, %v9743_v33 }
 0x41f   : > { %8860 = vmatprep.mubr.msk.f32.mxu1 %vm3180_vm4, %v3254_v32 }
 0x420   : > { %8861 = vmatmul.mubr.msk.f32.vlgmr.msra.gmra.mrb[28].mxu1 %vm3180_vm4, %v3256_v34 }
 0x421   : > { %9227 = vmatpush3.bf16.msra.mxu1 %v9224_v37  ;;  %v9703_v37 = vld [vmem:[%s11843_s4 + $0x38] sm:$0xff]  }
 0x471   : > { %v3240_v16 = vpop.xlane.xlu0 %3239 }
 0x472   : > { %9760 = vrcp.f32 %v3240_v16 }
 0x475   : > { %v3237_v17 = vpop.xlane.xlu1 %3236 }
 0x476   : > { %9762 = vrcp.f32 %v3237_v17 }
 0x479   : > { %v3246_v35 = vpop.xlane.xlu0 %3245  ;;  %v3243_v8 = vpop.xlane.xlu1 %3242 }
 0x47a   : > { %9764 = vrcp.f32 %v3246_v35 }
 0x47b   : > { %9766 = vrcp.f32 %v3243_v8 }
 0x47c   : > { %v9761_v50 = vpop.eup %9760 }
 0x47d   : > { %v3252_v59 = vpop.xlane.xlu0 %3251  ;;  %v3249_v25 = vpop.xlane.xlu1 %3248  ;;  %v3260_v54 = vmul.f32 %v9761_v50, %v9745_v1 }
 0x47e   : > { %9768 = vrcp.f32 %v3252_v59 }
 0x47f   : > { %9770 = vrcp.f32 %v3249_v25  ;;  %v9704_v25 = vld [vmem:[%s11843_s4 + $0x50] sm:$0xff]  }
 0x480   : > { %v9763_v33 = vpop.eup %9762 }
 0x481   : > { %v9408_v20 = vpop.permute.xlu0 %9407  ;;  %v9413_v51 = vpop.permute.xlu1 %9412  ;;  %v3258_v36 = vmul.f32 %v9763_v33, %v9747_v48  ;;  %v9705_v33 = vld [vmem:[%s11843_s4 + $0x58] sm:$0xff]  }
 0x482   : > { %v9410_v6 = vunpack.i.h.bf16 %v9408_v20  ;;  %v9409_v22 = vunpack.i.l.bf16 %v9408_v20  ;;  %v9415_v31 = vunpack.i.h.bf16 %v9413_v51  ;;  %v9414_v15 = vunpack.i.l.bf16 %v9413_v51 }
 0x483   : > { %8867 = vmatprep.mubr.msk.f32.mxu1 %vm3180_vm4, %v3258_v36  ;;  %v3628_v20 = vrot.slane %v10888_v60, %v10135_v57 }
 0x484   : > { %v9765_v55 = vpop.eup %9764  ;;  %8868 = vmatmul.mubr.msk.f32.vlgmr.msra.gmra.mrb[30].mxu1 %vm3180_vm4, %v3260_v54  ;;  %v9228_v63 = vpack.c.bf16 %v9410_v6, %v9409_v22  ;;  %v9232_v26 = vpack.c.bf16 %v9415_v31, %v9414_v15 }
 0x485   : > { %v9767_v45 = vpop.eup %9766  ;;  %v3264_v11 = vmul.f32 %v9765_v55, %v9751_v61 }
 0x486   : > { %9229 = vmatprep.subr.bf16.mxu0 %v9228_v63  ;;  %9233 = vmatprep.subr.bf16.mxu1 %v9232_v26  ;;  %v3262_v12 = vmul.f32 %v9767_v45, %v9749_v13  ;;  %v3813_v45 = vrot.slane %v10888_v60, %v10104_v42 }
 0x487   : > { %9231 = vmatpush3.bf16.msra.mxu0 %v9228_v63  ;;  %9235 = vmatpush3.bf16.msra.mxu1 %v9232_v26 }
 0x488   : > { %v9769_v38 = vpop.eup %9768  ;;  %8874 = vmatprep.mubr.msk.f32.mxu0 %vm3180_vm4, %v3262_v12  ;;  %8884 = vmatprep.subr.bf16.mxu0 %v9912_v47 }
 0x489   : > { %v9771_v2 = vpop.eup %9770  ;;  %v3268_v24 = vmul.f32 %v9769_v38, %v9755_v23  ;;  %8892 = vmatprep.subr.bf16.mxu1 %v9912_v47 }
 0x48a   : > { %8875 = vmatmul.mubr.msk.f32.vlgmr.msra.gmra.mrb[24].mxu0 %vm3180_vm4, %v3264_v11  ;;  %v3266_v30 = vmul.f32 %v9771_v2, %v9753_v58 }
 0x48b   : > { %8888 = vmatprep.mubr.msk.bf16.mxu0 %vm9913_vm0, %v9912_v47  ;;  %8885 = vmatpush3.bf16.msra.mxu0 %v9702_v18 }
 0x48c   : > { %8881 = vmatprep.mubr.msk.f32.mxu1 %vm3180_vm4, %v3266_v30  ;;  %8886 = vmatprep.subr.bf16.mxu0 %v9912_v47 }
 0x48d   : > { %8882 = vmatmul.mubr.msk.f32.vlgmr.msra.gmra.mrb[32].mxu1 %vm3180_vm4, %v3268_v24 }
 0x48e   : > { %8896 = vmatprep.mubr.msk.bf16.mxu1 %vm9913_vm0, %v9912_v47 }
 0x48f   : > { %8887 = vmatpush3.bf16.msra.mxu0 %v9703_v37 }
 0x490   : > { %8900 = vmatprep.subr.bf16.mxu0 %v9912_v47 }
 0x4f3   : > { %v8862_v21 = vpop.f32.mrb[28].mxu1 }
 0x4f4   : > { %v3341_v49 = vpop.f32.mrb[29].mxu1 }
 0x557   : > { %v8869_v1 = vpop.f32.mrb[30].mxu1 }
 0x558   : > { %v3422_v46 = vpop.f32.mrb[31].mxu1 }
 0x559   : > { %v9416_v19 = vpack.i.bf16 %v8869_v1, %v3422_v46 }
 0x55b   : > { %9417 = vrot.lane.b32.xlu1 %v9416_v19, %s9917_s30 }
 0x55d   : > { %v8876_v48 = vpop.f32.mrb[24].mxu0 }
 0x55e   : > { %v3503_v7 = vpop.f32.mrb[25].mxu0 }
 0x55f   : > { %v9421_v13 = vpack.i.bf16 %v8876_v48, %v3503_v7 }
 0x560   : > { %v8883_v61 = vpop.f32.mrb[32].mxu1 }
 0x561   : > { %v3584_v14 = vpop.f32.mrb[33].mxu1  ;;  %9422 = vrot.lane.b32.xlu0 %v9421_v13, %s9918_s11 }
 0x562   : > { %v9426_v3 = vpack.i.bf16 %v8883_v61, %v3584_v14 }
 0x564   : > { %9427 = vrot.lane.b32.xlu1 %v9426_v3, %s9919_s12  ;;  %v9706_v3 = vld [vmem:[%s11843_s4 + $0x40] sm:$0xff]  }
 0x565   : > { %8893 = vmatpush3.bf16.msra.mxu1 %v9706_v3 }
 0x566   : > { %8894 = vmatprep.subr.bf16.mxu1 %v9912_v47 }
 0x5cd   : > { %v9418_v58 = vpop.permute.xlu1 %9417 }
 0x5ce   : > { %v9420_v23 = vunpack.i.h.bf16 %v9418_v58  ;;  %v9419_v27 = vunpack.i.l.bf16 %v9418_v58  ;;  %v9707_v58 = vld [vmem:[%s11843_s4 + $0x48] sm:$0xff]  }
 0x5cf   : > { %8895 = vmatpush3.bf16.msra.mxu1 %v9707_v58 }
 0x5d0   : > { %v3618_v9 = vsel %vm2839_vm2, %v8862_v21, %v9420_v23  ;;  %v3617_v10 = vsel %vm2839_vm2, %v3341_v49, %v9419_v27  ;;  %8908 = vmatprep.subr.bf16.mxu1 %v9912_v47 }
 0x5d3   : > { %v9423_v62 = vpop.permute.xlu0 %9422 }
 0x5d4   : > { %v9425_v4 = vunpack.i.h.bf16 %v9423_v62  ;;  %v9424_v29 = vunpack.i.l.bf16 %v9423_v62 }
 0x5d6   : > { %v3619_v32 = vsel %vm3180_vm4, %v3617_v10, %v9424_v29  ;;  %v3620_v34 = vsel %vm3180_vm4, %v3618_v9, %v9425_v4  ;;  %v9428_v16 = vpop.permute.xlu1 %9427 }
 0x5d7   : > { %v9430_v17 = vunpack.i.h.bf16 %v9428_v16  ;;  %v9429_v35 = vunpack.i.l.bf16 %v9428_v16  ;;  %v11040_v16 = vld [vmem:[%s11844_s5 + $0x8] sm:$0xff] }
 0x5d9   : > { %v3623_v8 = vsel %vm3621_vm5, %v3620_v34, %v9430_v17  ;;  %v3622_v59 = vsel %vm3621_vm5, %v3619_v32, %v9429_v35  ;;  %v3717_v35 = vrot.slane %v11040_v16, %v10127_v53 }
 0x5da   : > { %v3624_v50 = vpack.c.bf16 %v3623_v8, %v3622_v59 }
 0x5dc   : > { %8889 = vmatmul.mubr.msk.bf16.vlgmr.msra.gmra.mrb[28].mxu0 %vm2628_vm1, %v3624_v50  ;;  %v3723_v50 = vrot.slane %v11040_v16, %v10132_v56 }
 0x5dd   : > { %8901 = vmatpush3.bf16.msra.mxu0 %v9704_v25  ;;  %8904 = vmatprep.mubr.msk.bf16.mxu0 %vm9913_vm0, %v9912_v47 }
 0x5de   : > { %8902 = vmatprep.subr.bf16.mxu0 %v9912_v47 }
 0x5e1   : > { %8903 = vmatpush3.bf16.msra.mxu0 %v9705_v33 }
 0x5e4   : > { %8905 = vmatmul.mubr.msk.bf16.vlgmr.msra.gmra.mrb[32].mxu0 %vm2628_vm1, %v10896_v39 }
 0x6af   : > { %v3678_v51 = vpop.f32.mrb[28].mxu0 }
 0x6b0   : > { %v3679_v36 = vadd.f32 %v3678_v51, %v3628_v20  ;;  %v8890_v54 = vpop.f32.mrb[29].mxu0 }
 0x6b1   : > { %v3681_v6 = vpop.f32.mrb[30].mxu0 }
 0x6b2   : > { %v3682_v22 = vadd.f32 %v3681_v6, %v3628_v20  ;;  %v8891_v31 = vpop.f32.mrb[31].mxu0  ;;  %v3685_v15 = vadd.f32 %v3679_v36, %v10842_v0 }
 0x6b4   : > { %v3687_v55 = vsel %vm2628_vm1, %v3685_v15, 0.0  ;;  %v3686_v63 = vadd.f32 %v3682_v22, %v10847_v5 }
 0x6b5   : > { %3688 = vadd.xlane.f32.xlu0 %v3687_v55 }
 0x6b6   : > { %v3690_v26 = vsel %vm2628_vm1, %v3686_v63, 0.0 }
 0x6b7   : > { %3691 = vadd.xlane.f32.xlu1 %v3690_v26  ;;  %v3863_v12 = vpop.f32.mrb[32].mxu0 }
 0x6b8   : > { %v8906_v38 = vpop.f32.mrb[33].mxu0  ;;  %v3864_v2 = vadd.f32 %v3863_v12, %v3813_v45 }
 0x6b9   : > { %v3866_v11 = vpop.f32.mrb[34].mxu0 }
 0x6ba   : > { %v3867_v24 = vadd.f32 %v3866_v11, %v3813_v45  ;;  %v8907_v30 = vpop.f32.mrb[35].mxu0  ;;  %v9709_v45 = vld [vmem:[%s11843_s4 + $0x68] sm:$0xff]  }
 0x6bc   : > { %v9236_v21 = vpack.c.bf16 %v3867_v24, %v3864_v2  ;;  %v9431_v49 = vpack.i.bf16 %v3867_v24, %v3864_v2  ;;  %v3752_v2 = vrot.slane %v10888_v60, %v10101_v41 }
 0x6be   : > { %9238 = vmatprep.subr.msk.bf16.mxu0 %vm10903_vm3, %v9236_v21 }
 0x6bf   : > { %9241 = vmatpush3.bf16.xpose.msk.msra.mxu0 %vm10903_vm3, %v9236_v21 }
 0x6c8   : > { %9432 = vrot.lane.b32.xlu1 %v9431_v49, %s9915_s24 }
 0x6cc   : > { %9442 = vrot.lane.b32.xlu1 %v9431_v49, %s9916_s25 }
 0x742   : > { %v3689_v18 = vpop.xlane.xlu0 %3688 }
 0x743   : > { %v3694_v1 = vmul.f32 0.03125, %v3689_v18 }
 0x744   : > { %v3692_v46 = vpop.xlane.xlu1 %3691 }
 0x745   : > { %v3696_v19 = vsub.f32 %v3685_v15, %v3694_v1  ;;  %v3695_v37 = vmul.f32 0.03125, %v3692_v46  ;;  %v9708_v15 = vld [vmem:[%s11843_s4 + $0x60] sm:$0xff]   ;;  %v3873_v46 = vrot.slane %v10888_v60, %v10107_v43 }
 0x747   : > { %v3697_v48 = vsub.f32 %v3686_v63, %v3695_v37  ;;  %v3698_v7 = vmul.f32 %v3696_v19, %v3696_v19 }
 0x748   : > { %v9433_v31 = vpop.permute.xlu1 %9432 }
 0x749   : > { %v3700_v13 = vsel %vm2628_vm1, %v3698_v7, 0.0  ;;  %v3699_v61 = vmul.f32 %v3697_v48, %v3697_v48  ;;  %v9435_v63 = vunpack.i.h.bf16 %v9433_v31  ;;  %v9434_v26 = vunpack.i.l.bf16 %v9433_v31 }
 0x74a   : > { %3701 = vadd.xlane.f32.xlu0 %v3700_v13 }
 0x74b   : > { %v3703_v14 = vsel %vm2628_vm1, %v3699_v61, 0.0 }
 0x74e   : > { %3704 = vadd.xlane.f32.xlu0 %v3703_v14 }
 0x764   : > { %9437 = vrot.lane.b32.xlu0 %v9431_v49, %s9914_s23 }
 0x7d7   : > { %v3702_v23 = vpop.xlane.xlu0 %3701 }
 0x7d8   : > { %v3706_v27 = vmul.f32 0.03125, %v3702_v23 }
 0x7da   : > { %v3708_v62 = vadd.f32 1e-05, %v3706_v27 }
 0x7db   : > { %v3705_v4 = vpop.xlane.xlu0 %3704 }
 0x7dc   : > { %9772 = vrsqrt.f32 %v3708_v62  ;;  %v3707_v29 = vmul.f32 0.03125, %v3705_v4 }
 0x7de   : > { %v3709_v9 = vadd.f32 1e-05, %v3707_v29 }
 0x7df   : > { %v9438_v10 = vpop.permute.xlu0 %9437 }
 0x7e0   : > { %9774 = vrsqrt.f32 %v3709_v9  ;;  %v9440_v32 = vunpack.i.h.bf16 %v9438_v10  ;;  %v9439_v34 = vunpack.i.l.bf16 %v9438_v10 }
 0x7e2   : > { %v9248_v17 = vpack.c.bf16 %v9440_v32, %v9439_v34 }
 0x7e4   : > { %9250 = vmatprep.subr.msk.bf16.mxu0 %vm10903_vm3, %v9248_v17 }
 0x7e6   : > { %v9773_v8 = vpop.eup %9772 }
 0x7e7   : > { %v3712_v59 = vmul.f32 %v9773_v8, %v3696_v19 }
 0x7e9   : > { %v3718_v25 = vmul.f32 %v3717_v35, %v3712_v59 }
 0x7ea   : > { %v9775_v33 = vpop.eup %9774 }
 0x7eb   : > { %v3713_v20 = vmul.f32 %v9775_v33, %v3697_v48  ;;  %v11048_v36 = vadd.f32 %v3723_v50, %v3718_v25 }
 0x7ed   : > { %v3719_v51 = vmul.f32 %v3717_v35, %v3713_v20  ;;  %v3726_v6 = vadd.f32 %v11048_v36, %v10842_v0  ;;  %v9242_v0 = vpack.c.bf16 %v9435_v63, %v9434_v26 }
 0x7ef   : > { %v11050_v54 = vadd.f32 %v3723_v50, %v3719_v51 }
 0x7f1   : > { %v3727_v22 = vadd.f32 %v11050_v54, %v10847_v5  ;;  %v9443_v5 = vpop.permute.xlu1 %9442 }
 0x7f2   : > { %v9445_v12 = vunpack.i.h.bf16 %v9443_v5  ;;  %v9444_v38 = vunpack.i.l.bf16 %v9443_v5 }
 0x7f3   : > { %v3748_v55 = vpack.c.bf16 %v3727_v22, %v3726_v6 }
 0x7f4   : > { %v9254_v11 = vpack.c.bf16 %v9445_v12, %v9444_v38 }
 0x7f5   : > { %8897 = vmatmul.mubr.msk.bf16.vlgmr.msra.gmra.mrb[36].mxu1 %vm2628_vm1, %v3748_v55 }
 0x7f6   : > { %8909 = vmatpush3.bf16.msra.mxu1 %v9708_v15  ;;  %8912 = vmatprep.mubr.msk.bf16.mxu1 %vm9913_vm0, %v9912_v47 }
 0x7f7   : > { %8910 = vmatprep.subr.bf16.mxu1 %v9912_v47 }
 0x7fa   : > { %8911 = vmatpush3.bf16.msra.mxu1 %v9709_v45 }
 0x7fb   : > { %9244 = vmatprep.subr.msk.bf16.mxu1 %vm10903_vm3, %v9242_v0 }
 0x7fd   : > { %8913 = vmatmul.mubr.msk.bf16.vlgmr.msra.gmra.mrb[40].mxu1 %vm2628_vm1, %v10896_v39 }
 0x803   : > { %9247 = vmatpush3.bf16.xpose.msk.msra.mxu1 %vm10903_vm3, %v9242_v0 }
 0x804   : > { %9256 = vmatprep.subr.msk.bf16.mxu1 %vm10903_vm3, %v9254_v11 }
 0x8c8   : > { %v3802_v24 = vpop.f32.mrb[36].mxu1 }
 0x8c9   : > { %v3803_v30 = vadd.f32 %v3802_v24, %v3752_v2  ;;  %v8898_v21 = vpop.f32.mrb[37].mxu1 }
 0x8ca   : > { %v3805_v49 = vpop.f32.mrb[38].mxu1 }
 0x8cb   : > { %v3806_v18 = vadd.f32 %v3805_v49, %v3752_v2  ;;  %v8899_v1 = vpop.f32.mrb[39].mxu1  ;;  %8920 = vmatprep.mubr.msk.f32.mxu0 %vm2839_vm2, %v3803_v30  ;;  %3929 = vrot.lane.b32.xlu1 %v3803_v30, %s9915_s24 }
 0x8cd   : > { %3931 = vrot.lane.b32.xlu0 %v3806_v18, %s9915_s24  ;;  %8921 = vmatmul.mubr.msk.f32.vlgmr.msra.gmra.mrb[26].mxu0 %vm2839_vm2, %v3806_v18 }
 0x8ce   : > { %9253 = vmatpush3.bf16.xpose.msk.msra.mxu0 %vm10903_vm3, %v9248_v17 }
 0x8cf   : > { %3933 = vrot.lane.b32.xlu1 %v3803_v30, %s9914_s23 }
 0x8d0   : > { %v3920_v19 = vpop.f32.mrb[40].mxu1 }
 0x8d1   : > { %v8914_v37 = vpop.f32.mrb[41].mxu1  ;;  %3935 = vrot.lane.b32.xlu0 %v3806_v18, %s9914_s23  ;;  %v3921_v7 = vadd.f32 %v3920_v19, %v3873_v46 }
 0x8d2   : > { %v3923_v48 = vpop.f32.mrb[42].mxu1 }
 0x8d3   : > { %v3924_v13 = vadd.f32 %v3923_v48, %v3873_v46  ;;  %v8915_v61 = vpop.f32.mrb[43].mxu1  ;;  %3937 = vrot.lane.b32.xlu1 %v3803_v30, %s9916_s25 }
 0x8d5   : > { %3939 = vrot.lane.b32.xlu0 %v3806_v18, %s9916_s25  ;;  %v9260_v14 = vpack.c.bf16 %v3924_v13, %v3921_v7  ;;  %v11088_v3 = vpack.i.bf16 %v3924_v13, %v3921_v7 }
 0x8d7   : > { %9261 = vmatprep.subr.bf16.mxu0 %v9260_v14 }
 0x93d   : > { %v3930_v58 = vpop.permute.xlu1 %3929 }
 0x93e   : > { %8927 = vmatprep.mubr.msk.f32.mxu1 %vm2839_vm2, %v3930_v58 }
 0x93f   : > { %v3932_v60 = vpop.permute.xlu0 %3931 }
 0x940   : > { %8928 = vmatmul.mubr.msk.f32.vlgmr.msra.gmra.mrb[34].mxu1 %vm2839_vm2, %v3932_v60 }
 0x941   : > { %9259 = vmatpush3.bf16.xpose.msk.msra.mxu1 %vm10903_vm3, %v9254_v11  ;;  %v3934_v23 = vpop.permute.xlu1 %3933 }
 0x942   : > { %8934 = vmatprep.mubr.msk.f32.mxu0 %vm2839_vm2, %v3934_v23 }
 0x943   : > { %v3936_v27 = vpop.permute.xlu0 %3935 }
 0x944   : > { %8935 = vmatmul.mubr.msk.f32.vlgmr.msra.gmra.mrb[36].mxu0 %vm2839_vm2, %v3936_v27 }
 0x945   : > { %9263 = vmatpush3.bf16.msra.mxu0 %v9260_v14  ;;  %v3938_v62 = vpop.permute.xlu1 %3937 }
 0x946   : > { %8941 = vmatprep.mubr.msk.f32.mxu1 %vm2839_vm2, %v3938_v62 }
 0x947   : > { %v3940_v4 = vpop.permute.xlu0 %3939 }
 0x948   : > { %8942 = vmatmul.mubr.msk.f32.vlgmr.msra.gmra.mrb[44].mxu1 %vm2839_vm2, %v3940_v4 }
 0x9a0   : > { %v8922_v29 = vpop.f32.mrb[26].mxu0 }
 0x9a1   : > { %v4308_v9 = vmul.f32 0.35355338, %v8922_v29  ;;  %v4049_v10 = vpop.f32.mrb[27].mxu0 }
 0x9a2   : > { %v4307_v32 = vmul.f32 0.35355338, %v4049_v10 }
 0x9a3   : > { %v4318_v34 = vsel %vm3180_vm4, %v4308_v9, -inf }
 0x9a4   : > { %4319 = vmax.xlane.f32.xlu0 %v4318_v34  ;;  %v4315_v17 = vsel %vm3180_vm4, %v4307_v32, -inf }
 0x9a5   : > { %4316 = vmax.xlane.f32.xlu1 %v4315_v17 }
 0xa13   : > { %v8929_v35 = vpop.f32.mrb[34].mxu1 }
 0xa14   : > { %v4310_v8 = vmul.f32 0.35355338, %v8929_v35  ;;  %v4132_v59 = vpop.f32.mrb[35].mxu1 }
 0xa15   : > { %v4309_v25 = vmul.f32 0.35355338, %v4132_v59 }
 0xa16   : > { %v4324_v50 = vsel %vm3180_vm4, %v4310_v8, -inf }
 0xa17   : > { %4325 = vmax.xlane.f32.xlu1 %v4324_v50  ;;  %v8936_v33 = vpop.f32.mrb[36].mxu0  ;;  %v4321_v20 = vsel %vm3180_vm4, %v4309_v25, -inf }
 0xa18   : > { %v4312_v51 = vmul.f32 0.35355338, %v8936_v33  ;;  %4322 = vmax.xlane.f32.xlu0 %v4321_v20  ;;  %v4215_v6 = vpop.f32.mrb[37].mxu0 }
 0xa19   : > { %v4311_v22 = vmul.f32 0.35355338, %v4215_v6 }
 0xa1a   : > { %v4330_v31 = vsel %vm3180_vm4, %v4312_v51, -inf }
 0xa1b   : > { %v8943_v15 = vpop.f32.mrb[44].mxu1  ;;  %4331 = vmax.xlane.f32.xlu1 %v4330_v31  ;;  %v4327_v55 = vsel %vm3180_vm4, %v4311_v22, -inf }
 0xa1c   : > { %v4314_v63 = vmul.f32 0.35355338, %v8943_v15  ;;  %v4298_v26 = vpop.f32.mrb[45].mxu1  ;;  %4328 = vmax.xlane.f32.xlu0 %v4327_v55 }
 0xa1d   : > { %v4313_v45 = vmul.f32 0.35355338, %v4298_v26 }
 0xa1e   : > { %v4336_v0 = vsel %vm3180_vm4, %v4314_v63, -inf }
 0xa1f   : > { %4337 = vmax.xlane.f32.xlu1 %v4336_v0  ;;  %v4333_v5 = vsel %vm3180_vm4, %v4313_v45, -inf }
 0xa20   : > { %4334 = vmax.xlane.f32.xlu0 %v4333_v5 }
 0xa31   : > { %v4320_v12 = vpop.xlane.xlu0 %4319 }
 0xa32   : > { %v4340_v38 = vsub.f32 %v4308_v9, %v4320_v12  ;;  %v4317_v11 = vpop.xlane.xlu1 %4316 }
 0xa33   : > { %v4339_v2 = vsub.f32 %v4307_v32, %v4317_v11 }
 0xa34   : > { %v4349_v24 = vmul.f32 1.442695, %v4340_v38 }
 0xa35   : > { %v4347_v30 = vmul.f32 1.442695, %v4339_v2 }
 0xa36   : > { %9776 = vpow2.f32 %v4349_v24 }
 0xa37   : > { %9778 = vpow2.f32 %v4347_v30 }
 0xa40   : > { %v9777_v21 = vpop.eup %9776 }
 0xa41   : > { %v9779_v49 = vpop.eup %9778  ;;  %v4366_v18 = vsel %vm3180_vm4, %v9777_v21, 0.0 }
 0xa42   : > { %4367 = vadd.xlane.f32.xlu1 %v4366_v18  ;;  %v4363_v1 = vsel %vm3180_vm4, %v9779_v49, 0.0 }
 0xa43   : > { %4364 = vadd.xlane.f32.xlu0 %v4363_v1 }
 0xaa4   : > { %v4326_v46 = vpop.xlane.xlu1 %4325 }
 0xaa5   : > { %v4342_v19 = vsub.f32 %v4310_v8, %v4326_v46  ;;  %v4323_v37 = vpop.xlane.xlu0 %4322 }
 0xaa6   : > { %v4341_v48 = vsub.f32 %v4309_v25, %v4323_v37 }
 0xaa7   : > { %v4353_v7 = vmul.f32 1.442695, %v4342_v19 }
 0xaa8   : > { %v4351_v13 = vmul.f32 1.442695, %v4341_v48  ;;  %v4332_v61 = vpop.xlane.xlu1 %4331 }
 0xaa9   : > { %9780 = vpow2.f32 %v4353_v7  ;;  %v4344_v14 = vsub.f32 %v4312_v51, %v4332_v61  ;;  %v4329_v58 = vpop.xlane.xlu0 %4328 }
 0xaaa   : > { %9782 = vpow2.f32 %v4351_v13  ;;  %v4343_v60 = vsub.f32 %v4311_v22, %v4329_v58 }
 0xaab   : > { %v4357_v23 = vmul.f32 1.442695, %v4344_v14 }
 0xaac   : > { %v4355_v27 = vmul.f32 1.442695, %v4343_v60  ;;  %v4338_v62 = vpop.xlane.xlu1 %4337 }
 0xaad   : > { %9784 = vpow2.f32 %v4357_v23  ;;  %v4346_v4 = vsub.f32 %v4314_v63, %v4338_v62  ;;  %v4335_v29 = vpop.xlane.xlu0 %4334 }
 0xaae   : > { %9786 = vpow2.f32 %v4355_v27  ;;  %v4345_v9 = vsub.f32 %v4313_v45, %v4335_v29 }
 0xaaf   : > { %v4361_v10 = vmul.f32 1.442695, %v4346_v4 }
 0xab0   : > { %v4359_v32 = vmul.f32 1.442695, %v4345_v9 }
 0xab1   : > { %9788 = vpow2.f32 %v4361_v10 }
 0xab2   : > { %9790 = vpow2.f32 %v4359_v32 }
 0xab3   : > { %v11108_v34 = vpop.eup %9780 }
 0xab4   : > { %v9783_v17 = vpop.eup %9782  ;;  %v4372_v35 = vsel %vm3180_vm4, %v11108_v34, 0.0 }
 0xab5   : > { %4373 = vadd.xlane.f32.xlu1 %v4372_v35  ;;  %v4369_v8 = vsel %vm3180_vm4, %v9783_v17, 0.0  ;;  %v9711_v35 = vld [vmem:[%s11843_s4 + $0x78] sm:$0xff]  }
 0xab6   : > { %4370 = vadd.xlane.f32.xlu0 %v4369_v8 }
 0xab7   : > { %v9785_v59 = vpop.eup %9784 }
 0xab8   : > { %v9787_v25 = vpop.eup %9786  ;;  %v4378_v50 = vsel %vm3180_vm4, %v9785_v59, 0.0 }
 0xab9   : > { %4379 = vadd.xlane.f32.xlu1 %v4378_v50  ;;  %v4375_v33 = vsel %vm3180_vm4, %v9787_v25, 0.0 }
 0xaba   : > { %4376 = vadd.xlane.f32.xlu0 %v4375_v33 }
 0xabb   : > { %v11115_v20 = vpop.eup %9788 }
 0xabc   : > { %v9791_v51 = vpop.eup %9790  ;;  %v4384_v6 = vsel %vm3180_vm4, %v11115_v20, 0.0 }
 0xabd   : > { %4385 = vadd.xlane.f32.xlu1 %v4384_v6  ;;  %v4381_v22 = vsel %vm3180_vm4, %v9791_v51, 0.0 }
 0xabe   : > { %4382 = vadd.xlane.f32.xlu0 %v4381_v22 }
 0xace   : > { %9452 = vrot.lane.b32.xlu1 %v11088_v3, %s9914_s23 }
 0xacf   : > { %v4368_v31 = vpop.xlane.xlu1 %4367 }
 0xad0   : > { %9792 = vrcp.f32 %v4368_v31  ;;  %v4365_v15 = vpop.xlane.xlu0 %4364 }
 0xad1   : > { %9794 = vrcp.f32 %v4365_v15 }
 0xad2   : > { %9457 = vrot.lane.b32.xlu1 %v11088_v3, %s9916_s25 }
 0xad4   : > { %9447 = vrot.lane.b32.xlu0 %v11088_v3, %s9915_s24 }
 0xada   : > { %v9793_v55 = vpop.eup %9792 }
 0xadb   : > { %v9795_v63 = vpop.eup %9794  ;;  %v4390_v45 = vmul.f32 %v9793_v55, %v9777_v21 }
 0xadc   : > { %v4388_v26 = vmul.f32 %v9795_v63, %v9779_v49 }
 0xade   : > { %8948 = vmatprep.mubr.msk.f32.mxu0 %vm3180_vm4, %v4388_v26 }
 0xadf   : > { %8949 = vmatmul.mubr.msk.f32.vlgmr.msra.gmra.mrb[38].mxu0 %vm3180_vm4, %v4390_v45 }
 0xb42   : > { %v4374_v0 = vpop.xlane.xlu1 %4373 }
 0xb43   : > { %v4371_v5 = vpop.xlane.xlu0 %4370 }
 0xb44   : > { %9796 = vrcp.f32 %v4371_v5 }
 0xb46   : > { %v4380_v12 = vpop.xlane.xlu1 %4379 }
 0xb47   : > { %9798 = vrcp.f32 %v4380_v12  ;;  %v4377_v38 = vpop.xlane.xlu0 %4376 }
 0xb48   : > { %9800 = vrcp.f32 %v4377_v38 }
 0xb49   : > { %9802 = vrcp.f32 %v4374_v0 }
 0xb4a   : > { %v4386_v11 = vpop.xlane.xlu1 %4385 }
 0xb4b   : > { %v4383_v2 = vpop.xlane.xlu0 %4382 }
 0xb4c   : > { %9804 = vrcp.f32 %v4383_v2 }
 0xb4d   : > { %9806 = vrcp.f32 %v4386_v11 }
 0xb4e   : > { %v9797_v3 = vpop.eup %9796  ;;  %v9453_v24 = vpop.permute.xlu1 %9452 }
 0xb4f   : > { %v9455_v30 = vunpack.i.h.bf16 %v9453_v24  ;;  %v9454_v21 = vunpack.i.l.bf16 %v9453_v24  ;;  %v9448_v49 = vpop.permute.xlu0 %9447  ;;  %v4392_v18 = vmul.f32 %v9797_v3, %v9783_v17  ;;  %v9710_v17 = vld [vmem:[%s11843_s4 + $0x70] sm:$0xff]  }
 0xb50   : > { %v9450_v1 = vunpack.i.h.bf16 %v9448_v49  ;;  %v9449_v46 = vunpack.i.l.bf16 %v9448_v49  ;;  %v9896_v49 = vld [vmem:[%s11844_s5] sm:$0xff] }
 0xb51   : > { %v9799_v19 = vpop.eup %9798  ;;  %8955 = vmatprep.mubr.msk.f32.mxu1 %vm3180_vm4, %v4392_v18  ;;  %v9268_v37 = vpack.c.bf16 %v9455_v30, %v9454_v21  ;;  %v4761_v18 = vrot.slane %v9896_v49, %v10110_v44 }
 0xb52   : > { %v9801_v48 = vpop.eup %9800  ;;  %v9458_v7 = vpop.permute.xlu1 %9457  ;;  %v9264_v13 = vpack.c.bf16 %v9450_v1, %v9449_v46  ;;  %v4398_v23 = vmul.f32 %v9799_v19, %v9785_v59 }
 0xb53   : > { %v9803_v61 = vpop.eup %9802  ;;  %v9460_v14 = vunpack.i.h.bf16 %v9458_v7  ;;  %v9459_v58 = vunpack.i.l.bf16 %v9458_v7  ;;  %9269 = vmatprep.subr.bf16.mxu0 %v9268_v37  ;;  %v4396_v60 = vmul.f32 %v9801_v48, %v9787_v25 }
 0xb54   : > { %9265 = vmatprep.subr.bf16.mxu1 %v9264_v13  ;;  %9271 = vmatpush3.bf16.msra.mxu0 %v9268_v37  ;;  %v4394_v4 = vmul.f32 %v9803_v61, %v11108_v34 }
 0xb55   : > { %9267 = vmatpush3.bf16.msra.mxu1 %v9264_v13  ;;  %8962 = vmatprep.mubr.msk.f32.mxu0 %vm3180_vm4, %v4396_v60  ;;  %v9272_v27 = vpack.c.bf16 %v9460_v14, %v9459_v58 }
 0xb56   : > { %v9805_v62 = vpop.eup %9804  ;;  %8972 = vmatprep.subr.bf16.mxu0 %v9912_v47 }
 0xb57   : > { %v9807_v29 = vpop.eup %9806  ;;  %8963 = vmatmul.mubr.msk.f32.vlgmr.msra.gmra.mrb[40].mxu0 %vm3180_vm4, %v4398_v23  ;;  %9273 = vmatprep.subr.bf16.mxu1 %v9272_v27  ;;  %v4400_v9 = vmul.f32 %v9805_v62, %v9791_v51 }
 0xb58   : > { %8956 = vmatmul.mubr.msk.f32.vlgmr.msra.gmra.mrb[46].mxu1 %vm3180_vm4, %v4394_v4  ;;  %8976 = vmatprep.mubr.msk.bf16.mxu0 %vm9913_vm0, %v9912_v47  ;;  %v4402_v10 = vmul.f32 %v9807_v29, %v11115_v20 }
 0xb59   : > { %9275 = vmatpush3.bf16.msra.mxu1 %v9272_v27  ;;  %8969 = vmatprep.mubr.msk.f32.mxu1 %vm3180_vm4, %v4400_v9 }
 0xb5a   : > { %8980 = vmatprep.subr.bf16.mxu1 %v9912_v47  ;;  %8973 = vmatpush3.bf16.msra.mxu0 %v9710_v17  ;;  %v9714_v17 = vld [vmem:[%s11847_s8] sm:$0xff]  }
 0xb5b   : > { %8974 = vmatprep.subr.bf16.mxu0 %v9912_v47 }
 0xb5c   : > { %8970 = vmatmul.mubr.msk.f32.vlgmr.msra.gmra.mrb[48].mxu1 %vm3180_vm4, %v4402_v10 }
 0xb5d   : > { %8984 = vmatprep.mubr.msk.bf16.mxu1 %vm9913_vm0, %v9912_v47 }
 0xb5e   : > { %8975 = vmatpush3.bf16.msra.mxu0 %v9711_v35  ;;  %v9715_v35 = vld [vmem:[%s11847_s8 + $0x8] sm:$0xff]  }
 0xb5f   : > { %8988 = vmatprep.subr.bf16.mxu0 %v9912_v47 }
 0xbb2   : > { %v8950_v32 = vpop.f32.mrb[38].mxu0 }
 0xbb3   : > { %v4475_v34 = vpop.f32.mrb[39].mxu0 }
 0xc2a   : > { %v8964_v8 = vpop.f32.mrb[40].mxu0 }
 0xc2b   : > { %v8957_v59 = vpop.f32.mrb[46].mxu1  ;;  %v4637_v25 = vpop.f32.mrb[41].mxu0 }
 0xc2c   : > { %v9466_v50 = vpack.i.bf16 %v8964_v8, %v4637_v25  ;;  %v4556_v33 = vpop.f32.mrb[47].mxu1 }
 0xc2d   : > { %v9461_v20 = vpack.i.bf16 %v8957_v59, %v4556_v33 }
 0xc2e   : > { %9467 = vrot.lane.b32.xlu1 %v9466_v50, %s9918_s11 }
 0xc2f   : > { %9462 = vrot.lane.b32.xlu0 %v9461_v20, %s9917_s30  ;;  %v8971_v51 = vpop.f32.mrb[48].mxu1 }
 0xc30   : > { %v4718_v6 = vpop.f32.mrb[49].mxu1 }
 0xc31   : > { %v9471_v22 = vpack.i.bf16 %v8971_v51, %v4718_v6  ;;  %v4849_v51 = vrot.slane %v11040_v16, %v10135_v57 }
 0xc33   : > { %9472 = vrot.lane.b32.xlu0 %v9471_v22, %s9919_s12 }
 0xca0   : > { %v9468_v15 = vpop.permute.xlu1 %9467 }
 0xca1   : > { %v9463_v31 = vpop.permute.xlu0 %9462  ;;  %v9470_v0 = vunpack.i.h.bf16 %v9468_v15  ;;  %v9469_v5 = vunpack.i.l.bf16 %v9468_v15 }
 0xca2   : > { %v9465_v55 = vunpack.i.h.bf16 %v9463_v31  ;;  %v9464_v63 = vunpack.i.l.bf16 %v9463_v31 }
 0xca4   : > { %v4752_v26 = vsel %vm2839_vm2, %v8950_v32, %v9465_v55  ;;  %v4751_v45 = vsel %vm2839_vm2, %v4475_v34, %v9464_v63  ;;  %v9713_v34 = vld [vmem:[%s11845_s6 + $0x8] sm:$0xff]   ;;  %v4855_v63 = vrot.slane %v11040_v16, %v10101_v41 }
 0xca5   : > { %v9473_v12 = vpop.permute.xlu0 %9472  ;;  %v4753_v2 = vsel %vm3180_vm4, %v4751_v45, %v9469_v5  ;;  %v4754_v3 = vsel %vm3180_vm4, %v4752_v26, %v9470_v0 }
 0xca6   : > { %v9475_v38 = vunpack.i.h.bf16 %v9473_v12  ;;  %v9474_v11 = vunpack.i.l.bf16 %v9473_v12  ;;  %v9716_v12 = vld [vmem:[%s11847_s8 + $0x10] sm:$0xff]  }
 0xca8   : > { %v4756_v24 = vsel %vm3621_vm5, %v4754_v3, %v9475_v38  ;;  %v4755_v30 = vsel %vm3621_vm5, %v4753_v2, %v9474_v11  ;;  %v9717_v38 = vld [vmem:[%s11847_s8 + $0x18] sm:$0xff]   ;;  %v8291_v11 = vld [vmem:[%s11846_s7] ss:$0 sm:$0xff] }
 0xca9   : > { %v4757_v21 = vpack.c.bf16 %v4756_v24, %v4755_v30 }
 0xcab   : > { %8977 = vmatmul.mubr.msk.bf16.vlgmr.msra.gmra.mrb[44].mxu0 %vm2628_vm1, %v4757_v21 }
 0xcac   : > { %8996 = vmatprep.mubr.msk.bf16.mxu0 %vm9913_vm0, %v9912_v47  ;;  %8989 = vmatpush3.bf16.msra.mxu0 %v9714_v17 }
 0xcad   : > { %8990 = vmatprep.subr.bf16.mxu0 %v9912_v47 }
 0xcb0   : > { %8991 = vmatpush3.bf16.msra.mxu0 %v9715_v35  ;;  %v9718_v35 = vld [vmem:[%s11843_s4 + $0xa0] sm:$0xff]  }
 0xcb1   : > { %8992 = vmatprep.subr.bf16.mxu0 %v9912_v47 }
 0xcb4   : > { %8993 = vmatpush3.bf16.msra.mxu0 %v9716_v12 }
 0xcb5   : > { %8994 = vmatprep.subr.bf16.mxu0 %v9912_v47 }
 0xcb8   : > { %8995 = vmatpush3.bf16.msra.mxu0 %v9717_v38 }
 0xcb9   : > { %9016 = vmatprep.subr.bf16.mxu0 %v9912_v47 }
 0xd7e   : > { %v4811_v1 = vpop.f32.mrb[44].mxu0 }
 0xd7f   : > { %v4812_v46 = vadd.f32 %v4811_v1, %v4761_v18  ;;  %v8978_v19 = vpop.f32.mrb[45].mxu0 }
 0xd80   : > { %v4814_v37 = vpop.f32.mrb[46].mxu0  ;;  %v4940_v19 = vrot.slane %v11040_v16, %v10124_v52 }
 0xd81   : > { %v4815_v48 = vadd.f32 %v4814_v37, %v4761_v18  ;;  %v8979_v7 = vpop.f32.mrb[47].mxu0  ;;  %v4818_v13 = vadd.f32 %v4812_v46, %v11048_v36 }
 0xd83   : > { %v4820_v61 = vsel %vm2628_vm1, %v4818_v13, 0.0  ;;  %v4819_v14 = vadd.f32 %v4815_v48, %v11050_v54  ;;  %v9712_v54 = vld [vmem:[%s11845_s6] sm:$0xff]  }
 0xd84   : > { %4821 = vadd.xlane.f32.xlu1 %v4820_v61  ;;  %8981 = vmatpush3.bf16.msra.mxu1 %v9712_v54 }
 0xd85   : > { %v4823_v58 = vsel %vm2628_vm1, %v4819_v14, 0.0  ;;  %8982 = vmatprep.subr.bf16.mxu1 %v9912_v47 }
 0xd86   : > { %4824 = vadd.xlane.f32.xlu0 %v4823_v58 }
 0xd88   : > { %8983 = vmatpush3.bf16.msra.mxu1 %v9713_v34 }
 0xd89   : > { %9000 = vmatprep.subr.bf16.mxu1 %v9912_v47 }
 0xe11   : > { %v4822_v60 = vpop.xlane.xlu1 %4821 }
 0xe12   : > { %v4826_v23 = vmul.f32 0.03125, %v4822_v60 }
 0xe13   : > { %v4825_v27 = vpop.xlane.xlu0 %4824 }
 0xe14   : > { %v4828_v62 = vsub.f32 %v4818_v13, %v4826_v23  ;;  %v4827_v4 = vmul.f32 0.03125, %v4825_v27 }
 0xe16   : > { %v4829_v29 = vsub.f32 %v4819_v14, %v4827_v4  ;;  %v4830_v9 = vmul.f32 %v4828_v62, %v4828_v62 }
 0xe18   : > { %v4832_v10 = vsel %vm2628_vm1, %v4830_v9, 0.0  ;;  %v4831_v32 = vmul.f32 %v4829_v29, %v4829_v29 }
 0xe19   : > { %4833 = vadd.xlane.f32.xlu0 %v4832_v10 }
 0xe1a   : > { %v4835_v36 = vsel %vm2628_vm1, %v4831_v32, 0.0 }
 0xe1b   : > { %4836 = vadd.xlane.f32.xlu1 %v4835_v36 }
 0xea6   : > { %v4834_v8 = vpop.xlane.xlu0 %4833 }
 0xea7   : > { %v4838_v59 = vmul.f32 0.03125, %v4834_v8  ;;  %v9719_v8 = vld [vmem:[%s11843_s4 + $0x80] sm:$0xff]  }
 0xea8   : > { %v4837_v25 = vpop.xlane.xlu1 %4836 }
 0xea9   : > { %v4840_v50 = vadd.f32 1e-05, %v4838_v59  ;;  %v4839_v33 = vmul.f32 0.03125, %v4837_v25  ;;  %v9720_v59 = vld [vmem:[%s11843_s4 + $0xa8] sm:$0xff]  }
 0xeaa   : > { %v9721_v25 = vld [vmem:[%s11843_s4 + $0x88] sm:$0xff]  }
 0xeab   : > { %9808 = vrsqrt.f32 %v4840_v50  ;;  %v4841_v20 = vadd.f32 1e-05, %v4839_v33 }
 0xead   : > { %9810 = vrsqrt.f32 %v4841_v20 }
 0xeb5   : > { %v9809_v6 = vpop.eup %9808 }
 0xeb6   : > { %v4844_v22 = vmul.f32 %v9809_v6, %v4828_v62 }
 0xeb7   : > { %v9811_v31 = vpop.eup %9810 }
 0xeb8   : > { %v4850_v15 = vmul.f32 %v4849_v51, %v4844_v22  ;;  %v4845_v55 = vmul.f32 %v9811_v31, %v4829_v29  ;;  %v5041_v31 = vrot.slane %v11040_v16, %v10104_v42 }
 0xeba   : > { %v4851_v26 = vmul.f32 %v4849_v51, %v4845_v55  ;;  %v4856_v45 = vadd.f32 %v4855_v63, %v4850_v15 }
 0xebc   : > { %v4857_v0 = vadd.f32 %v4855_v63, %v4851_v26  ;;  %v5047_v63 = vrot.slane %v11040_v16, %v10107_v43  ;;  %v11250_v16 = vld [vmem:[%s11842_s3 + $0x8] sm:$0xff] }
 0xebe   : > { %v4858_v5 = vpack.c.bf16 %v4857_v0, %v4856_v45 }
 0xec0   : > { %8985 = vmatmul.mubr.msk.bf16.vlgmr.msra.gmra.mrb[52].mxu1 %vm2628_vm1, %v4858_v5 }
 0xec1   : > { %9004 = vmatprep.mubr.msk.bf16.mxu1 %vm9913_vm0, %v9912_v47  ;;  %9001 = vmatpush3.bf16.msra.mxu1 %v9719_v8 }
 0xec2   : > { %9002 = vmatprep.subr.bf16.mxu1 %v9912_v47 }
 0xec5   : > { %9003 = vmatpush3.bf16.msra.mxu1 %v9721_v25 }
 0xec6   : > { %9008 = vmatprep.subr.bf16.mxu1 %v9912_v47 }
 0xf93   : > { %v4919_v2 = vpop.f32.mrb[52].mxu1 }
 0xf94   : > { %v4920_v3 = vadd.f32 %v8291_v11, %v4919_v2  ;;  %v8986_v24 = vpop.f32.mrb[53].mxu1  ;;  %v11243_v2 = vld [vmem:[%s11842_s3] sm:$0xff] }
 0xf95   : > { %v4922_v30 = vpop.f32.mrb[54].mxu1 }
 0xf96   : > { %v4923_v21 = vadd.f32 %v8291_v11, %v4922_v30  ;;  %v8987_v49 = vpop.f32.mrb[55].mxu1  ;;  %v4926_v18 = vmax.f32 %v4920_v3, 0.0  ;;  %v9722_v30 = vld [vmem:[%s11843_s4 + $0x90] sm:$0xff]  }
 0xf97   : > { %v9723_v49 = vld [vmem:[%s11843_s4 + $0x98] sm:$0xff]  }
 0xf98   : > { %v4927_v1 = vmax.f32 %v4923_v21, 0.0 }
 0xf9a   : > { %v4928_v46 = vpack.c.bf16 %v4927_v1, %v4926_v18  ;;  %v11269_v18 = vld [vmem:[%s11844_s5 + $0x10] sm:$0xff] }
 0xf9b   : > { %v5197_v1 = vrot.slane %v11269_v18, %v10132_v56 }
 0xf9c   : > { %8997 = vmatmul.mubr.msk.bf16.vlgmr.msra.gmra.mrb[48].mxu0 %vm4965_vm6, %v4928_v46  ;;  %v5079_v46 = vrot.slane %v11269_v18, %v10124_v52 }
 0xf9d   : > { %9020 = vmatprep.mubr.msk.bf16.mxu0 %vm9913_vm0, %v9912_v47  ;;  %9017 = vmatpush3.bf16.msra.mxu0 %v9718_v35 }
 0xf9e   : > { %9018 = vmatprep.subr.bf16.mxu0 %v9912_v47 }
 0xfa1   : > { %9019 = vmatpush3.bf16.msra.mxu0 %v9720_v59 }
0x106f   : > { %v5003_v37 = vpop.f32.mrb[48].mxu0 }
0x1070   : > { %v5004_v48 = vadd.f32 %v5003_v37, %v4940_v19  ;;  %v8998_v7 = vpop.f32.mrb[49].mxu0 }
0x1071   : > { %v5006_v13 = vpop.f32.mrb[50].mxu0 }
0x1072   : > { %v5007_v61 = vadd.f32 %v5006_v13, %v4940_v19  ;;  %v8999_v14 = vpop.f32.mrb[51].mxu0  ;;  %v5010_v58 = vadd.f32 %v5004_v48, %v4856_v45 }
0x1074   : > { %v5012_v60 = vsel %vm2628_vm1, %v5010_v58, 0.0  ;;  %v5011_v23 = vadd.f32 %v5007_v61, %v4857_v0 }
0x1075   : > { %5013 = vadd.xlane.f32.xlu0 %v5012_v60 }
0x1076   : > { %v5015_v27 = vsel %vm2628_vm1, %v5011_v23, 0.0 }
0x1077   : > { %5016 = vadd.xlane.f32.xlu1 %v5015_v27 }
0x1102   : > { %v5014_v62 = vpop.xlane.xlu0 %5013 }
0x1103   : > { %v5018_v4 = vmul.f32 0.03125, %v5014_v62 }
0x1104   : > { %v5017_v29 = vpop.xlane.xlu1 %5016 }
0x1105   : > { %v5020_v9 = vsub.f32 %v5010_v58, %v5018_v4  ;;  %v5019_v10 = vmul.f32 0.03125, %v5017_v29  ;;  %v5139_v29 = vrot.slane %v11269_v18, %v10127_v53 }
0x1107   : > { %v5021_v32 = vsub.f32 %v5011_v23, %v5019_v10  ;;  %v5022_v36 = vmul.f32 %v5020_v9, %v5020_v9 }
0x1109   : > { %v5024_v54 = vsel %vm2628_vm1, %v5022_v36, 0.0  ;;  %v5023_v34 = vmul.f32 %v5021_v32, %v5021_v32 }
0x110a   : > { %5025 = vadd.xlane.f32.xlu0 %v5024_v54 }
0x110b   : > { %v5027_v17 = vsel %vm2628_vm1, %v5023_v34, 0.0 }
0x110c   : > { %5028 = vadd.xlane.f32.xlu1 %v5027_v17 }
0x1197   : > { %v5026_v50 = vpop.xlane.xlu0 %5025 }
0x1198   : > { %v5030_v33 = vmul.f32 0.03125, %v5026_v50 }
0x1199   : > { %v5029_v20 = vpop.xlane.xlu1 %5028 }
0x119a   : > { %v5032_v51 = vadd.f32 1e-05, %v5030_v33  ;;  %v5031_v6 = vmul.f32 0.03125, %v5029_v20 }
0x119c   : > { %9812 = vrsqrt.f32 %v5032_v51  ;;  %v5033_v22 = vadd.f32 1e-05, %v5031_v6 }
0x119e   : > { %9814 = vrsqrt.f32 %v5033_v22 }
0x11a6   : > { %v9813_v15 = vpop.eup %9812 }
0x11a7   : > { %v5036_v55 = vmul.f32 %v9813_v15, %v5020_v9 }
0x11a8   : > { %v9815_v26 = vpop.eup %9814 }
0x11a9   : > { %v5042_v45 = vmul.f32 %v5041_v31, %v5036_v55  ;;  %v5037_v0 = vmul.f32 %v9815_v26, %v5021_v32 }
0x11ab   : > { %v5043_v5 = vmul.f32 %v5041_v31, %v5037_v0  ;;  %v11234_v12 = vadd.f32 %v5047_v63, %v5042_v45 }
0x11ad   : > { %v11236_v38 = vadd.f32 %v5047_v63, %v5043_v5  ;;  %v5053_v3 = vadd.f32 %v11243_v2, %v11234_v12 }
0x11af   : > { %v5193_v11 = vpack.c.bf16 %v11236_v38, %v11234_v12  ;;  %v5054_v24 = vadd.f32 %v11250_v16, %v11236_v38 }
0x11b1   : > { %9021 = vmatmul.mubr.msk.bf16.vlgmr.msra.gmra.mrb[52].mxu0 %vm2628_vm1, %v5193_v11  ;;  %v5075_v21 = vpack.c.bf16 %v5054_v24, %v5053_v3 }
0x11b3   : > { %9005 = vmatmul.mubr.msk.bf16.vlgmr.msra.gmra.mrb[56].mxu1 %vm2628_vm1, %v5075_v21 }
0x11b4   : > { %9009 = vmatpush3.bf16.msra.mxu1 %v9722_v30  ;;  %9012 = vmatprep.mubr.msk.bf16.mxu1 %vm9913_vm0, %v9912_v47 }
0x11b5   : > { %9010 = vmatprep.subr.bf16.mxu1 %v9912_v47 }
0x11b8   : > { %9011 = vmatpush3.bf16.msra.mxu1 %v9723_v49 }
0x11bb   : > { %9013 = vmatmul.mubr.msk.bf16.vlgmr.msra.gmra.mrb[60].mxu1 %vm2628_vm1, %v5075_v21 }
0x1284   : > { %v5247_v19 = vpop.f32.mrb[52].mxu0 }
0x1285   : > { %v9022_v37 = vpop.f32.mrb[53].mxu0  ;;  %v5248_v13 = vadd.f32 %v5247_v19, %v5197_v1 }
0x1286   : > { %v5129_v48 = vpop.f32.mrb[56].mxu1  ;;  %v5250_v7 = vpop.f32.mrb[54].mxu0 }
0x1287   : > { %v5130_v61 = vadd.f32 %v5129_v48, %v5079_v46  ;;  %v5251_v14 = vadd.f32 %v5250_v7, %v5197_v1  ;;  %v9006_v58 = vpop.f32.mrb[57].mxu1  ;;  %v9023_v60 = vpop.f32.mrb[55].mxu0 }
0x1288   : > { %v5132_v23 = vpop.f32.mrb[58].mxu1 }
0x1289   : > { %v9007_v27 = vpop.f32.mrb[59].mxu1  ;;  %9028 = vmatprep.mubr.msk.f32.mxu1 %vm2839_vm2, %v5130_v61  ;;  %v9300_v62 = vpack.c.bf16 %v5251_v14, %v5248_v13  ;;  %v11276_v4 = vpack.i.bf16 %v5251_v14, %v5248_v13  ;;  %v5133_v8 = vadd.f32 %v5132_v23, %v5079_v46 }
0x128e   : > { %v5186_v9 = vpop.f32.mrb[60].mxu1 }
0x128f   : > { %v9014_v10 = vpop.f32.mrb[61].mxu1  ;;  %v5187_v36 = vadd.f32 %v5186_v9, %v5139_v29 }
0x1290   : > { %v5189_v32 = vpop.f32.mrb[62].mxu1 }
0x1291   : > { %v5190_v54 = vadd.f32 %v5189_v32, %v5139_v29  ;;  %v9015_v34 = vpop.f32.mrb[63].mxu1 }
0x1293   : > { %v9481_v17 = vpack.i.bf16 %v5190_v54, %v5187_v36  ;;  %v9276_v35 = vpack.c.bf16 %v5190_v54, %v5187_v36 }
0x1295   : > { %9482 = vrot.lane.b32.xlu1 %v9481_v17, %s9914_s23  ;;  %9477 = vrot.lane.b32.xlu0 %v9481_v17, %s9915_s24 }
0x1296   : > { %9278 = vmatprep.subr.msk.bf16.mxu1 %vm10903_vm3, %v9276_v35 }
0x1297   : > { %9281 = vmatpush3.bf16.xpose.msk.msra.mxu1 %vm10903_vm3, %v9276_v35 }
0x1299   : > { %9487 = vrot.lane.b32.xlu1 %v9481_v17, %s9916_s25  ;;  %5256 = vrot.lane.b32.xlu0 %v5130_v61, %s9915_s24 }
0x129d   : > { %5258 = vrot.lane.b32.xlu1 %v5133_v8, %s9915_s24  ;;  %5260 = vrot.lane.b32.xlu0 %v5130_v61, %s9914_s23 }
0x129e   : > { %9029 = vmatmul.mubr.msk.f32.vlgmr.msra.gmra.mrb[50].mxu1 %vm2839_vm2, %v5133_v8 }
0x12a1   : > { %5262 = vrot.lane.b32.xlu1 %v5133_v8, %s9914_s23  ;;  %5264 = vrot.lane.b32.xlu0 %v5130_v61, %s9916_s25 }
0x12a5   : > { %5266 = vrot.lane.b32.xlu1 %v5133_v8, %s9916_s25 }
0x1307   : > { %v9483_v59 = vpop.permute.xlu1 %9482  ;;  %v9478_v25 = vpop.permute.xlu0 %9477 }
0x1308   : > { %v9485_v50 = vunpack.i.h.bf16 %v9483_v59  ;;  %v9484_v33 = vunpack.i.l.bf16 %v9483_v59  ;;  %v9480_v20 = vunpack.i.h.bf16 %v9478_v25  ;;  %v9479_v51 = vunpack.i.l.bf16 %v9478_v25 }
0x130a   : > { %v9288_v6 = vpack.c.bf16 %v9485_v50, %v9484_v33  ;;  %v9282_v22 = vpack.c.bf16 %v9480_v20, %v9479_v51 }
0x130b   : > { %v9488_v31 = vpop.permute.xlu1 %9487  ;;  %v5257_v15 = vpop.permute.xlu0 %5256 }
0x130c   : > { %v9490_v55 = vunpack.i.h.bf16 %v9488_v31  ;;  %v9489_v63 = vunpack.i.l.bf16 %v9488_v31  ;;  %9284 = vmatprep.subr.msk.bf16.mxu0 %vm10903_vm3, %v9282_v22  ;;  %9035 = vmatprep.mubr.msk.f32.mxu0 %vm2839_vm2, %v5257_v15 }
0x130d   : > { %9290 = vmatprep.subr.msk.bf16.mxu1 %vm10903_vm3, %v9288_v6  ;;  %9287 = vmatpush3.bf16.xpose.msk.msra.mxu0 %vm10903_vm3, %v9282_v22 }
0x130e   : > { %v9294_v26 = vpack.c.bf16 %v9490_v55, %v9489_v63  ;;  %9293 = vmatpush3.bf16.xpose.msk.msra.mxu1 %vm10903_vm3, %v9288_v6 }
0x130f   : > { %9301 = vmatprep.subr.bf16.mxu1 %v9300_v62  ;;  %v5259_v45 = vpop.permute.xlu1 %5258  ;;  %v5261_v0 = vpop.permute.xlu0 %5260 }
0x1310   : > { %9042 = vmatprep.mubr.msk.f32.mxu1 %vm2839_vm2, %v5261_v0  ;;  %9296 = vmatprep.subr.msk.bf16.mxu0 %vm10903_vm3, %v9294_v26 }
0x1313   : > { %v5263_v5 = vpop.permute.xlu1 %5262  ;;  %v5265_v11 = vpop.permute.xlu0 %5264 }
0x1314   : > { %9036 = vmatmul.mubr.msk.f32.vlgmr.msra.gmra.mrb[42].mxu0 %vm2839_vm2, %v5259_v45 }
0x1315   : > { %9043 = vmatmul.mubr.msk.f32.vlgmr.msra.gmra.mrb[64].mxu1 %vm2839_vm2, %v5263_v5  ;;  %9299 = vmatpush3.bf16.xpose.msk.msra.mxu0 %vm10903_vm3, %v9294_v26 }
0x1316   : > { %9049 = vmatprep.mubr.msk.f32.mxu0 %vm2839_vm2, %v5265_v11  ;;  %9303 = vmatpush3.bf16.msra.mxu1 %v9300_v62 }
0x1317   : > { %v5267_v3 = vpop.permute.xlu1 %5266 }
0x131c   : > { %9050 = vmatmul.mubr.msk.f32.vlgmr.msra.gmra.mrb[56].mxu0 %vm2839_vm2, %v5267_v3 }
0x1371   : > { %v9030_v24 = vpop.f32.mrb[50].mxu1 }
0x1372   : > { %v5635_v30 = vmul.f32 0.35355338, %v9030_v24  ;;  %v5376_v21 = vpop.f32.mrb[51].mxu1 }
0x1373   : > { %v5634_v49 = vmul.f32 0.35355338, %v5376_v21 }
0x1374   : > { %v5645_v1 = vsel %vm3180_vm4, %v5635_v30, -inf }
0x1375   : > { %5646 = vmax.xlane.f32.xlu1 %v5645_v1  ;;  %v5642_v46 = vsel %vm3180_vm4, %v5634_v49, -inf }
0x1376   : > { %5643 = vmax.xlane.f32.xlu0 %v5642_v46 }
0x13e7   : > { %v9037_v19 = vpop.f32.mrb[42].mxu0 }
0x13e8   : > { %v5637_v37 = vmul.f32 0.35355338, %v9037_v19  ;;  %v9044_v48 = vpop.f32.mrb[64].mxu1  ;;  %v5459_v7 = vpop.f32.mrb[43].mxu0 }
0x13e9   : > { %v5542_v13 = vpop.f32.mrb[65].mxu1  ;;  %v5636_v61 = vmul.f32 0.35355338, %v5459_v7  ;;  %v5639_v23 = vmul.f32 0.35355338, %v9044_v48 }
0x13ea   : > { %v5638_v14 = vmul.f32 0.35355338, %v5542_v13  ;;  %v5651_v58 = vsel %vm3180_vm4, %v5637_v37, -inf }
0x13eb   : > { %5652 = vmax.xlane.f32.xlu0 %v5651_v58  ;;  %v5648_v27 = vsel %vm3180_vm4, %v5636_v61, -inf  ;;  %v5657_v32 = vsel %vm3180_vm4, %v5639_v23, -inf }
0x13ec   : > { %v5654_v60 = vsel %vm3180_vm4, %v5638_v14, -inf }
0x13ed   : > { %5655 = vmax.xlane.f32.xlu1 %v5654_v60 }
0x13ef   : > { %5649 = vmax.xlane.f32.xlu0 %v5648_v27  ;;  %v9051_v62 = vpop.f32.mrb[56].mxu0 }
0x13f0   : > { %v5625_v29 = vpop.f32.mrb[57].mxu0  ;;  %v5641_v10 = vmul.f32 0.35355338, %v9051_v62 }
0x13f1   : > { %v5640_v9 = vmul.f32 0.35355338, %v5625_v29 }
0x13f2   : > { %v5663_v54 = vsel %vm3180_vm4, %v5641_v10, -inf }
0x13f3   : > { %5658 = vmax.xlane.f32.xlu0 %v5657_v32  ;;  %v5660_v36 = vsel %vm3180_vm4, %v5640_v9, -inf }
0x13f4   : > { %5661 = vmax.xlane.f32.xlu1 %v5660_v36 }
0x13f7   : > { %5664 = vmax.xlane.f32.xlu0 %v5663_v54 }
0x1402   : > { %v5647_v34 = vpop.xlane.xlu1 %5646 }
0x1403   : > { %v5667_v17 = vsub.f32 %v5635_v30, %v5647_v34  ;;  %v5644_v8 = vpop.xlane.xlu0 %5643 }
0x1404   : > { %v5666_v50 = vsub.f32 %v5634_v49, %v5644_v8 }
0x1405   : > { %v5676_v35 = vmul.f32 1.442695, %v5667_v17  ;;  %9492 = vrot.lane.b32.xlu1 %v11276_v4, %s9915_s24 }
0x1406   : > { %v5674_v33 = vmul.f32 1.442695, %v5666_v50 }
0x1407   : > { %9816 = vpow2.f32 %v5676_v35 }
0x1408   : > { %9818 = vpow2.f32 %v5674_v33 }
0x1411   : > { %v11322_v59 = vpop.eup %9816 }
0x1412   : > { %v5693_v25 = vsel %vm3180_vm4, %v11322_v59, 0.0  ;;  %v9819_v20 = vpop.eup %9818 }
0x1413   : > { %5694 = vadd.xlane.f32.xlu0 %v5693_v25  ;;  %v5690_v51 = vsel %vm3180_vm4, %v9819_v20, 0.0 }
0x1429   : > { %5691 = vadd.xlane.f32.xlu1 %v5690_v51 }
0x1478   : > { %v5653_v6 = vpop.xlane.xlu0 %5652 }
0x1479   : > { %v5669_v22 = vsub.f32 %v5637_v37, %v5653_v6 }
0x147a   : > { %v5656_v31 = vpop.xlane.xlu1 %5655 }
0x147b   : > { %v5680_v15 = vmul.f32 1.442695, %v5669_v22  ;;  %v5670_v55 = vsub.f32 %v5638_v14, %v5656_v31 }
0x147c   : > { %v5650_v63 = vpop.xlane.xlu0 %5649 }
0x147d   : > { %9820 = vpow2.f32 %v5680_v15  ;;  %v5668_v26 = vsub.f32 %v5636_v61, %v5650_v63  ;;  %v5682_v45 = vmul.f32 1.442695, %v5670_v55 }
0x147f   : > { %v5678_v0 = vmul.f32 1.442695, %v5668_v26 }
0x1480   : > { %v5659_v5 = vpop.xlane.xlu0 %5658 }
0x1481   : > { %9822 = vpow2.f32 %v5678_v0  ;;  %v5671_v11 = vsub.f32 %v5639_v23, %v5659_v5  ;;  %v5662_v3 = vpop.xlane.xlu1 %5661 }
0x1482   : > { %v5672_v24 = vsub.f32 %v5640_v9, %v5662_v3  ;;  %9824 = vpow2.f32 %v5682_v45 }
0x1483   : > { %v5684_v30 = vmul.f32 1.442695, %v5671_v11 }
0x1484   : > { %v5686_v21 = vmul.f32 1.442695, %v5672_v24  ;;  %v5665_v49 = vpop.xlane.xlu0 %5664 }
0x1485   : > { %9826 = vpow2.f32 %v5684_v30  ;;  %v5673_v1 = vsub.f32 %v5641_v10, %v5665_v49  ;;  %v9493_v46 = vpop.permute.xlu1 %9492 }
0x1486   : > { %v9495_v19 = vunpack.i.h.bf16 %v9493_v46  ;;  %v9494_v37 = vunpack.i.l.bf16 %v9493_v46  ;;  %9828 = vpow2.f32 %v5686_v21 }
0x1487   : > { %v9821_v48 = vpop.eup %9820  ;;  %v5688_v7 = vmul.f32 1.442695, %v5673_v1 }
0x1488   : > { %v9304_v13 = vpack.c.bf16 %v9495_v19, %v9494_v37  ;;  %v5699_v61 = vsel %vm3180_vm4, %v9821_v48, 0.0 }
0x1489   : > { %9830 = vpow2.f32 %v5688_v7  ;;  %5700 = vadd.xlane.f32.xlu0 %v5699_v61  ;;  %v9724_v7 = vld [vmem:[%s11843_s4 + $0xb0] sm:$0xff]  }
0x148a   : > { %9305 = vmatprep.subr.bf16.mxu1 %v9304_v13 }
0x148b   : > { %v9823_v14 = vpop.eup %9822 }
0x148c   : > { %v5696_v58 = vsel %vm3180_vm4, %v9823_v14, 0.0  ;;  %v9825_v60 = vpop.eup %9824 }
0x148d   : > { %5697 = vadd.xlane.f32.xlu1 %v5696_v58  ;;  %v5702_v62 = vsel %vm3180_vm4, %v9825_v60, 0.0  ;;  %v9725_v58 = vld [vmem:[%s11843_s4 + $0xb8] sm:$0xff]  }
0x148f   : > { %v9827_v23 = vpop.eup %9826 }
0x1490   : > { %v5705_v27 = vsel %vm3180_vm4, %v9827_v23, 0.0  ;;  %v9829_v29 = vpop.eup %9828 }
0x1491   : > { %5706 = vadd.xlane.f32.xlu0 %v5705_v27  ;;  %5703 = vadd.xlane.f32.xlu1 %v5702_v62  ;;  %v5708_v32 = vsel %vm3180_vm4, %v9829_v29, 0.0 }
0x1493   : > { %v9831_v9 = vpop.eup %9830 }
0x1494   : > { %v5711_v10 = vsel %vm3180_vm4, %v9831_v9, 0.0 }
0x1495   : > { %5712 = vadd.xlane.f32.xlu0 %v5711_v10  ;;  %5709 = vadd.xlane.f32.xlu1 %v5708_v32 }
0x14a0   : > { %v5695_v36 = vpop.xlane.xlu0 %5694 }
0x14a1   : > { %9832 = vrcp.f32 %v5695_v36 }
0x14a6   : > { %9502 = vrot.lane.b32.xlu1 %v11276_v4, %s9916_s25 }
0x14ab   : > { %9497 = vrot.lane.b32.xlu0 %v11276_v4, %s9914_s23  ;;  %v9833_v34 = vpop.eup %9832 }
0x14ac   : > { %v5717_v8 = vmul.f32 %v9833_v34, %v11322_v59 }
0x14b6   : > { %v5692_v54 = vpop.xlane.xlu1 %5691 }
0x14b7   : > { %9834 = vrcp.f32 %v5692_v54 }
0x14c1   : > { %v9835_v17 = vpop.eup %9834 }
0x14c2   : > { %v5715_v35 = vmul.f32 %v9835_v17, %v9819_v20 }
0x14c4   : > { %9056 = vmatprep.mubr.msk.f32.mxu1 %vm3180_vm4, %v5715_v35 }
0x14c5   : > { %9057 = vmatmul.mubr.msk.f32.vlgmr.msra.gmra.mrb[66].mxu1 %vm3180_vm4, %v5717_v8 }
0x14c6   : > { %9307 = vmatpush3.bf16.msra.mxu1 %v9304_v13 }
0x1516   : > { %v5701_v25 = vpop.xlane.xlu0 %5700 }
0x1517   : > { %9836 = vrcp.f32 %v5701_v25 }
0x151a   : > { %v5698_v50 = vpop.xlane.xlu1 %5697 }
0x151b   : > { %9838 = vrcp.f32 %v5698_v50 }
0x151e   : > { %v5707_v33 = vpop.xlane.xlu0 %5706  ;;  %v5704_v4 = vpop.xlane.xlu1 %5703 }
0x151f   : > { %9840 = vrcp.f32 %v5707_v33 }
0x1520   : > { %9842 = vrcp.f32 %v5704_v4 }
0x1521   : > { %v9837_v22 = vpop.eup %9836 }
0x1522   : > { %v5713_v51 = vpop.xlane.xlu0 %5712  ;;  %v5710_v6 = vpop.xlane.xlu1 %5709  ;;  %v5721_v59 = vmul.f32 %v9837_v22, %v9821_v48 }
0x1523   : > { %9844 = vrcp.f32 %v5713_v51 }
0x1524   : > { %9846 = vrcp.f32 %v5710_v6 }
0x1525   : > { %v9839_v20 = vpop.eup %9838 }
0x1526   : > { %v9498_v31 = vpop.permute.xlu0 %9497  ;;  %v9503_v15 = vpop.permute.xlu1 %9502  ;;  %v5719_v55 = vmul.f32 %v9839_v20, %v9823_v14  ;;  %v9726_v20 = vld [vmem:[%s11843_s4 + $0xd0] sm:$0xff]  }
0x1527   : > { %v9500_v63 = vunpack.i.h.bf16 %v9498_v31  ;;  %v9499_v26 = vunpack.i.l.bf16 %v9498_v31  ;;  %v9505_v45 = vunpack.i.h.bf16 %v9503_v15  ;;  %v9504_v0 = vunpack.i.l.bf16 %v9503_v15  ;;  %v9727_v31 = vld [vmem:[%s11843_s4 + $0xd8] sm:$0xff]  }
0x1528   : > { %9063 = vmatprep.mubr.msk.f32.mxu1 %vm3180_vm4, %v5719_v55  ;;  %v6088_v15 = vrot.slane %v11269_v18, %v10135_v57 }
0x1529   : > { %v9841_v5 = vpop.eup %9840  ;;  %v9308_v11 = vpack.c.bf16 %v9500_v63, %v9499_v26  ;;  %v9312_v3 = vpack.c.bf16 %v9505_v45, %v9504_v0  ;;  %9064 = vmatmul.mubr.msk.f32.vlgmr.msra.gmra.mrb[68].mxu1 %vm3180_vm4, %v5721_v59 }
0x152a   : > { %v9843_v24 = vpop.eup %9842  ;;  %v5725_v49 = vmul.f32 %v9841_v5, %v9827_v23 }
0x152b   : > { %9309 = vmatprep.subr.bf16.mxu0 %v9308_v11  ;;  %9313 = vmatprep.subr.bf16.mxu1 %v9312_v3  ;;  %v5723_v30 = vmul.f32 %v9843_v24, %v9825_v60 }
0x152c   : > { %9311 = vmatpush3.bf16.msra.mxu0 %v9308_v11  ;;  %9315 = vmatpush3.bf16.msra.mxu1 %v9312_v3 }
0x152d   : > { %v9845_v21 = vpop.eup %9844  ;;  %9070 = vmatprep.mubr.msk.f32.mxu0 %vm3180_vm4, %v5723_v30  ;;  %9080 = vmatprep.subr.bf16.mxu0 %v9912_v47 }
0x152e   : > { %v9847_v1 = vpop.eup %9846  ;;  %v5729_v46 = vmul.f32 %v9845_v21, %v9831_v9  ;;  %9088 = vmatprep.subr.bf16.mxu1 %v9912_v47  ;;  %v6271_v21 = vrot.slane %v11269_v18, %v10104_v42 }
0x152f   : > { %9071 = vmatmul.mubr.msk.f32.vlgmr.msra.gmra.mrb[58].mxu0 %vm3180_vm4, %v5725_v49  ;;  %v5727_v19 = vmul.f32 %v9847_v1, %v9829_v29 }
0x1530   : > { %9084 = vmatprep.mubr.msk.bf16.mxu0 %vm9913_vm0, %v9912_v47  ;;  %9081 = vmatpush3.bf16.msra.mxu0 %v9724_v7 }
0x1531   : > { %9077 = vmatprep.mubr.msk.f32.mxu1 %vm3180_vm4, %v5727_v19  ;;  %9082 = vmatprep.subr.bf16.mxu0 %v9912_v47 }
0x1532   : > { %9078 = vmatmul.mubr.msk.f32.vlgmr.msra.gmra.mrb[70].mxu1 %vm3180_vm4, %v5729_v46 }
0x1533   : > { %9092 = vmatprep.mubr.msk.bf16.mxu1 %vm9913_vm0, %v9912_v47 }
0x1534   : > { %9083 = vmatpush3.bf16.msra.mxu0 %v9725_v58 }
0x1535   : > { %9096 = vmatprep.subr.bf16.mxu0 %v9912_v47 }
0x1598   : > { %v9058_v37 = vpop.f32.mrb[66].mxu1 }
0x1599   : > { %v5802_v48 = vpop.f32.mrb[67].mxu1 }
0x15fc   : > { %v9065_v13 = vpop.f32.mrb[68].mxu1 }
0x15fd   : > { %v5883_v61 = vpop.f32.mrb[69].mxu1 }
0x15fe   : > { %v9506_v14 = vpack.i.bf16 %v9065_v13, %v5883_v61 }
0x1600   : > { %9507 = vrot.lane.b32.xlu1 %v9506_v14, %s9917_s30 }
0x1602   : > { %v9072_v60 = vpop.f32.mrb[58].mxu0 }
0x1603   : > { %v5964_v23 = vpop.f32.mrb[59].mxu0 }
0x1604   : > { %v9511_v27 = vpack.i.bf16 %v9072_v60, %v5964_v23 }
0x1605   : > { %v9079_v62 = vpop.f32.mrb[70].mxu1 }
0x1606   : > { %v6045_v29 = vpop.f32.mrb[71].mxu1  ;;  %9512 = vrot.lane.b32.xlu0 %v9511_v27, %s9918_s11 }
0x1607   : > { %v9516_v9 = vpack.i.bf16 %v9079_v62, %v6045_v29 }
0x1609   : > { %9517 = vrot.lane.b32.xlu1 %v9516_v9, %s9919_s12  ;;  %v9728_v9 = vld [vmem:[%s11843_s4 + $0xc0] sm:$0xff]  }
0x160a   : > { %9089 = vmatpush3.bf16.msra.mxu1 %v9728_v9 }
0x160b   : > { %9090 = vmatprep.subr.bf16.mxu1 %v9912_v47 }
0x1672   : > { %v9508_v10 = vpop.permute.xlu1 %9507 }
0x1673   : > { %v9510_v32 = vunpack.i.h.bf16 %v9508_v10  ;;  %v9509_v36 = vunpack.i.l.bf16 %v9508_v10  ;;  %v9729_v10 = vld [vmem:[%s11843_s4 + $0xc8] sm:$0xff]  }
0x1674   : > { %9091 = vmatpush3.bf16.msra.mxu1 %v9729_v10 }
0x1675   : > { %v6079_v35 = vsel %vm2839_vm2, %v9058_v37, %v9510_v32  ;;  %v6078_v8 = vsel %vm2839_vm2, %v5802_v48, %v9509_v36  ;;  %9104 = vmatprep.subr.bf16.mxu1 %v9912_v47 }
0x1678   : > { %v9513_v54 = vpop.permute.xlu0 %9512 }
0x1679   : > { %v9515_v34 = vunpack.i.h.bf16 %v9513_v54  ;;  %v9514_v17 = vunpack.i.l.bf16 %v9513_v54 }
0x167b   : > { %v6080_v25 = vsel %vm3180_vm4, %v6078_v8, %v9514_v17  ;;  %v6081_v50 = vsel %vm3180_vm4, %v6079_v35, %v9515_v34  ;;  %v9518_v33 = vpop.permute.xlu1 %9517 }
0x167c   : > { %v9520_v4 = vunpack.i.h.bf16 %v9518_v33  ;;  %v9519_v51 = vunpack.i.l.bf16 %v9518_v33  ;;  %v11409_v33 = vld [vmem:[%s11844_s5 + $0x18] sm:$0xff] }
0x167e   : > { %v6083_v6 = vsel %vm3621_vm5, %v6081_v50, %v9520_v4  ;;  %v6082_v22 = vsel %vm3621_vm5, %v6080_v25, %v9519_v51  ;;  %v6176_v51 = vrot.slane %v11409_v33, %v10127_v53 }
0x167f   : > { %v6084_v59 = vpack.c.bf16 %v6083_v6, %v6082_v22 }
0x1681   : > { %9085 = vmatmul.mubr.msk.bf16.vlgmr.msra.gmra.mrb[60].mxu0 %vm2628_vm1, %v6084_v59  ;;  %v6182_v59 = vrot.slane %v11409_v33, %v10132_v56 }
0x1682   : > { %9097 = vmatpush3.bf16.msra.mxu0 %v9726_v20  ;;  %9100 = vmatprep.mubr.msk.bf16.mxu0 %vm9913_vm0, %v9912_v47 }
0x1683   : > { %9098 = vmatprep.subr.bf16.mxu0 %v9912_v47 }
0x1686   : > { %9099 = vmatpush3.bf16.msra.mxu0 %v9727_v31 }
0x1689   : > { %9101 = vmatmul.mubr.msk.bf16.vlgmr.msra.gmra.mrb[64].mxu0 %vm2628_vm1, %v10896_v39 }
0x1754   : > { %v6138_v55 = vpop.f32.mrb[60].mxu0 }
0x1755   : > { %v6139_v63 = vadd.f32 %v6138_v55, %v6088_v15  ;;  %v9086_v26 = vpop.f32.mrb[61].mxu0 }
0x1756   : > { %v6141_v45 = vpop.f32.mrb[62].mxu0 }
0x1757   : > { %v6145_v0 = vadd.f32 %v6139_v63, %v11234_v12  ;;  %v6142_v5 = vadd.f32 %v6141_v45, %v6088_v15  ;;  %v9087_v11 = vpop.f32.mrb[63].mxu0 }
0x1758   : > { %v9730_v11 = vld [vmem:[%s11843_s4 + $0xe0] sm:$0xff]  }
0x1759   : > { %v6146_v3 = vadd.f32 %v6142_v5, %v11236_v38  ;;  %v6147_v24 = vsel %vm2628_vm1, %v6145_v0, 0.0 }
0x175a   : > { %6148 = vadd.xlane.f32.xlu0 %v6147_v24 }
0x175b   : > { %v6150_v30 = vsel %vm2628_vm1, %v6146_v3, 0.0 }
0x175c   : > { %6151 = vadd.xlane.f32.xlu1 %v6150_v30  ;;  %v6318_v49 = vpop.f32.mrb[64].mxu0 }
0x175d   : > { %v9102_v1 = vpop.f32.mrb[65].mxu0  ;;  %v6319_v19 = vadd.f32 %v6318_v49, %v6271_v21 }
0x175e   : > { %v6321_v46 = vpop.f32.mrb[66].mxu0 }
0x175f   : > { %v6322_v37 = vadd.f32 %v6321_v46, %v6271_v21  ;;  %v9103_v48 = vpop.f32.mrb[67].mxu0  ;;  %v9731_v21 = vld [vmem:[%s11843_s4 + $0xe8] sm:$0xff]  }
0x1761   : > { %v9316_v12 = vpack.c.bf16 %v6322_v37, %v6319_v19  ;;  %v9521_v7 = vpack.i.bf16 %v6322_v37, %v6319_v19  ;;  %v6211_v19 = vrot.slane %v11269_v18, %v10101_v41 }
0x1763   : > { %9318 = vmatprep.subr.msk.bf16.mxu0 %vm10903_vm3, %v9316_v12 }
0x1764   : > { %9321 = vmatpush3.bf16.xpose.msk.msra.mxu0 %vm10903_vm3, %v9316_v12 }
0x176d   : > { %9522 = vrot.lane.b32.xlu1 %v9521_v7, %s9915_s24 }
0x1771   : > { %9532 = vrot.lane.b32.xlu1 %v9521_v7, %s9916_s25 }
0x17e7   : > { %v6149_v38 = vpop.xlane.xlu0 %6148 }
0x17e8   : > { %v6153_v13 = vmul.f32 0.03125, %v6149_v38 }
0x17e9   : > { %v6152_v61 = vpop.xlane.xlu1 %6151 }
0x17ea   : > { %v6155_v14 = vsub.f32 %v6145_v0, %v6153_v13  ;;  %v6154_v58 = vmul.f32 0.03125, %v6152_v61 }
0x17ec   : > { %v6156_v60 = vsub.f32 %v6146_v3, %v6154_v58  ;;  %v6157_v23 = vmul.f32 %v6155_v14, %v6155_v14 }
0x17ed   : > { %v9523_v5 = vpop.permute.xlu1 %9522 }
0x17ee   : > { %v6159_v27 = vsel %vm2628_vm1, %v6157_v23, 0.0  ;;  %v6158_v62 = vmul.f32 %v6156_v60, %v6156_v60  ;;  %v9525_v24 = vunpack.i.h.bf16 %v9523_v5  ;;  %v9524_v30 = vunpack.i.l.bf16 %v9523_v5 }
0x17ef   : > { %6160 = vadd.xlane.f32.xlu0 %v6159_v27 }
0x17f0   : > { %v6162_v29 = vsel %vm2628_vm1, %v6158_v62, 0.0 }
0x17f3   : > { %6163 = vadd.xlane.f32.xlu0 %v6162_v29 }
0x1809   : > { %9527 = vrot.lane.b32.xlu0 %v9521_v7, %s9914_s23 }
0x187c   : > { %v6161_v32 = vpop.xlane.xlu0 %6160 }
0x187d   : > { %v6165_v36 = vmul.f32 0.03125, %v6161_v32 }
0x187f   : > { %v6167_v54 = vadd.f32 1e-05, %v6165_v36 }
0x1880   : > { %v6164_v34 = vpop.xlane.xlu0 %6163 }
0x1881   : > { %9848 = vrsqrt.f32 %v6167_v54  ;;  %v6166_v17 = vmul.f32 0.03125, %v6164_v34 }
0x1883   : > { %v6168_v35 = vadd.f32 1e-05, %v6166_v17 }
0x1884   : > { %v9528_v8 = vpop.permute.xlu0 %9527 }
0x1885   : > { %9850 = vrsqrt.f32 %v6168_v35  ;;  %v9530_v25 = vunpack.i.h.bf16 %v9528_v8  ;;  %v9529_v50 = vunpack.i.l.bf16 %v9528_v8 }
0x1887   : > { %v9328_v4 = vpack.c.bf16 %v9530_v25, %v9529_v50 }
0x1889   : > { %9330 = vmatprep.subr.msk.bf16.mxu0 %vm10903_vm3, %v9328_v4 }
0x188b   : > { %v9849_v6 = vpop.eup %9848 }
0x188c   : > { %v6171_v22 = vmul.f32 %v9849_v6, %v6155_v14 }
0x188e   : > { %v6177_v20 = vmul.f32 %v6176_v51, %v6171_v22 }
0x188f   : > { %v9851_v31 = vpop.eup %9850 }
0x1890   : > { %v6172_v15 = vmul.f32 %v9851_v31, %v6156_v60  ;;  %v11417_v63 = vadd.f32 %v6182_v59, %v6177_v20 }
0x1892   : > { %v6178_v55 = vmul.f32 %v6176_v51, %v6172_v15  ;;  %v6185_v45 = vadd.f32 %v11243_v2, %v11417_v63  ;;  %v9322_v2 = vpack.c.bf16 %v9525_v24, %v9524_v30 }
0x1894   : > { %v11419_v26 = vadd.f32 %v6182_v59, %v6178_v55 }
0x1896   : > { %v6186_v0 = vadd.f32 %v11250_v16, %v11419_v26  ;;  %v9533_v16 = vpop.permute.xlu1 %9532 }
0x1897   : > { %v9535_v49 = vunpack.i.h.bf16 %v9533_v16  ;;  %v9534_v1 = vunpack.i.l.bf16 %v9533_v16 }
0x1898   : > { %v6207_v3 = vpack.c.bf16 %v6186_v0, %v6185_v45 }
0x1899   : > { %v9334_v46 = vpack.c.bf16 %v9535_v49, %v9534_v1 }
0x189a   : > { %9093 = vmatmul.mubr.msk.bf16.vlgmr.msra.gmra.mrb[72].mxu1 %vm2628_vm1, %v6207_v3 }
0x189b   : > { %9105 = vmatpush3.bf16.msra.mxu1 %v9730_v11  ;;  %9108 = vmatprep.mubr.msk.bf16.mxu1 %vm9913_vm0, %v9912_v47 }
0x189c   : > { %9106 = vmatprep.subr.bf16.mxu1 %v9912_v47 }
0x189f   : > { %9107 = vmatpush3.bf16.msra.mxu1 %v9731_v21 }
0x18a0   : > { %9324 = vmatprep.subr.msk.bf16.mxu1 %vm10903_vm3, %v9322_v2 }
0x18a2   : > { %9109 = vmatmul.mubr.msk.bf16.vlgmr.msra.gmra.mrb[76].mxu1 %vm2628_vm1, %v10896_v39  ;;  %v6328_v39 = vrot.slane %v11269_v18, %v10107_v43 }
0x18a8   : > { %9327 = vmatpush3.bf16.xpose.msk.msra.mxu1 %vm10903_vm3, %v9322_v2 }
0x18a9   : > { %9336 = vmatprep.subr.msk.bf16.mxu1 %vm10903_vm3, %v9334_v46 }
0x196d   : > { %v6261_v37 = vpop.f32.mrb[72].mxu1 }
0x196e   : > { %v6262_v48 = vadd.f32 %v6261_v37, %v6211_v19  ;;  %v9094_v12 = vpop.f32.mrb[73].mxu1 }
0x196f   : > { %v6264_v7 = vpop.f32.mrb[74].mxu1 }
0x1970   : > { %v6265_v38 = vadd.f32 %v6264_v7, %v6211_v19  ;;  %v9095_v13 = vpop.f32.mrb[75].mxu1  ;;  %9116 = vmatprep.mubr.msk.f32.mxu0 %vm2839_vm2, %v6262_v48  ;;  %6384 = vrot.lane.b32.xlu1 %v6262_v48, %s9915_s24 }
0x1972   : > { %6386 = vrot.lane.b32.xlu0 %v6265_v38, %s9915_s24  ;;  %9117 = vmatmul.mubr.msk.f32.vlgmr.msra.gmra.mrb[68].mxu0 %vm2839_vm2, %v6265_v38 }
0x1973   : > { %9333 = vmatpush3.bf16.xpose.msk.msra.mxu0 %vm10903_vm3, %v9328_v4 }
0x1974   : > { %6388 = vrot.lane.b32.xlu1 %v6262_v48, %s9914_s23 }
0x1975   : > { %v6375_v61 = vpop.f32.mrb[76].mxu1 }
0x1976   : > { %v9110_v14 = vpop.f32.mrb[77].mxu1  ;;  %6390 = vrot.lane.b32.xlu0 %v6265_v38, %s9914_s23  ;;  %v6376_v60 = vadd.f32 %v6375_v61, %v6328_v39 }
0x1977   : > { %v6378_v58 = vpop.f32.mrb[78].mxu1 }
0x1978   : > { %v6379_v23 = vadd.f32 %v6378_v58, %v6328_v39  ;;  %v9111_v27 = vpop.f32.mrb[79].mxu1  ;;  %6392 = vrot.lane.b32.xlu1 %v6262_v48, %s9916_s25 }
0x197a   : > { %6394 = vrot.lane.b32.xlu0 %v6265_v38, %s9916_s25  ;;  %v9340_v62 = vpack.c.bf16 %v6379_v23, %v6376_v60  ;;  %v11457_v29 = vpack.i.bf16 %v6379_v23, %v6376_v60 }
0x197c   : > { %9341 = vmatprep.subr.bf16.mxu0 %v9340_v62 }
0x19e2   : > { %v6385_v9 = vpop.permute.xlu1 %6384 }
0x19e3   : > { %9123 = vmatprep.mubr.msk.f32.mxu1 %vm2839_vm2, %v6385_v9 }
0x19e4   : > { %v6387_v18 = vpop.permute.xlu0 %6386 }
0x19e5   : > { %9124 = vmatmul.mubr.msk.f32.vlgmr.msra.gmra.mrb[80].mxu1 %vm2839_vm2, %v6387_v18 }
0x19e6   : > { %9339 = vmatpush3.bf16.xpose.msk.msra.mxu1 %vm10903_vm3, %v9334_v46  ;;  %v6389_v10 = vpop.permute.xlu1 %6388 }
0x19e7   : > { %9130 = vmatprep.mubr.msk.f32.mxu0 %vm2839_vm2, %v6389_v10 }
0x19e8   : > { %v6391_v32 = vpop.permute.xlu0 %6390 }
0x19e9   : > { %9131 = vmatmul.mubr.msk.f32.vlgmr.msra.gmra.mrb[70].mxu0 %vm2839_vm2, %v6391_v32 }
0x19ea   : > { %9343 = vmatpush3.bf16.msra.mxu0 %v9340_v62  ;;  %v6393_v36 = vpop.permute.xlu1 %6392 }
0x19eb   : > { %9137 = vmatprep.mubr.msk.f32.mxu1 %vm2839_vm2, %v6393_v36 }
0x19ec   : > { %v6395_v54 = vpop.permute.xlu0 %6394 }
0x19ed   : > { %9138 = vmatmul.mubr.msk.f32.vlgmr.msra.gmra.mrb[82].mxu1 %vm2839_vm2, %v6395_v54 }
0x1a45   : > { %v9118_v34 = vpop.f32.mrb[68].mxu0 }
0x1a46   : > { %v6763_v17 = vmul.f32 0.35355338, %v9118_v34  ;;  %v6504_v35 = vpop.f32.mrb[69].mxu0 }
0x1a47   : > { %v6762_v8 = vmul.f32 0.35355338, %v6504_v35 }
0x1a48   : > { %v6773_v28 = vsel %vm3180_vm4, %v6763_v17, -inf }
0x1a49   : > { %6774 = vmax.xlane.f32.xlu0 %v6773_v28  ;;  %v6770_v25 = vsel %vm3180_vm4, %v6762_v8, -inf }
0x1a4a   : > { %6771 = vmax.xlane.f32.xlu1 %v6770_v25 }
0x1ab8   : > { %v9125_v50 = vpop.f32.mrb[80].mxu1 }
0x1ab9   : > { %v6765_v4 = vmul.f32 0.35355338, %v9125_v50  ;;  %v6587_v51 = vpop.f32.mrb[81].mxu1 }
0x1aba   : > { %v6764_v6 = vmul.f32 0.35355338, %v6587_v51 }
0x1abb   : > { %v6779_v22 = vsel %vm3180_vm4, %v6765_v4, -inf }
0x1abc   : > { %6780 = vmax.xlane.f32.xlu1 %v6779_v22  ;;  %v9132_v20 = vpop.f32.mrb[70].mxu0  ;;  %v6776_v59 = vsel %vm3180_vm4, %v6764_v6, -inf }
0x1abd   : > { %v6767_v31 = vmul.f32 0.35355338, %v9132_v20  ;;  %6777 = vmax.xlane.f32.xlu0 %v6776_v59  ;;  %v6670_v15 = vpop.f32.mrb[71].mxu0 }
0x1abe   : > { %v6766_v55 = vmul.f32 0.35355338, %v6670_v15 }
0x1abf   : > { %v6785_v45 = vsel %vm3180_vm4, %v6767_v31, -inf }
0x1ac0   : > { %v9139_v0 = vpop.f32.mrb[82].mxu1  ;;  %6786 = vmax.xlane.f32.xlu1 %v6785_v45  ;;  %v6782_v5 = vsel %vm3180_vm4, %v6766_v55, -inf }
0x1ac1   : > { %v6769_v11 = vmul.f32 0.35355338, %v9139_v0  ;;  %v6753_v3 = vpop.f32.mrb[83].mxu1  ;;  %6783 = vmax.xlane.f32.xlu0 %v6782_v5 }
0x1ac2   : > { %v6768_v24 = vmul.f32 0.35355338, %v6753_v3 }
0x1ac3   : > { %v6791_v30 = vsel %vm3180_vm4, %v6769_v11, -inf }
0x1ac4   : > { %6792 = vmax.xlane.f32.xlu1 %v6791_v30  ;;  %v6788_v21 = vsel %vm3180_vm4, %v6768_v24, -inf }
0x1ac5   : > { %6789 = vmax.xlane.f32.xlu0 %v6788_v21 }
0x1ad6   : > { %v6775_v2 = vpop.xlane.xlu0 %6774 }
0x1ad7   : > { %v6795_v16 = vsub.f32 %v6763_v17, %v6775_v2  ;;  %v6772_v49 = vpop.xlane.xlu1 %6771 }
0x1ad8   : > { %v6794_v1 = vsub.f32 %v6762_v8, %v6772_v49 }
0x1ad9   : > { %v6804_v46 = vmul.f32 1.442695, %v6795_v16 }
0x1ada   : > { %v6802_v19 = vmul.f32 1.442695, %v6794_v1 }
0x1adb   : > { %9852 = vpow2.f32 %v6804_v46 }
0x1adc   : > { %9854 = vpow2.f32 %v6802_v19 }
0x1ae5   : > { %v9853_v37 = vpop.eup %9852 }
0x1ae6   : > { %v9855_v48 = vpop.eup %9854  ;;  %v6821_v12 = vsel %vm3180_vm4, %v9853_v37, 0.0 }
0x1ae7   : > { %6822 = vadd.xlane.f32.xlu1 %v6821_v12  ;;  %v6818_v7 = vsel %vm3180_vm4, %v9855_v48, 0.0 }
0x1ae8   : > { %6819 = vadd.xlane.f32.xlu0 %v6818_v7 }
0x1b49   : > { %v6781_v38 = vpop.xlane.xlu1 %6780 }
0x1b4a   : > { %v6797_v13 = vsub.f32 %v6765_v4, %v6781_v38  ;;  %v6778_v39 = vpop.xlane.xlu0 %6777 }
0x1b4b   : > { %v6796_v61 = vsub.f32 %v6764_v6, %v6778_v39 }
0x1b4c   : > { %v6808_v14 = vmul.f32 1.442695, %v6797_v13 }
0x1b4d   : > { %v6806_v58 = vmul.f32 1.442695, %v6796_v61  ;;  %v6787_v60 = vpop.xlane.xlu1 %6786 }
0x1b4e   : > { %9856 = vpow2.f32 %v6808_v14  ;;  %v6799_v23 = vsub.f32 %v6767_v31, %v6787_v60  ;;  %v6784_v27 = vpop.xlane.xlu0 %6783 }
0x1b4f   : > { %9858 = vpow2.f32 %v6806_v58  ;;  %v6798_v62 = vsub.f32 %v6766_v55, %v6784_v27 }
0x1b50   : > { %v6812_v9 = vmul.f32 1.442695, %v6799_v23 }
0x1b51   : > { %v6810_v18 = vmul.f32 1.442695, %v6798_v62  ;;  %v6793_v10 = vpop.xlane.xlu1 %6792 }
0x1b52   : > { %9860 = vpow2.f32 %v6812_v9  ;;  %v6801_v32 = vsub.f32 %v6769_v11, %v6793_v10  ;;  %v6790_v36 = vpop.xlane.xlu0 %6789 }
0x1b53   : > { %9862 = vpow2.f32 %v6810_v18  ;;  %v6800_v54 = vsub.f32 %v6768_v24, %v6790_v36 }
0x1b54   : > { %v6816_v34 = vmul.f32 1.442695, %v6801_v32 }
0x1b55   : > { %v6814_v17 = vmul.f32 1.442695, %v6800_v54 }
0x1b56   : > { %9864 = vpow2.f32 %v6816_v34 }
0x1b57   : > { %9866 = vpow2.f32 %v6814_v17 }
0x1b58   : > { %v9857_v35 = vpop.eup %9856 }
0x1b59   : > { %v9859_v8 = vpop.eup %9858  ;;  %v6827_v28 = vsel %vm3180_vm4, %v9857_v35, 0.0 }
0x1b5a   : > { %6828 = vadd.xlane.f32.xlu1 %v6827_v28  ;;  %v6824_v25 = vsel %vm3180_vm4, %v9859_v8, 0.0 }
0x1b5b   : > { %6825 = vadd.xlane.f32.xlu0 %v6824_v25 }
0x1b5c   : > { %v9861_v50 = vpop.eup %9860 }
0x1b5d   : > { %v9863_v4 = vpop.eup %9862  ;;  %v6833_v51 = vsel %vm3180_vm4, %v9861_v50, 0.0 }
0x1b5e   : > { %6834 = vadd.xlane.f32.xlu1 %v6833_v51  ;;  %v6830_v6 = vsel %vm3180_vm4, %v9863_v4, 0.0 }
0x1b5f   : > { %6831 = vadd.xlane.f32.xlu0 %v6830_v6 }
0x1b60   : > { %v11481_v22 = vpop.eup %9864 }
0x1b61   : > { %v11483_v20 = vpop.eup %9866  ;;  %v6839_v59 = vsel %vm3180_vm4, %v11481_v22, 0.0 }
0x1b62   : > { %6840 = vadd.xlane.f32.xlu1 %v6839_v59  ;;  %v6836_v31 = vsel %vm3180_vm4, %v11483_v20, 0.0 }
0x1b63   : > { %6837 = vadd.xlane.f32.xlu0 %v6836_v31  ;;  %v11858_v31 = vlaneseq }
0x1b65   : > { %vm11523_vm7 = vcmp.lt.s32.totalorder %v11858_v31, 16  ;;  %vm11658_vm8 = vcmp.ge.s32.totalorder %v11858_v31, 16  ;;  %vm11663_vm9 = vcmp.lt.s32.totalorder %v11858_v31, 32  ;;  %vm11668_vm10 = vcmp.ge.s32.totalorder %v11858_v31, 32 }
0x1b66   : > { %vm11673_vm11 = vcmp.lt.s32.totalorder %v11858_v31, 48  ;;  %vm11678_vm12 = vcmp.ge.s32.totalorder %v11858_v31, 48  ;;  %vm11684_vm13 = vcmp.lt.s32.totalorder %v11858_v31, 64  ;;  %vm7620_vm14 = vmand %vm11658_vm8, %vm11663_vm9  ;;  %vm11816_vm9 = vcmp.ge.s32.totalorder %v11858_v31, 96 }
0x1b67   : > { %vm7628_vm15 = vmand %vm11668_vm10, %vm11673_vm11  ;;  %vm7680_vm10 = vcmp.lt.s32.totalorder %v11858_v31, 112 }
0x1b68   : > { %vm7681_vm11 = vmand %vm11816_vm9, %vm7680_vm10 }
0x1b73   : > { %9542 = vrot.lane.b32.xlu1 %v11457_v29, %s9914_s23 }
0x1b74   : > { %v6823_v15 = vpop.xlane.xlu1 %6822 }
0x1b75   : > { %9868 = vrcp.f32 %v6823_v15  ;;  %v6820_v55 = vpop.xlane.xlu0 %6819 }
0x1b76   : > { %9870 = vrcp.f32 %v6820_v55 }
0x1b77   : > { %9547 = vrot.lane.b32.xlu1 %v11457_v29, %s9916_s25  ;;  %s9925_s25 = smov 96  }
0x1b79   : > { %9537 = vrot.lane.b32.xlu0 %v11457_v29, %s9915_s24  ;;  %s9356_s24 = smul.u32 3, %s11884_s14  ;;  %s9923_s14 = smov 64  }
0x1b7b   : > { %s11519_s28 = scalar_lea.vmem %s11849_s10, %s9356_s24  ;;  %s9922_s24 = smov 48  }
0x1b7f   : > { %v9869_v45 = vpop.eup %9868 }
0x1b80   : > { %v9871_v0 = vpop.eup %9870  ;;  %v6845_v11 = vmul.f32 %v9869_v45, %v9853_v37 }
0x1b81   : > { %v6843_v5 = vmul.f32 %v9871_v0, %v9855_v48 }
0x1b82   : > { %v7219_v10 = vsel %vm3180_vm4, %v6845_v11, 0.0 }
0x1b83   : > { %9144 = vmatprep.mubr.msk.f32.mxu0 %vm3180_vm4, %v6843_v5  ;;  %v7212_v54 = vsel %vm3180_vm4, %v6843_v5, 0.0 }
0x1b84   : > { %9145 = vmatmul.mubr.msk.f32.vlgmr.msra.gmra.mrb[72].mxu0 %vm3180_vm4, %v6845_v11  ;;  %v9732_v11 = vld [vmem:[%s11843_s4 + $0xf0] sm:$0xff]  }
0x1be7   : > { %v6829_v3 = vpop.xlane.xlu1 %6828 }
0x1be8   : > { %9872 = vrcp.f32 %v6829_v3  ;;  %v6826_v24 = vpop.xlane.xlu0 %6825  ;;  %v9733_v3 = vld [vmem:[%s11843_s4 + $0xf8] sm:$0xff]  }
0x1be9   : > { %9874 = vrcp.f32 %v6826_v24 }
0x1beb   : > { %v6835_v30 = vpop.xlane.xlu1 %6834 }
0x1bec   : > { %9876 = vrcp.f32 %v6835_v30  ;;  %v6832_v21 = vpop.xlane.xlu0 %6831 }
0x1bed   : > { %9878 = vrcp.f32 %v6832_v21 }
0x1bef   : > { %v6841_v2 = vpop.xlane.xlu1 %6840 }
0x1bf0   : > { %9880 = vrcp.f32 %v6841_v2  ;;  %v6838_v16 = vpop.xlane.xlu0 %6837 }
0x1bf1   : > { %9882 = vrcp.f32 %v6838_v16 }
0x1bf2   : > { %v9873_v29 = vpop.eup %9872 }
0x1bf3   : > { %v9875_v49 = vpop.eup %9874  ;;  %v6849_v1 = vmul.f32 %v9873_v29, %v9857_v35  ;;  %v9543_v46 = vpop.permute.xlu1 %9542 }
0x1bf4   : > { %v9545_v19 = vunpack.i.h.bf16 %v9543_v46  ;;  %v9544_v37 = vunpack.i.l.bf16 %v9543_v46  ;;  %v9538_v48 = vpop.permute.xlu0 %9537  ;;  %v6847_v12 = vmul.f32 %v9875_v49, %v9859_v8 }
0x1bf5   : > { %v9540_v7 = vunpack.i.h.bf16 %v9538_v48  ;;  %v9539_v38 = vunpack.i.l.bf16 %v9538_v48  ;;  %v7220_v14 = vsel %vm3180_vm4, %v6849_v1, 0.0 }
0x1bf6   : > { %v9877_v13 = vpop.eup %9876  ;;  %v9348_v39 = vpack.c.bf16 %v9545_v19, %v9544_v37  ;;  %9151 = vmatprep.mubr.msk.f32.mxu1 %vm3180_vm4, %v6847_v12  ;;  %v7213_v27 = vsel %vm3180_vm4, %v6847_v12, 0.0  ;;  %v7221_v34 = vadd.f32 %v7220_v14, %v7219_v10 }
0x1bf7   : > { %v9879_v61 = vpop.eup %9878  ;;  %v6853_v58 = vmul.f32 %v9877_v13, %v9861_v50  ;;  %v9344_v60 = vpack.c.bf16 %v9540_v7, %v9539_v38  ;;  %v9548_v23 = vpop.permute.xlu1 %9547  ;;  %v7214_v25 = vadd.f32 %v7213_v27, %v7212_v54 }
0x1bf8   : > { %v9550_v62 = vunpack.i.h.bf16 %v9548_v23  ;;  %v9549_v9 = vunpack.i.l.bf16 %v9548_v23  ;;  %9349 = vmatprep.subr.bf16.mxu0 %v9348_v39  ;;  %v6851_v18 = vmul.f32 %v9879_v61, %v9863_v4 }
0x1bf9   : > { %v7222_v32 = vsel %vm3180_vm4, %v6853_v58, 0.0  ;;  %9345 = vmatprep.subr.bf16.mxu1 %v9344_v60  ;;  %9351 = vmatpush3.bf16.msra.mxu0 %v9348_v39 }
0x1bfa   : > { %v9881_v36 = vpop.eup %9880  ;;  %v9352_v17 = vpack.c.bf16 %v9550_v62, %v9549_v9  ;;  %9347 = vmatpush3.bf16.msra.mxu1 %v9344_v60  ;;  %9158 = vmatprep.mubr.msk.f32.mxu0 %vm3180_vm4, %v6851_v18  ;;  %v7215_v35 = vsel %vm3180_vm4, %v6851_v18, 0.0  ;;  %v7223_v50 = vadd.f32 %v7222_v32, %v7221_v34  ;;  %v9899_v18 = vld [vmem:[%s11844_s5 + $0x10] sm:$0xff] }
0x1bfb   : > { %v9883_v8 = vpop.eup %9882  ;;  %v6857_v28 = vmul.f32 %v9881_v36, %v11481_v22  ;;  %9168 = vmatprep.subr.bf16.mxu0 %v9912_v47  ;;  %v7216_v6 = vadd.f32 %v7215_v35, %v7214_v25  ;;  %v7233_v10 = vrot.slane %v9899_v18, %v10110_v44 }
0x1bfc   : > { %9159 = vmatmul.mubr.msk.f32.vlgmr.msra.gmra.mrb[74].mxu0 %vm3180_vm4, %v6853_v58  ;;  %9353 = vmatprep.subr.bf16.mxu1 %v9352_v17  ;;  %v6855_v4 = vmul.f32 %v9883_v8, %v11483_v20 }
0x1bfd   : > { %v7224_v51 = vsel %vm3180_vm4, %v6857_v28, 0.0  ;;  %9152 = vmatmul.mubr.msk.f32.vlgmr.msra.gmra.mrb[84].mxu1 %vm3180_vm4, %v6849_v1  ;;  %9172 = vmatprep.mubr.msk.bf16.mxu0 %vm9913_vm0, %v9912_v47 }
0x1bfe   : > { %v7225_v59 = vadd.f32 %v7224_v51, %v7223_v50  ;;  %9355 = vmatpush3.bf16.msra.mxu1 %v9352_v17  ;;  %9165 = vmatprep.mubr.msk.f32.mxu1 %vm3180_vm4, %v6855_v4  ;;  %v7217_v22 = vsel %vm3180_vm4, %v6855_v4, 0.0 }
0x1bff   : > { %v7218_v20 = vadd.f32 %v7217_v22, %v7216_v6  ;;  %9176 = vmatprep.subr.bf16.mxu1 %v9912_v47  ;;  %9169 = vmatpush3.bf16.msra.mxu0 %v9732_v11  ;;  %v9735_v11 = vld [vmem:[%s11845_s6 + $0x18] sm:$0xff]  }
0x1c00   : > { %v11527_v55 = vmul.f32 0.25, %v7225_v59  ;;  %9170 = vmatprep.subr.bf16.mxu0 %v9912_v47 }
0x1c01   : > { %v11529_v45 = vmul.f32 0.25, %v7218_v20  ;;  %9166 = vmatmul.mubr.msk.f32.vlgmr.msra.gmra.mrb[86].mxu1 %vm3180_vm4, %v6857_v28 }
0x1c02   : > { %9180 = vmatprep.mubr.msk.bf16.mxu1 %vm9913_vm0, %v9912_v47  ;;  %7691 = vst.msk [vmem:[%s11519_s28 + $0x1] sm:$0x1] %vm11523_vm7, %v11527_v55 }
0x1c03   : > { %7591 = vst.msk [vmem:[%s11519_s28] sm:$0x1] %vm11523_vm7, %v11529_v45  ;;  %9171 = vmatpush3.bf16.msra.mxu0 %v9733_v3  ;;  %v9736_v3 = vld [vmem:[%s11847_s8 + $0x20] sm:$0xff]  }
0x1c04   : > { %9184 = vmatprep.subr.bf16.mxu0 %v9912_v47 }
0x1c57   : > { %v9146_v0 = vpop.f32.mrb[72].mxu0 }
0x1c58   : > { %v6930_v5 = vpop.f32.mrb[73].mxu0 }
0x1ccf   : > { %v9160_v24 = vpop.f32.mrb[74].mxu0 }
0x1cd0   : > { %v9153_v30 = vpop.f32.mrb[84].mxu1  ;;  %v7092_v21 = vpop.f32.mrb[75].mxu0 }
0x1cd1   : > { %v9556_v2 = vpack.i.bf16 %v9160_v24, %v7092_v21  ;;  %v7011_v16 = vpop.f32.mrb[85].mxu1  ;;  %v9737_v24 = vld [vmem:[%s11847_s8 + $0x28] sm:$0xff]  }
0x1cd2   : > { %v9551_v29 = vpack.i.bf16 %v9153_v30, %v7011_v16 }
0x1cd3   : > { %9557 = vrot.lane.b32.xlu1 %v9556_v2, %s9918_s11 }
0x1cd4   : > { %9552 = vrot.lane.b32.xlu0 %v9551_v29, %s9917_s30  ;;  %v9167_v49 = vpop.f32.mrb[86].mxu1 }
0x1cd5   : > { %v7173_v1 = vpop.f32.mrb[87].mxu1 }
0x1cd6   : > { %v9561_v46 = vpack.i.bf16 %v9167_v49, %v7173_v1  ;;  %v7321_v1 = vrot.slane %v11409_v33, %v10135_v57  ;;  %v9739_v57 = vld [vmem:[%s11847_s8 + $0x38] sm:$0xff]  }
0x1cd8   : > { %9562 = vrot.lane.b32.xlu0 %v9561_v46, %s9919_s12 }
0x1d45   : > { %v9558_v37 = vpop.permute.xlu1 %9557 }
0x1d46   : > { %v9553_v19 = vpop.permute.xlu0 %9552  ;;  %v9560_v13 = vunpack.i.h.bf16 %v9558_v37  ;;  %v9559_v39 = vunpack.i.l.bf16 %v9558_v37 }
0x1d47   : > { %v9555_v48 = vunpack.i.h.bf16 %v9553_v19  ;;  %v9554_v12 = vunpack.i.l.bf16 %v9553_v19 }
0x1d49   : > { %v7207_v7 = vsel %vm2839_vm2, %v9146_v0, %v9555_v48  ;;  %v7206_v38 = vsel %vm2839_vm2, %v6930_v5, %v9554_v12  ;;  %vm11708_vm2 = vcmp.lt.s32.totalorder %v11858_v31, 80 }
0x1d4a   : > { %v9563_v61 = vpop.permute.xlu0 %9562  ;;  %v7208_v60 = vsel %vm3180_vm4, %v7206_v38, %v9559_v39  ;;  %v7209_v23 = vsel %vm3180_vm4, %v7207_v7, %v9560_v13  ;;  %v7327_v7 = vrot.slane %v11409_v33, %v10101_v41  ;;  %v8411_v41 = vld [vmem:[%s11846_s7 + $0x1] ss:$0 sm:$0xff]  ;;  %vm11796_vm4 = vcmp.ge.s32.totalorder %v11858_v31, 80 }
0x1d4b   : > { %v9565_v14 = vunpack.i.h.bf16 %v9563_v61  ;;  %v9564_v58 = vunpack.i.l.bf16 %v9563_v61 }
0x1d4d   : > { %v7211_v27 = vsel %vm3621_vm5, %v7209_v23, %v9565_v14  ;;  %v7210_v62 = vsel %vm3621_vm5, %v7208_v60, %v9564_v58  ;;  %v9738_v14 = vld [vmem:[%s11847_s8 + $0x30] sm:$0xff]   ;;  %vm11801_vm5 = vcmp.lt.s32.totalorder %v11858_v31, 96 }
0x1d4e   : > { %v7229_v9 = vpack.c.bf16 %v7211_v27, %v7210_v62  ;;  %vm7673_vm8 = vmand %vm11796_vm4, %vm11801_vm5 }
0x1d50   : > { %9173 = vmatmul.mubr.msk.bf16.vlgmr.msra.gmra.mrb[76].mxu0 %vm2628_vm1, %v7229_v9 }
0x1d51   : > { %9192 = vmatprep.mubr.msk.bf16.mxu0 %vm9913_vm0, %v9912_v47  ;;  %9185 = vmatpush3.bf16.msra.mxu0 %v9736_v3  ;;  %vm7636_vm0 = vmand %vm11678_vm12, %vm11684_vm13  ;;  %vm7687_vm12 = vcmp.ge.s32.totalorder %v11858_v31, 112  ;;  %vm7688_vm13 = vcmp.lt.s32.totalorder %v11858_v31, 128 }
0x1d52   : > { %9186 = vmatprep.subr.bf16.mxu0 %v9912_v47 }
0x1d55   : > { %9187 = vmatpush3.bf16.msra.mxu0 %v9737_v24 }
0x1d56   : > { %9188 = vmatprep.subr.bf16.mxu0 %v9912_v47 }
0x1d59   : > { %9189 = vmatpush3.bf16.msra.mxu0 %v9738_v14 }
0x1d5a   : > { %9190 = vmatprep.subr.bf16.mxu0 %v9912_v47 }
0x1d5d   : > { %9191 = vmatpush3.bf16.msra.mxu0 %v9739_v57 }
0x1e23   : > { %v7283_v32 = vpop.f32.mrb[76].mxu0 }
0x1e24   : > { %v7284_v36 = vadd.f32 %v7283_v32, %v7233_v10  ;;  %v9174_v54 = vpop.f32.mrb[77].mxu0 }
0x1e25   : > { %v7286_v34 = vpop.f32.mrb[78].mxu0 }
0x1e26   : > { %v7290_v17 = vadd.f32 %v7284_v36, %v11417_v63  ;;  %v7287_v35 = vadd.f32 %v7286_v34, %v7233_v10  ;;  %v9175_v8 = vpop.f32.mrb[79].mxu0  ;;  %v7415_v36 = vrot.slane %v11409_v33, %v10124_v52 }
0x1e28   : > { %v7291_v28 = vadd.f32 %v7287_v35, %v11419_v26  ;;  %v7292_v25 = vsel %vm2628_vm1, %v7290_v17, 0.0  ;;  %v9734_v26 = vld [vmem:[%s11845_s6 + $0x10] sm:$0xff]  }
0x1e29   : > { %7293 = vadd.xlane.f32.xlu1 %v7292_v25  ;;  %9177 = vmatpush3.bf16.msra.mxu1 %v9734_v26 }
0x1e2a   : > { %v7295_v50 = vsel %vm2628_vm1, %v7291_v28, 0.0  ;;  %9178 = vmatprep.subr.bf16.mxu1 %v9912_v47 }
0x1e2b   : > { %7296 = vadd.xlane.f32.xlu0 %v7295_v50 }
0x1e2d   : > { %9179 = vmatpush3.bf16.msra.mxu1 %v9735_v11 }
0x1eb6   : > { %v7294_v4 = vpop.xlane.xlu1 %7293 }
0x1eb7   : > { %v7298_v51 = vmul.f32 0.03125, %v7294_v4 }
0x1eb8   : > { %v7297_v6 = vpop.xlane.xlu0 %7296 }
0x1eb9   : > { %v7300_v44 = vsub.f32 %v7290_v17, %v7298_v51  ;;  %v7299_v59 = vmul.f32 0.03125, %v7297_v6 }
0x1ebb   : > { %v7301_v22 = vsub.f32 %v7291_v28, %v7299_v59  ;;  %v7302_v20 = vmul.f32 %v7300_v44, %v7300_v44 }
0x1ebd   : > { %v7304_v0 = vsel %vm2628_vm1, %v7302_v20, 0.0  ;;  %v7303_v63 = vmul.f32 %v7301_v22, %v7301_v22 }
0x1ebe   : > { %7305 = vadd.xlane.f32.xlu0 %v7304_v0 }
0x1ebf   : > { %v7307_v5 = vsel %vm2628_vm1, %v7303_v63, 0.0 }
0x1ec0   : > { %7308 = vadd.xlane.f32.xlu1 %v7307_v5 }
0x1f4b   : > { %v7306_v30 = vpop.xlane.xlu0 %7305 }
0x1f4c   : > { %v7310_v21 = vmul.f32 0.03125, %v7306_v30 }
0x1f4d   : > { %v7309_v2 = vpop.xlane.xlu1 %7308 }
0x1f4e   : > { %v7312_v16 = vadd.f32 1e-05, %v7310_v21  ;;  %v7311_v29 = vmul.f32 0.03125, %v7309_v2  ;;  %v7515_v2 = vrot.slane %v11409_v33, %v10104_v42 }
0x1f50   : > { %9884 = vrsqrt.f32 %v7312_v16  ;;  %v7313_v49 = vadd.f32 1e-05, %v7311_v29 }
0x1f52   : > { %9886 = vrsqrt.f32 %v7313_v49  ;;  %v7521_v49 = vrot.slane %v11409_v33, %v10107_v43 }
0x1f5a   : > { %v9885_v46 = vpop.eup %9884 }
0x1f5b   : > { %v7316_v19 = vmul.f32 %v9885_v46, %v7300_v44 }
0x1f5c   : > { %v9887_v37 = vpop.eup %9886 }
0x1f5d   : > { %v7322_v48 = vmul.f32 %v7321_v1, %v7316_v19  ;;  %v7317_v12 = vmul.f32 %v9887_v37, %v7301_v22 }
0x1f5f   : > { %v7323_v38 = vmul.f32 %v7321_v1, %v7317_v12  ;;  %v7328_v13 = vadd.f32 %v7327_v7, %v7322_v48 }
0x1f61   : > { %v7329_v39 = vadd.f32 %v7327_v7, %v7323_v38 }
0x1f63   : > { %v7330_v61 = vpack.c.bf16 %v7329_v39, %v7328_v13 }
0x1f65   : > { %9181 = vmatmul.mubr.msk.bf16.vlgmr.msra.gmra.mrb[88].mxu1 %vm2628_vm1, %v7330_v61 }
0x2038   : > { %v7393_v58 = vpop.f32.mrb[88].mxu1 }
0x2039   : > { %v7394_v60 = vadd.f32 %v8411_v41, %v7393_v58  ;;  %v9182_v23 = vpop.f32.mrb[89].mxu1 }
0x203a   : > { %v7396_v27 = vpop.f32.mrb[90].mxu1 }
0x203b   : > { %v7397_v62 = vadd.f32 %v8411_v41, %v7396_v27  ;;  %v9183_v9 = vpop.f32.mrb[91].mxu1  ;;  %v7400_v18 = vmax.f32 %v7394_v60, 0.0 }
0x203d   : > { %v7401_v10 = vmax.f32 %v7397_v62, 0.0 }
0x203f   : > { %v7402_v32 = vpack.c.bf16 %v7401_v10, %v7400_v18  ;;  %v9900_v10 = vld [vmem:[%s11842_s3 + $0x20] sm:$0x7] }
0x2041   : > { %9193 = vmatmul.mubr.msk.bf16.vlgmr.msra.gmra.mrb[80].mxu0 %vm4965_vm6, %v7402_v32  ;;  %v7553_v32 = vrot.slane %v9900_v10, %v10127_v53  ;;  %vm7985_vm6 = vcmask 130112  }
0x2114   : > { %v7477_v47 = vpop.f32.mrb[80].mxu0 }
0x2115   : > { %v7478_v54 = vadd.f32 %v7477_v47, %v7415_v36  ;;  %v9194_v34 = vpop.f32.mrb[81].mxu0 }
0x2116   : > { %v7480_v17 = vpop.f32.mrb[82].mxu0 }
0x2117   : > { %v7484_v35 = vadd.f32 %v7478_v54, %v7328_v13  ;;  %v7481_v8 = vadd.f32 %v7480_v17, %v7415_v36  ;;  %v9195_v28 = vpop.f32.mrb[83].mxu0  ;;  %v7559_v54 = vrot.slane %v9900_v10, %v10132_v56  ;;  %v9920_v56 = vmov 1966171168  }
0x2119   : > { %v7485_v25 = vadd.f32 %v7481_v8, %v7329_v39  ;;  %v7486_v50 = vsel %vm2628_vm1, %v7484_v35, 0.0  ;;  %v2586_v8 = vld [vmem:[%s11842_s3 + $0x10] sm:$0xff] }
0x211a   : > { %7487 = vadd.xlane.f32.xlu0 %v7486_v50  ;;  %v2587_v50 = vld [vmem:[%s11842_s3 + $0x18] sm:$0xff] }
0x211b   : > { %v7489_v4 = vsel %vm2628_vm1, %v7485_v25, 0.0 }
0x211c   : > { %7490 = vadd.xlane.f32.xlu1 %v7489_v4 }
0x21a7   : > { %v7488_v51 = vpop.xlane.xlu0 %7487 }
0x21a8   : > { %v7492_v6 = vmul.f32 0.03125, %v7488_v51 }
0x21a9   : > { %v7491_v44 = vpop.xlane.xlu1 %7490 }
0x21aa   : > { %v7494_v59 = vsub.f32 %v7484_v35, %v7492_v6  ;;  %v7493_v22 = vmul.f32 0.03125, %v7491_v44  ;;  %v7594_v44 = vunpack.c.l.s4 %v9920_v56 }
0x21ac   : > { %v7495_v52 = vsub.f32 %v7485_v25, %v7493_v22  ;;  %v7496_v20 = vmul.f32 %v7494_v59, %v7494_v59  ;;  %v7595_v22 = vunpack.c.0.s8 %v7594_v44 }
0x21ae   : > { %v7498_v0 = vsel %vm2628_vm1, %v7496_v20, 0.0  ;;  %v7497_v63 = vmul.f32 %v7495_v52, %v7495_v52 }
0x21af   : > { %7499 = vadd.xlane.f32.xlu0 %v7498_v0  ;;  %v8428_v0 = vld [vmem:[%s11848_s9] ss:$0 sm:$0xff] }
0x21b0   : > { %v7501_v5 = vsel %vm2628_vm1, %v7497_v63, 0.0 }
0x21b1   : > { %7502 = vadd.xlane.f32.xlu1 %v7501_v5 }
0x223c   : > { %v7500_v26 = vpop.xlane.xlu0 %7499 }
0x223d   : > { %v7504_v11 = vmul.f32 0.03125, %v7500_v26 }
0x223e   : > { %v7503_v3 = vpop.xlane.xlu1 %7502 }
0x223f   : > { %v7506_v24 = vadd.f32 1e-05, %v7504_v11  ;;  %v7505_v30 = vmul.f32 0.03125, %v7503_v3 }
0x2241   : > { %9888 = vrsqrt.f32 %v7506_v24  ;;  %v7507_v21 = vadd.f32 1e-05, %v7505_v30  ;;  %v7638_v30 = vcombine.high %v11529_v45, %v11529_v45 }
0x2243   : > { %9890 = vrsqrt.f32 %v7507_v21 }
0x224b   : > { %v9889_v16 = vpop.eup %9888 }
0x224c   : > { %v7510_v29 = vmul.f32 %v9889_v16, %v7494_v59 }
0x224d   : > { %v9891_v1 = vpop.eup %9890 }
0x224e   : > { %v7516_v46 = vmul.f32 %v7515_v2, %v7510_v29  ;;  %v7511_v19 = vmul.f32 %v9891_v1, %v7495_v52  ;;  %v11631_v52 = vsub.s32 %v7595_v22, %v10098_v40 }
0x2250   : > { %v7522_v37 = vadd.f32 %v7521_v49, %v7516_v46  ;;  %v7517_v48 = vmul.f32 %v7515_v2, %v7511_v19  ;;  %v7599_v20 = vrot.slane %v11529_v45, %v11631_v52  ;;  %v7699_v5 = vrot.slane %v11527_v55, %v11631_v52 }
0x2251   : > { %v11649_v29 = vrot.slane %v7638_v30, %v11631_v52 }
0x2252   : > { %v7524_v12 = vsel %vm2628_vm1, %v7522_v37, 0.0  ;;  %v7523_v7 = vadd.f32 %v7521_v49, %v7517_v48  ;;  %v7600_v63 = vcombine.high %v7599_v20, %v7599_v20  ;;  %v7607_v26 = vrot.slane %v7599_v20, %v11631_v52 }
0x2253   : > { %7525 = vadd.xlane.f32.xlu0 %v7524_v12  ;;  %v7700_v3 = vcombine.high %v7699_v5, %v7699_v5  ;;  %v7707_v2 = vrot.slane %v7699_v5, %v11631_v52  ;;  %v11653_v1 = vrot.slane %v11649_v29, %v11631_v52 }
0x2254   : > { %v7527_v38 = vsel %vm2628_vm1, %v7523_v7, 0.0  ;;  %v7614_v11 = vrot.slane %v7600_v63, %v11631_v52  ;;  %v7622_v24 = vcombine.high %v7607_v26, %v7607_v26 }
0x2255   : > { %7528 = vadd.xlane.f32.xlu1 %v7527_v38  ;;  %v7714_v21 = vrot.slane %v7700_v3, %v11631_v52  ;;  %v7719_v49 = vcombine.high %v7707_v2, %v7707_v2 }
0x2256   : > { %v7630_v16 = vcombine.high %v7614_v11, %v7614_v11 }
0x2257   : > { %v7724_v45 = vcombine.high %v7714_v21, %v7714_v21 }
0x22e0   : > { %v7526_v13 = vpop.xlane.xlu0 %7525 }
0x22e1   : > { %v7530_v39 = vmul.f32 0.03125, %v7526_v13 }
0x22e2   : > { %v7529_v42 = vpop.xlane.xlu1 %7528 }
0x22e3   : > { %v7532_v61 = vsub.f32 %v7522_v37, %v7530_v39  ;;  %v7531_v14 = vmul.f32 0.03125, %v7529_v42 }
0x22e5   : > { %v7533_v57 = vsub.f32 %v7523_v7, %v7531_v14  ;;  %v7534_v41 = vmul.f32 %v7532_v61, %v7532_v61 }
0x22e7   : > { %v7536_v43 = vsel %vm2628_vm1, %v7534_v41, 0.0  ;;  %v7535_v33 = vmul.f32 %v7533_v57, %v7533_v57 }
0x22e8   : > { %7537 = vadd.xlane.f32.xlu0 %v7536_v43 }
0x22e9   : > { %v7539_v58 = vsel %vm2628_vm1, %v7535_v33, 0.0 }
0x22ea   : > { %7540 = vadd.xlane.f32.xlu1 %v7539_v58 }
0x2375   : > { %v7538_v60 = vpop.xlane.xlu0 %7537 }
0x2376   : > { %v7542_v23 = vmul.f32 0.03125, %v7538_v60 }
0x2377   : > { %v7541_v27 = vpop.xlane.xlu1 %7540 }
0x2378   : > { %v7544_v62 = vadd.f32 1e-05, %v7542_v23  ;;  %v7543_v9 = vmul.f32 0.03125, %v7541_v27 }
0x237a   : > { %9892 = vrsqrt.f32 %v7544_v62  ;;  %v7545_v18 = vadd.f32 1e-05, %v7543_v9 }
0x237c   : > { %9894 = vrsqrt.f32 %v7545_v18 }
0x2384   : > { %v9893_v36 = vpop.eup %9892 }
0x2385   : > { %v7548_v47 = vmul.f32 %v9893_v36, %v7532_v61 }
0x2386   : > { %v9895_v34 = vpop.eup %9894 }
0x2387   : > { %v7554_v17 = vmul.f32 %v7553_v32, %v7548_v47  ;;  %v7549_v35 = vmul.f32 %v9895_v34, %v7533_v57 }
0x2389   : > { %v7560_v28 = vadd.f32 %v7559_v54, %v7554_v17  ;;  %v7555_v25 = vmul.f32 %v7553_v32, %v7549_v35 }
0x238b   : > { %v7562_v4 = vmul.f32 %v7560_v28, %v2586_v8  ;;  %v7561_v51 = vadd.f32 %v7559_v54, %v7555_v25 }
0x238d   : > { %v7564_v53 = vsel %vm2628_vm1, %v7562_v4, 0.0  ;;  %v7563_v6 = vmul.f32 %v7561_v51, %v2587_v50 }
0x238e   : > { %7565 = vadd.xlane.f32.xlu0 %v7564_v53 }
0x238f   : > { %v7567_v59 = vsel %vm2628_vm1, %v7563_v6, 0.0  ;;  %vm11703_vm1 = vcmp.ge.s32.totalorder %v11858_v31, 64 }
0x2390   : > { %7568 = vadd.xlane.f32.xlu1 %v7567_v59  ;;  %vm7658_vm3 = vmand %vm11703_vm1, %vm11708_vm2 }
0x23a1   : > { %7581 = vbcast.lane.b32.xlu1 %v8428_v0, 264 }
0x23a4   : > { %7577 = vbcast.lane.b32.xlu0 %v8428_v0, 256 }
0x23a5   : > { %7615 = vrot.lane.b32.xlu1 %v7614_v11, %s9918_s11 }
0x23a8   : > { %7623 = vrot.lane.b32.xlu0 %v7622_v24, %s9921_s27 }
0x23a9   : > { %7715 = vrot.lane.b32.xlu1 %v7714_v21, %s9918_s11  ;;  %s9924_s11 = smov 80  }
0x23ac   : > { %7631 = vrot.lane.b32.xlu0 %v7630_v16, %s9922_s24  ;;  %v7729_v16 = vcombine.high %v11527_v55, %v11527_v55 }
0x23ad   : > { %7720 = vrot.lane.b32.xlu1 %v7719_v49, %s9921_s27 }
0x23ae   : > { %v7736_v55 = vrot.slane %v7729_v16, %v11631_v52 }
0x23b0   : > { %7653 = vrot.lane.b32.xlu0 %v11653_v1, %s9923_s14 }
0x23b1   : > { %7725 = vrot.lane.b32.xlu1 %v7724_v45, %s9922_s24 }
0x241b   : > { %v7566_v46 = vpop.xlane.xlu0 %7565 }
0x241d   : > { %v7569_v19 = vpop.xlane.xlu1 %7568 }
0x241f   : > { %v7578_v37 = vpop.permute.xlu0 %7577 }
0x2420   : > { %v7585_v48 = vadd.f32 %v7578_v37, %v7566_v46 }
0x2421   : > { %v7582_v38 = vpop.permute.xlu1 %7581 }
0x2422   : > { %v7772_v61 = vcombine.high %v7585_v48, %v7585_v48  ;;  %v7779_v14 = vrot.slane %v7585_v48, %v11631_v52  ;;  %v7586_v57 = vadd.f32 %v7582_v38, %v7569_v19 }
0x2423   : > { %v7624_v43 = vpop.permute.xlu0 %7623 }
0x2424   : > { %v7786_v33 = vrot.slane %v7772_v61, %v11631_v52  ;;  %v7787_v58 = vcombine.high %v7779_v14, %v7779_v14  ;;  %v7821_v60 = vcombine.high %v7586_v57, %v7586_v57  ;;  %v7828_v23 = vrot.slane %v7586_v57, %v11631_v52 }
0x2425   : > { %v7616_v27 = vpop.permute.xlu1 %7615  ;;  %v7795_v10 = vrot.slane %v7779_v14, %v11631_v52  ;;  %v7660_v61 = vcombine.high %v11649_v29, %v11649_v29  ;;  %v7743_v14 = vrot.slane %v7736_v55, %v11631_v52  ;;  %v7748_v57 = vcombine.high %v7736_v55, %v7736_v55 }
0x2426   : > { %v7788_v18 = vcombine.high %v7786_v33, %v7786_v33  ;;  %v7809_v32 = vrot.slane %v7787_v58, %v11631_v52  ;;  %v7835_v36 = vrot.slane %v7821_v60, %v11631_v52  ;;  %7621 = vst.msk [vmem:[%s11519_s28] sm:$0x1] %vm7620_vm14, %v7616_v27  ;;  %v7802_v47 = vrot.slane %v7786_v33, %v11631_v52 }
0x2427   : > { %v7836_v54 = vcombine.high %v7828_v23, %v7828_v23  ;;  %v7632_v34 = vpop.permute.xlu0 %7631  ;;  %7629 = vst.msk [vmem:[%s11519_s28] sm:$0x1] %vm7628_vm15, %v7624_v43  ;;  %v7844_v25 = vrot.slane %v7828_v23, %v11631_v52  ;;  %v7667_v42 = vrot.slane %v7660_v61, %v11631_v52  ;;  %v7755_v41 = vrot.slane %v7748_v57, %v11631_v52 }
0x2428   : > { %v7816_v17 = vrot.slane %v7788_v18, %v11631_v52  ;;  %v7870_v35 = vcombine.low %v7795_v10, %v7809_v32  ;;  %v8429_v8 = vcombine.high %v7795_v10, %v7809_v32  ;;  %v7837_v28 = vcombine.high %v7835_v36, %v7835_v36  ;;  %7637 = vst.msk [vmem:[%s11519_s28] sm:$0x1] %vm7636_vm0, %v7632_v34 }
0x2429   : > { %v7858_v50 = vrot.slane %v7836_v54, %v11631_v52  ;;  %v7716_v4 = vpop.permute.xlu1 %7715  ;;  %v7851_v44 = vrot.slane %v7835_v36, %v11631_v52  ;;  %v7675_v43 = vcombine.high %v11653_v1, %v11653_v1  ;;  %v7760_v33 = vcombine.high %v7743_v14, %v7743_v14 }
0x242a   : > { %v7872_v51 = vcombine.low %v7802_v47, %v7816_v17  ;;  %v8430_v53 = vcombine.high %v7802_v47, %v7816_v17  ;;  %v7880_v6 = vrot.slane %v7870_v35, %v11631_v52  ;;  %v7887_v56 = vrot.slane %v8429_v8, %v11631_v52  ;;  %7718 = vst.msk [vmem:[%s11519_s28 + $0x1] sm:$0x1] %vm7620_vm14, %v7716_v4  ;;  %vm7689_vm14 = vmand %vm7687_vm12, %vm7688_vm13 }
0x242b   : > { %v7865_v59 = vrot.slane %v7837_v28, %v11631_v52  ;;  %v7919_v22 = vcombine.low %v7844_v25, %v7858_v50  ;;  %v8431_v20 = vcombine.high %v7844_v25, %v7858_v50  ;;  %v7654_v0 = vpop.permute.xlu0 %7653  ;;  %v7683_v29 = vcombine.high %v7667_v42, %v7667_v42 }
0x242c   : > { %v7894_v63 = vrot.slane %v7872_v51, %v11631_v52  ;;  %v7901_v5 = vrot.slane %v8430_v53, %v11631_v52  ;;  %v7902_v26 = vcombine.low %v7880_v6, %v7887_v56  ;;  %7659 = vst.msk [vmem:[%s11519_s28] sm:$0x1] %vm7658_vm3, %v7654_v0  ;;  %v7765_v58 = vcombine.high %v7755_v41, %v7755_v41 }
0x242d   : > { %v7921_v11 = vcombine.low %v7851_v44, %v7865_v59  ;;  %v8432_v3 = vcombine.high %v7851_v44, %v7865_v59  ;;  %v7929_v24 = vrot.slane %v7919_v22, %v11631_v52  ;;  %v7936_v30 = vrot.slane %v8431_v20, %v11631_v52  ;;  %v7721_v21 = vpop.permute.xlu1 %7720 }
0x242e   : > { %7723 = vst.msk [vmem:[%s11519_s28 + $0x1] sm:$0x1] %vm7628_vm15, %v7721_v21  ;;  %v7903_v2 = vcombine.low %v7894_v63, %v7901_v5  ;;  %v7910_v19 = vrot.slane %v7902_v26, %v11631_v52  ;;  %v7975_v60 = vand.u32 127, %v11858_v31 }
0x242f   : > { %v7943_v49 = vrot.slane %v7921_v11, %v11631_v52  ;;  %v7950_v45 = vrot.slane %v8432_v3, %v11631_v52  ;;  %v7951_v46 = vcombine.low %v7929_v24, %v7936_v30 }
0x2430   : > { %v7917_v37 = vrot.slane %v7903_v2, %v11631_v52  ;;  %v7980_v23 = vadd.s32 4294967288, %v7975_v60  ;;  %v7978_v27 = vsub.s32 %v7975_v60, %v10098_v40 }
0x2431   : > { %v7726_v48 = vpop.permute.xlu1 %7725  ;;  %v7952_v12 = vcombine.low %v7943_v49, %v7950_v45  ;;  %v7959_v38 = vrot.slane %v7951_v46, %v11631_v52 }
0x2432   : > { %7728 = vst.msk [vmem:[%s11519_s28 + $0x1] sm:$0x1] %vm7636_vm0, %v7726_v48  ;;  %v7918_v7 = vcombine.low %v7910_v19, %v7917_v37  ;;  %v7983_v1 = vsub.s32 %v7980_v23, %v10098_v40 }
0x2433   : > { %v7966_v13 = vrot.slane %v7952_v12, %v11631_v52 }
0x2434   : > { %7969 = vperm.xlu1 %9566, %v7918_v7  }
0x2435   : > { %v7967_v39 = vcombine.low %v7959_v38, %v7966_v13 }
0x2437   : > { %7972 = vperm.xlu0 %9567, %v7967_v39  }
0x2438   : > { %7744 = vrot.lane.b32.xlu1 %v7743_v14, %s9923_s14 }
0x243b   : > { %7668 = vrot.lane.b32.xlu0 %v7667_v42, %s9924_s11 }
0x243c   : > { %7756 = vrot.lane.b32.xlu1 %v7755_v41, %s9924_s11 }
0x243f   : > { %7676 = vrot.lane.b32.xlu0 %v7675_v43, %s9925_s25 }
0x2440   : > { %7761 = vrot.lane.b32.xlu1 %v7760_v33, %s9925_s25 }
0x2443   : > { %7684 = vrot.lane.b32.xlu0 %v7683_v29, %s9914_s23 }
0x2444   : > { %7766 = vrot.lane.b32.xlu1 %v7765_v58, %s9914_s23 }
0x24b3   : > { %v7970_v18 = vpop.permute.xlu1 %7969 }
0x24b4   : > { %v7979_v47 = vrot.slane %v7970_v18, %v7978_v27 }
0x24b6   : > { %v7973_v36 = vpop.permute.xlu0 %7972 }
0x24b7   : > { %v7984_v54 = vrot.slane %v7973_v36, %v7983_v1  ;;  %v7745_v34 = vpop.permute.xlu1 %7744 }
0x24b8   : > { %7747 = vst.msk [vmem:[%s11519_s28 + $0x1] sm:$0x1] %vm7658_vm3, %v7745_v34 }
0x24b9   : > { %v7986_v40 = vsel %vm7985_vm6, %v7984_v54, %v7979_v47 }
0x24ba   : > { %v7993_v62 = vrot.slane %v7986_v40, %v11631_v52  ;;  %v7669_v9 = vpop.permute.xlu0 %7668 }
0x24bb   : > { %7674 = vst.msk [vmem:[%s11519_s28] sm:$0x1] %vm7673_vm8, %v7669_v9  ;;  %v7757_v35 = vpop.permute.xlu1 %7756 }
0x24bc   : > { %v8000_v8 = vrot.slane %v7993_v62, %v11631_v52  ;;  %7759 = vst.msk [vmem:[%s11519_s28 + $0x1] sm:$0x1] %vm7673_vm8, %v7757_v35 }
0x24be   : > { %8002 = vst.msk [vmem:[%s11519_s28 + $0x2] sm:$0x1] %vm11523_vm7, %v8000_v8  ;;  %v7677_v28 = vpop.permute.xlu0 %7676 }
0x24bf   : > { %7682 = vst.msk [vmem:[%s11519_s28] sm:$0x1] %vm7681_vm11, %v7677_v28  ;;  %v7762_v25 = vpop.permute.xlu1 %7761 }
0x24c0   : > { %7764 = vst.msk [vmem:[%s11519_s28 + $0x1] sm:$0x1] %vm7681_vm11, %v7762_v25 }
0x24c2   : > { %v7685_v50 = vpop.permute.xlu0 %7684 }
0x24c3   : > { %7690 = vst.msk [vmem:[%s11519_s28] sm:$0x1] %vm7689_vm14, %v7685_v50  ;;  %v7767_v4 = vpop.permute.xlu1 %7766 }
0x24c4   : > { %7769 = vst.msk [vmem:[%s11519_s28 + $0x1] sm:$0x1] %vm7689_vm14, %v7767_v4 }
0x24c5 PF: > { %s20_s13 = sadd.s32 1, %s9907_s13  }
0x24c6   : > { %p17_p4 = scmp.ge.s32.totalorder %s20_s13, 4  }
0x24c8   :  { %19 = sbr.rel (!%p17_p4) target bundleno = 1 (0x1), region = 109 }

</bundles_post_ra>
